<compile_context>
chip_gen: v7x
topology: tpu7x:2x2x1
jax: 0.10.0
libtpu: 0.0.40
codegen_flags: <defaults>
</compile_context>

<pallas_src>
import functools

import numpy as np

import jax
import jax.numpy as jnp
from jax.experimental import pallas as pl
from jax.experimental.pallas import tpu as pltpu


def _round_up(x, m):
    return ((x + m - 1) // m) * m


# ----------------------------------------------------------------------------
# Fused bidirectional LSTM layer: hoisted input projection + recurrence.
#   x_ref    : (T*Bp, Din)   layer input, time-major, batch padded to 8
#   m_ref    : (T, Bp, 1)    float validity mask
#   wih_ref  : (Din, GW)     packed input weights, col = gate*HC + dir*H2 + u
#   b_ref    : (1, GW)       packed bias (b_ih + b_hh folded)
#   whh_ref  : (HC, GW)      packed block-diagonal recurrent weights
#   hseq_f   : (T, Bp, HC)   combined state at fwd-time t (lanes [0:H2) valid)
#   hseq_b   : (T, Bp, HC)   combined state at bwd-time t (lanes [H2:HC) valid)
#   hfin     : (Bp, HC)      final [h_fwd | h_bwd]
#   gx_scr   : (T*Bp, GW)    VMEM scratch for the hoisted projection
# Gate order i, f, g, o (PyTorch LSTMCell); HC = 2*H2, GW = 4*HC.
# ----------------------------------------------------------------------------
def _bilstm_layer_kernel(x_ref, m_ref, wih_ref, b_ref, whh_ref,
                         hseq_f_ref, hseq_b_ref, hfin_ref, gx_scr):
    T, Bp, _ = m_ref.shape
    HC = hseq_f_ref.shape[-1]           # combined hidden width = 2 * H2
    H2 = HC // 2                        # per-direction hidden
    GW = wih_ref.shape[-1]              # packed gate width = 4 * HC

    # Hoisted input projection: one MXU matmul for both directions and all
    # timesteps; gx stays in VMEM (no HBM round trip).
    gx_scr[...] = (jnp.dot(x_ref[...], wih_ref[...],
                           preferred_element_type=jnp.float32)
                   + b_ref[...])

    whh = whh_ref[...]                  # (HC, GW) block-diagonal per direction

    # Loop-invariant lane masks (hoisted: broadcast_in_dim is not CSE'd).
    col = jax.lax.broadcasted_iota(jnp.int32, (1, GW), 1)
    fwd_gate_cols = (col % HC) < H2                   # fwd-direction gate lanes
    tanh_cols = (col >= 2 * HC) & (col < 3 * HC)      # the 'g' gate lanes
    hcol = jax.lax.broadcasted_iota(jnp.int32, (1, HC), 1)
    fwd_h_cols = hcol < H2                            # fwd half of h / c

    def step(s, carry):
        h, c = carry                                  # (Bp, HC) vreg carries
        tb = T - 1 - s                                # bwd walks in reverse
        off_s = pl.multiple_of(s * Bp, Bp)
        off_b = pl.multiple_of(tb * Bp, Bp)
        gx_s = gx_scr[pl.ds(off_s, Bp), :]
        gx_b = gx_scr[pl.ds(off_b, Bp), :]
        # fwd lanes take the projection at time s, bwd lanes at time T-1-s.
        gates = jnp.where(fwd_gate_cols, gx_s, gx_b) + jnp.dot(
            h, whh, preferred_element_type=jnp.float32)
        # Two full-width EUP passes + one select instead of four per-gate ones.
        act = jnp.where(tanh_cols, jnp.tanh(gates), jax.nn.sigmoid(gates))
        i_g = act[:, 0 * HC:1 * HC]
        f_g = act[:, 1 * HC:2 * HC]
        g_g = act[:, 2 * HC:3 * HC]
        o_g = act[:, 3 * HC:4 * HC]
        c_new = f_g * c + i_g * g_g
        h_new = o_g * jnp.tanh(c_new)
        # Mask-gated update: padded steps keep the previous state; the fwd
        # half uses mask(s), the bwd half mask(T-1-s).
        valid = jnp.where(fwd_h_cols, m_ref[s], m_ref[tb]) > 0.5
        h = jnp.where(valid, h_new, h)
        c = jnp.where(valid, c_new, c)
        # Full-width lane-dense stores (no masked partial stores).
        hseq_f_ref[s] = h
        hseq_b_ref[tb] = h
        return h, c

    h0 = jnp.zeros((Bp, HC), jnp.float32)
    c0 = jnp.zeros((Bp, HC), jnp.float32)
    h_fin, _ = jax.lax.fori_loop(0, T, step, (h0, c0),
                                 unroll=True if T <= 16 else 8)
    hfin_ref[...] = h_fin


def bilstm_layer(x2d, m, w_ih, b, w_hh, *, T, Bp):
    """x2d: (T*Bp, Din); m: (T, Bp, 1) -> (hseq_f, hseq_b, hfin)."""
    TB, Din = x2d.shape
    HC, GW = w_hh.shape
    return pl.pallas_call(
        _bilstm_layer_kernel,
        out_shape=(jax.ShapeDtypeStruct((T, Bp, HC), jnp.float32),
                   jax.ShapeDtypeStruct((T, Bp, HC), jnp.float32),
                   jax.ShapeDtypeStruct((Bp, HC), jnp.float32)),
        grid_spec=pltpu.PrefetchScalarGridSpec(
            num_scalar_prefetch=0,
            grid=(1,),
            in_specs=[
                pl.BlockSpec((TB, Din), lambda i: (0, 0)),
                pl.BlockSpec((T, Bp, 1), lambda i: (0, 0, 0)),
                pl.BlockSpec((Din, GW), lambda i: (0, 0)),
                pl.BlockSpec((1, GW), lambda i: (0, 0)),
                pl.BlockSpec((HC, GW), lambda i: (0, 0)),
            ],
            out_specs=[
                pl.BlockSpec((T, Bp, HC), lambda i: (0, 0, 0)),
                pl.BlockSpec((T, Bp, HC), lambda i: (0, 0, 0)),
                pl.BlockSpec((Bp, HC), lambda i: (0, 0)),
            ],
            scratch_shapes=[pltpu.VMEM((TB, GW), jnp.float32)],
        ),
        compiler_params=pltpu.CompilerParams(
            dimension_semantics=("arbitrary",),
            vmem_limit_bytes=64 * 1024 * 1024),
    )(x2d, m, w_ih, b, w_hh)


# ----------------------------------------------------------------------------
# Encoder forward (glue in plain JAX, one fused Pallas kernel per layer).
# ----------------------------------------------------------------------------
def encoder_forward(token_ids, mask, packed, *, num_layers, hidden_dim):
    """
    token_ids: (B, T) int32, mask: (B, T) float (1 valid / 0 pad)
    Returns (combined_states (T, B, hidden_dim),
             (final_fwd (B, hidden_dim//2), final_bwd (B, hidden_dim//2))).
    """
    H2 = hidden_dim // 2
    B, T = token_ids.shape
    Bp = _round_up(B, 8)                      # sublane-align the batch
    pad_b = Bp - B
    ids = jnp.pad(token_ids, ((0, pad_b), (0, 0))) if pad_b else token_ids
    msk = jnp.pad(mask, ((0, pad_b), (0, 0))) if pad_b else mask

    # TODO(synk): embedding gather stays in XLA (jnp.take); a Pallas DMA-gather
    # kernel only pays off at much larger vocab / batch sizes.
    emb = jnp.take(packed["embedding"], ids, axis=0)                # (Bp, T, E)
    x = jnp.transpose(emb, (1, 0, 2)).astype(jnp.float32)           # (T, Bp, E)
    m = jnp.transpose(msk, (1, 0))[:, :, None].astype(jnp.float32)  # (T, Bp, 1)

    hfin = None
    for layer in range(num_layers):
        lp = packed["layers"][layer]
        x2d = x.reshape(T * Bp, x.shape[-1])
        hseq_f, hseq_b, hfin = bilstm_layer(
            x2d, m, lp["w_ih"], lp["b"], lp["w_hh"], T=T, Bp=Bp)
        # Next-layer input / final combined states: [h_fwd(t) | h_bwd(t)].
        x = jnp.concatenate([hseq_f[..., :H2], hseq_b[..., H2:]], axis=-1)

    combined = x[:, :B, :]                          # (T, B, 2*H2)
    final_fwd = hfin[:B, :H2]
    final_bwd = hfin[:B, H2:]
    return combined, (final_fwd, final_bwd)


def make_agenda(final_states):
    # Encoder.make_agenda: torch.cat(encoder_output.final_states, 1)
    return jnp.concatenate(final_states, axis=1)


# ----------------------------------------------------------------------------
# Parameters: deterministic synthetic "PyTorch-shaped" params, then packed into
# the lane-packed layouts the kernel consumes.
# ----------------------------------------------------------------------------
def init_params(key, vocab_size, embed_dim, hidden_dim, num_layers):
    assert hidden_dim % 2 == 0
    H2 = hidden_dim // 2
    params = {}
    key, k_emb = jax.random.split(key)
    params["embedding"] = 0.1 * jax.random.normal(
        k_emb, (vocab_size, embed_dim), jnp.float32)
    layers = []
    for layer in range(num_layers):
        din = embed_dim if layer == 0 else hidden_dim
        lp = {}
        for direction in ("fwd", "bwd"):
            key, k1, k2, k3 = jax.random.split(key, 4)
            lp[direction] = dict(
                w_ih=0.1 * jax.random.normal(k1, (din, 4 * H2), jnp.float32),
                w_hh=0.1 * jax.random.normal(k2, (H2, 4 * H2), jnp.float32),
                # PyTorch LSTMCell has b_ih + b_hh; folded into one bias.
                b=0.1 * jax.random.normal(k3, (1, 4 * H2), jnp.float32),
            )
        layers.append(lp)
    params["layers"] = layers
    return params


def pack_params(params, embed_dim, hidden_dim, num_layers):
    """Lane-pack both directions of each layer into one gate tile.

    w_ih : (Din, GW)  col = gate*HC + dir*H2 + unit   (gate order i,f,g,o)
    b    : (1, GW)
    w_hh : (HC, GW)   rows [0:H2)=fwd hidden, [H2:HC)=bwd hidden,
                      block-diagonal within every gate's HC-lane slab
    with H2 = hidden_dim//2, HC = 2*H2, GW = 4*HC (= 128 for hidden_dim=32).
    """
    H2 = hidden_dim // 2
    HC = 2 * H2
    GW = 4 * HC
    packed = {"embedding": params["embedding"]}
    layers = []
    for layer in range(num_layers):
        lp = params["layers"][layer]
        din = embed_dim if layer == 0 else HC

        wib = np.zeros((din, 4, 2, H2), np.float32)
        wib[:, :, 0, :] = np.asarray(lp["fwd"]["w_ih"]).reshape(din, 4, H2)
        wib[:, :, 1, :] = np.asarray(lp["bwd"]["w_ih"]).reshape(din, 4, H2)

        bb = np.zeros((1, 4, 2, H2), np.float32)
        bb[0, :, 0, :] = np.asarray(lp["fwd"]["b"]).reshape(4, H2)
        bb[0, :, 1, :] = np.asarray(lp["bwd"]["b"]).reshape(4, H2)

        whh = np.zeros((2, H2, 4, 2, H2), np.float32)
        whh[0, :, :, 0, :] = np.asarray(lp["fwd"]["w_hh"]).reshape(H2, 4, H2)
        whh[1, :, :, 1, :] = np.asarray(lp["bwd"]["w_hh"]).reshape(H2, 4, H2)

        layers.append(dict(
            w_ih=jnp.asarray(wib.reshape(din, GW)),
            b=jnp.asarray(bb.reshape(1, GW)),
            w_hh=jnp.asarray(whh.reshape(HC, GW)),
        ))
    packed["layers"] = layers
    return packed


# ----------------------------------------------------------------------------
# Pure-JAX reference (mirrors the PyTorch module) for a correctness check.
# ----------------------------------------------------------------------------
def _lstm_dir_ref(x, m, w_ih, w_hh, b):
    T, B, _ = x.shape
    H2 = w_hh.shape[0]
    h0 = jnp.zeros((B, H2), jnp.float32)
    c0 = jnp.zeros((B, H2), jnp.float32)

    def step(carry, inp):
        h, c = carry
        xt, mt = inp
        gates = xt @ w_ih + h @ w_hh + b
        i = jax.nn.sigmoid(gates[:, :H2])
        f = jax.nn.sigmoid(gates[:, H2:2 * H2])
        g = jnp.tanh(gates[:, 2 * H2:3 * H2])
        o = jax.nn.sigmoid(gates[:, 3 * H2:])
        c_new = f * c + i * g
        h_new = o * jnp.tanh(c_new)
        h_u = mt * h_new + (1.0 - mt) * h
        c_u = mt * c_new + (1.0 - mt) * c
        return (h_u, c_u), h_u

    _, hs = jax.lax.scan(step, (h0, c0), (x, m))
    return hs


def encoder_forward_ref(token_ids, mask, params, num_layers):
    emb = jnp.take(params["embedding"], token_ids, axis=0)
    x = jnp.transpose(emb, (1, 0, 2)).astype(jnp.float32)
    m = jnp.transpose(mask, (1, 0))[:, :, None].astype(jnp.float32)
    final_f = final_b = None
    for layer in range(num_layers):
        lp = params["layers"][layer]
        hf = _lstm_dir_ref(x, m, lp["fwd"]["w_ih"], lp["fwd"]["w_hh"], lp["fwd"]["b"])
        hb_rev = _lstm_dir_ref(x[::-1], m[::-1],
                               lp["bwd"]["w_ih"], lp["bwd"]["w_hh"], lp["bwd"]["b"])
        hb = hb_rev[::-1]
        final_f, final_b = hf[-1], hb_rev[-1]
        x = jnp.concatenate([hf, hb], axis=-1)
    return x, (final_f, final_b)


# ----------------------------------------------------------------------------
if __name__ == "__main__":
    VOCAB = 50
    EMBED_DIM = 16
    HIDDEN_DIM = 32          # each direction: 16
    NUM_LAYERS = 2
    B, T = 2, 8

    key = jax.random.PRNGKey(0)
    key, k_ids, k_par = jax.random.split(key, 3)

    params = init_params(k_par, VOCAB, EMBED_DIM, HIDDEN_DIM, NUM_LAYERS)
    packed = pack_params(params, EMBED_DIM, HIDDEN_DIM, NUM_LAYERS)

    # synthetic SequenceBatch: token ids + prefix validity mask (ragged lengths)
    token_ids = jax.random.randint(k_ids, (B, T), 2, VOCAB, dtype=jnp.int32)
    lengths = jnp.array([T, T - 3], dtype=jnp.int32)
    mask = (jnp.arange(T)[None, :] < lengths[:, None]).astype(jnp.float32)
    token_ids = token_ids * mask.astype(jnp.int32)   # pad positions -> id 0

    fwd = jax.jit(functools.partial(
        encoder_forward, num_layers=NUM_LAYERS, hidden_dim=HIDDEN_DIM))
    fwd_ref = jax.jit(functools.partial(
        encoder_forward_ref, num_layers=NUM_LAYERS))

    combined, finals = fwd(token_ids, mask, packed)
    agenda = make_agenda(finals)
    jax.block_until_ready(combined)
    jax.block_until_ready(finals)
    jax.block_until_ready(agenda)

    combined_r, finals_r = fwd_ref(token_ids, mask, params)
    jax.block_until_ready(combined_r)

    assert combined.shape == (T, B, HIDDEN_DIM)
    assert finals[0].shape == (B, HIDDEN_DIM // 2)
    assert finals[1].shape == (B, HIDDEN_DIM // 2)
    assert agenda.shape == (B, HIDDEN_DIM)

    assert bool(jnp.all(jnp.isfinite(combined)))
    assert float(jnp.max(jnp.abs(combined - combined_r))) < 5e-2
    assert float(jnp.max(jnp.abs(finals[0] - finals_r[0]))) < 5e-2
    assert float(jnp.max(jnp.abs(finals[1] - finals_r[1]))) < 5e-2

    print("KERNEL_OK")
</pallas_src>

<mosaic_0001>
module attributes {stable_mosaic.version = 11 : i64} {
  func.func @_bilstm_layer_kernel(%arg0: i32, %arg1: memref<64x32xf32, #tpu.memory_space<vmem>>, %arg2: memref<8x8x1xf32, #tpu.memory_space<vmem>>, %arg3: memref<32x128xf32, #tpu.memory_space<vmem>>, %arg4: memref<1x128xf32, #tpu.memory_space<vmem>>, %arg5: memref<32x128xf32, #tpu.memory_space<vmem>>, %arg6: memref<8x8x32xf32, #tpu.memory_space<vmem>>, %arg7: memref<8x8x32xf32, #tpu.memory_space<vmem>>, %arg8: memref<8x32xf32, #tpu.memory_space<vmem>>, %arg9: memref<64x128xf32, #tpu.memory_space<vmem>>) attributes {dimension_semantics = [#tpu.dimension_semantics<arbitrary>], iteration_bounds = array<i64: 1>, scalar_prefetch = 0 : i64, scratch_operands = 1 : i64, tpu.core_type = #tpu.core_type<tc>, window_params = [{pipeline_mode = #tpu.pipeline_mode<synchronous>, transform_indices = @transform_0, window_bounds = array<i64: 64, 32>}, {pipeline_mode = #tpu.pipeline_mode<synchronous>, transform_indices = @transform_1, window_bounds = array<i64: 8, 8, 1>}, {pipeline_mode = #tpu.pipeline_mode<synchronous>, transform_indices = @transform_2, window_bounds = array<i64: 32, 128>}, {pipeline_mode = #tpu.pipeline_mode<synchronous>, transform_indices = @transform_3, window_bounds = array<i64: 1, 128>}, {pipeline_mode = #tpu.pipeline_mode<synchronous>, transform_indices = @transform_4, window_bounds = array<i64: 32, 128>}, {pipeline_mode = #tpu.pipeline_mode<synchronous>, transform_indices = @transform_5, window_bounds = array<i64: 8, 8, 32>}, {pipeline_mode = #tpu.pipeline_mode<synchronous>, transform_indices = @transform_6, window_bounds = array<i64: 8, 8, 32>}, {pipeline_mode = #tpu.pipeline_mode<synchronous>, transform_indices = @transform_7, window_bounds = array<i64: 8, 32>}]} {
    %c0 = arith.constant 0 : index
    %c0_0 = arith.constant 0 : index
    %0 = vector.load %arg1[%c0, %c0_0] : memref<64x32xf32, #tpu.memory_space<vmem>>, vector<64x32xf32>
    %c0_1 = arith.constant 0 : index
    %c0_2 = arith.constant 0 : index
    %1 = vector.load %arg3[%c0_1, %c0_2] : memref<32x128xf32, #tpu.memory_space<vmem>>, vector<32x128xf32>
    %cst = arith.constant dense<0.000000e+00> : vector<64x128xf32>
    %2 = tpu.matmul %0, %1, %cst {dimension_numbers = #tpu.dot_dimension_numbers<[1], [0], [0], [1], [0, 0, 1, 1], [], []>} : vector<64x32xf32>, vector<32x128xf32>, vector<64x128xf32> -> vector<64x128xf32>
    %c0_3 = arith.constant 0 : index
    %c0_4 = arith.constant 0 : index
    %3 = vector.load %arg4[%c0_3, %c0_4] : memref<1x128xf32, #tpu.memory_space<vmem>>, vector<1x128xf32>
    %4 = vector.broadcast %3 : vector<1x128xf32> to vector<64x128xf32>
    %5 = arith.addf %2, %4 : vector<64x128xf32>
    %c0_5 = arith.constant 0 : index
    %c0_6 = arith.constant 0 : index
    %6 = vector.load %arg9[%c0_5, %c0_6] : memref<64x128xf32, #tpu.memory_space<vmem>>, vector<64x128xf32>
    tpu.vector_store %arg9[%c0_5, %c0_6], %5 {strides = array<i32>} : memref<64x128xf32, #tpu.memory_space<vmem>>, vector<64x128xf32>,
    %c0_7 = arith.constant 0 : index
    %c0_8 = arith.constant 0 : index
    %7 = vector.load %arg5[%c0_7, %c0_8] : memref<32x128xf32, #tpu.memory_space<vmem>>, vector<32x128xf32>
    %8 = tpu.iota {dimensions = array<i32: 1>} : vector<1x128xi32>
    %c32_i32 = arith.constant 32 : i32
    %c0_i32 = arith.constant 0 : i32
    %9 = arith.cmpi eq, %c32_i32, %c0_i32 : i32
    %c1_i32 = arith.constant 1 : i32
    %10 = arith.select %9, %c1_i32, %c32_i32 : i32
    %11 = vector.broadcast %10 : i32 to vector<1x128xi32>
    %12 = arith.remsi %8, %11 : vector<1x128xi32>
    %c0_i32_9 = arith.constant 0 : i32
    %13 = vector.broadcast %c0_i32_9 : i32 to vector<1x128xi32>
    %14 = arith.cmpi ne, %12, %13 : vector<1x128xi32>
    %c0_i32_10 = arith.constant 0 : i32
    %15 = vector.broadcast %c0_i32_10 : i32 to vector<1x128xi32>
    %16 = arith.cmpi slt, %12, %15 : vector<1x128xi32>
    %c0_i32_11 = arith.constant 0 : i32
    %17 = arith.cmpi slt, %10, %c0_i32_11 : i32
    %18 = vector.broadcast %17 : i1 to vector<1x128xi1>
    %19 = vector.broadcast %18 : vector<1x128xi1> to vector<1x128xi1>
    %20 = arith.xori %16, %19 : vector<1x128xi1>
    %21 = arith.andi %20, %14 : vector<1x128xi1>
    %22 = vector.broadcast %10 : i32 to vector<1x128xi32>
    %23 = arith.addi %12, %22 : vector<1x128xi32>
    %24 = arith.select %21, %23, %12 : vector<1x128xi1>, vector<1x128xi32>
    %c16_i32 = arith.constant 16 : i32
    %25 = vector.broadcast %c16_i32 : i32 to vector<1x128xi32>
    %26 = arith.cmpi slt, %24, %25 : vector<1x128xi32>
    %c64_i32 = arith.constant 64 : i32
    %27 = vector.broadcast %c64_i32 : i32 to vector<1x128xi32>
    %28 = arith.cmpi sge, %8, %27 : vector<1x128xi32>
    %c96_i32 = arith.constant 96 : i32
    %29 = vector.broadcast %c96_i32 : i32 to vector<1x128xi32>
    %30 = arith.cmpi slt, %8, %29 : vector<1x128xi32>
    %31 = arith.andi %28, %30 : vector<1x128xi1>
    %32 = tpu.iota {dimensions = array<i32: 1>} : vector<1x32xi32>
    %c16_i32_12 = arith.constant 16 : i32
    %33 = vector.broadcast %c16_i32_12 : i32 to vector<1x32xi32>
    %34 = arith.cmpi slt, %32, %33 : vector<1x32xi32>
    %cst_13 = arith.constant 0.000000e+00 : f32
    %35 = vector.broadcast %cst_13 : f32 to vector<8x32xf32>
    %cst_14 = arith.constant 0.000000e+00 : f32
    %36 = vector.broadcast %cst_14 : f32 to vector<8x32xf32>
    %c0_i32_15 = arith.constant 0 : i32
    %c7_i32 = arith.constant 7 : i32
    %37 = arith.subi %c7_i32, %c0_i32_15 : i32
    %c8_i32 = arith.constant 8 : i32
    %38 = arith.muli %c0_i32_15, %c8_i32 : i32
    %39 = tpu.assume_multiple %38, 8 : i32
    %c8_i32_16 = arith.constant 8 : i32
    %40 = arith.muli %37, %c8_i32_16 : i32
    %41 = tpu.assume_multiple %40, 8 : i32
    %42 = arith.index_cast %39 : i32 to index
    %c0_17 = arith.constant 0 : index
    %43 = vector.load %arg9[%42, %c0_17] : memref<64x128xf32, #tpu.memory_space<vmem>>, vector<8x128xf32>
    %44 = arith.index_cast %41 : i32 to index
    %c0_18 = arith.constant 0 : index
    %45 = vector.load %arg9[%44, %c0_18] : memref<64x128xf32, #tpu.memory_space<vmem>>, vector<8x128xf32>
    %46 = vector.shape_cast %26 : vector<1x128xi1> to vector<1x128xi1>
    %47 = vector.broadcast %46 : vector<1x128xi1> to vector<8x128xi1>
    %48 = arith.select %47, %43, %45 : vector<8x128xi1>, vector<8x128xf32>
    %cst_19 = arith.constant dense<0.000000e+00> : vector<8x128xf32>
    %49 = tpu.matmul %35, %7, %cst_19 {dimension_numbers = #tpu.dot_dimension_numbers<[1], [0], [0], [1], [0, 0, 1, 1], [], []>} : vector<8x32xf32>, vector<32x128xf32>, vector<8x128xf32> -> vector<8x128xf32>
    %50 = arith.addf %48, %49 : vector<8x128xf32>
    %51 = math.tanh %50 : vector<8x128xf32>
    %52 = arith.negf %50 : vector<8x128xf32>
    %53 = math.exp %52 : vector<8x128xf32>
    %cst_20 = arith.constant 1.000000e+00 : f32
    %54 = vector.broadcast %cst_20 : f32 to vector<8x128xf32>
    %55 = arith.addf %54, %53 : vector<8x128xf32>
    %56 = arith.divf %54, %55 : vector<8x128xf32>
    %57 = vector.shape_cast %31 : vector<1x128xi1> to vector<1x128xi1>
    %58 = vector.broadcast %57 : vector<1x128xi1> to vector<8x128xi1>
    %59 = arith.select %58, %51, %56 : vector<8x128xi1>, vector<8x128xf32>
    %60 = vector.extract_strided_slice %59 {offsets = [0, 0], sizes = [8, 32], strides = [1, 1]} : vector<8x128xf32> to vector<8x32xf32>
    %61 = vector.extract_strided_slice %59 {offsets = [0, 32], sizes = [8, 32], strides = [1, 1]} : vector<8x128xf32> to vector<8x32xf32>
    %62 = vector.extract_strided_slice %59 {offsets = [0, 64], sizes = [8, 32], strides = [1, 1]} : vector<8x128xf32> to vector<8x32xf32>
    %63 = vector.extract_strided_slice %59 {offsets = [0, 96], sizes = [8, 32], strides = [1, 1]} : vector<8x128xf32> to vector<8x32xf32>
    %64 = arith.mulf %61, %36 : vector<8x32xf32>
    %65 = arith.mulf %60, %62 : vector<8x32xf32>
    %66 = arith.addf %64, %65 : vector<8x32xf32>
    %67 = math.tanh %66 : vector<8x32xf32>
    %68 = arith.mulf %63, %67 : vector<8x32xf32>
    %69 = arith.index_cast %c0_i32_15 : i32 to index
    %c0_21 = arith.constant 0 : index
    %c0_22 = arith.constant 0 : index
    %70 = vector.load %arg2[%69, %c0_21, %c0_22] : memref<8x8x1xf32, #tpu.memory_space<vmem>>, vector<1x8x1xf32>
    %71 = vector.shape_cast %70 : vector<1x8x1xf32> to vector<8x1xf32>
    %72 = arith.index_cast %37 : i32 to index
    %c0_23 = arith.constant 0 : index
    %c0_24 = arith.constant 0 : index
    %73 = vector.load %arg2[%72, %c0_23, %c0_24] : memref<8x8x1xf32, #tpu.memory_space<vmem>>, vector<1x8x1xf32>
    %74 = vector.shape_cast %73 : vector<1x8x1xf32> to vector<8x1xf32>
    %75 = vector.shape_cast %34 : vector<1x32xi1> to vector<1x32xi1>
    %76 = vector.broadcast %75 : vector<1x32xi1> to vector<8x32xi1>
    %77 = vector.shape_cast %71 : vector<8x1xf32> to vector<8x1xf32>
    %78 = vector.broadcast %77 : vector<8x1xf32> to vector<8x32xf32>
    %79 = vector.shape_cast %74 : vector<8x1xf32> to vector<8x1xf32>
    %80 = vector.broadcast %79 : vector<8x1xf32> to vector<8x32xf32>
    %81 = arith.select %76, %78, %80 : vector<8x32xi1>, vector<8x32xf32>
    %cst_25 = arith.constant 5.000000e-01 : f32
    %82 = vector.broadcast %cst_25 : f32 to vector<8x32xf32>
    %83 = arith.cmpf ogt, %81, %82 : vector<8x32xf32>
    %84 = arith.select %83, %68, %35 : vector<8x32xi1>, vector<8x32xf32>
    %85 = arith.select %83, %66, %36 : vector<8x32xi1>, vector<8x32xf32>
    %86 = arith.index_cast %c0_i32_15 : i32 to index
    %c0_26 = arith.constant 0 : index
    %c0_27 = arith.constant 0 : index
    %87 = vector.load %arg6[%86, %c0_26, %c0_27] : memref<8x8x32xf32, #tpu.memory_space<vmem>>, vector<1x8x32xf32>
    %88 = vector.shape_cast %87 : vector<1x8x32xf32> to vector<8x32xf32>
    %89 = vector.shape_cast %84 : vector<8x32xf32> to vector<1x8x32xf32>
    tpu.vector_store %arg6[%86, %c0_26, %c0_27], %89 {strides = array<i32>} : memref<8x8x32xf32, #tpu.memory_space<vmem>>, vector<1x8x32xf32>,
    %90 = arith.index_cast %37 : i32 to index
    %c0_28 = arith.constant 0 : index
    %c0_29 = arith.constant 0 : index
    %91 = vector.load %arg7[%90, %c0_28, %c0_29] : memref<8x8x32xf32, #tpu.memory_space<vmem>>, vector<1x8x32xf32>
    %92 = vector.shape_cast %91 : vector<1x8x32xf32> to vector<8x32xf32>
    %93 = vector.shape_cast %84 : vector<8x32xf32> to vector<1x8x32xf32>
    tpu.vector_store %arg7[%90, %c0_28, %c0_29], %93 {strides = array<i32>} : memref<8x8x32xf32, #tpu.memory_space<vmem>>, vector<1x8x32xf32>,
    %c1_i32_30 = arith.constant 1 : i32
    %c7_i32_31 = arith.constant 7 : i32
    %94 = arith.subi %c7_i32_31, %c1_i32_30 : i32
    %c8_i32_32 = arith.constant 8 : i32
    %95 = arith.muli %c1_i32_30, %c8_i32_32 : i32
    %96 = tpu.assume_multiple %95, 8 : i32
    %c8_i32_33 = arith.constant 8 : i32
    %97 = arith.muli %94, %c8_i32_33 : i32
    %98 = tpu.assume_multiple %97, 8 : i32
    %99 = arith.index_cast %96 : i32 to index
    %c0_34 = arith.constant 0 : index
    %100 = vector.load %arg9[%99, %c0_34] : memref<64x128xf32, #tpu.memory_space<vmem>>, vector<8x128xf32>
    %101 = arith.index_cast %98 : i32 to index
    %c0_35 = arith.constant 0 : index
    %102 = vector.load %arg9[%101, %c0_35] : memref<64x128xf32, #tpu.memory_space<vmem>>, vector<8x128xf32>
    %103 = vector.shape_cast %26 : vector<1x128xi1> to vector<1x128xi1>
    %104 = vector.broadcast %103 : vector<1x128xi1> to vector<8x128xi1>
    %105 = arith.select %104, %100, %102 : vector<8x128xi1>, vector<8x128xf32>
    %cst_36 = arith.constant dense<0.000000e+00> : vector<8x128xf32>
    %106 = tpu.matmul %84, %7, %cst_36 {dimension_numbers = #tpu.dot_dimension_numbers<[1], [0], [0], [1], [0, 0, 1, 1], [], []>} : vector<8x32xf32>, vector<32x128xf32>, vector<8x128xf32> -> vector<8x128xf32>
    %107 = arith.addf %105, %106 : vector<8x128xf32>
    %108 = math.tanh %107 : vector<8x128xf32>
    %109 = arith.negf %107 : vector<8x128xf32>
    %110 = math.exp %109 : vector<8x128xf32>
    %cst_37 = arith.constant 1.000000e+00 : f32
    %111 = vector.broadcast %cst_37 : f32 to vector<8x128xf32>
    %112 = arith.addf %111, %110 : vector<8x128xf32>
    %113 = arith.divf %111, %112 : vector<8x128xf32>
    %114 = vector.shape_cast %31 : vector<1x128xi1> to vector<1x128xi1>
    %115 = vector.broadcast %114 : vector<1x128xi1> to vector<8x128xi1>
    %116 = arith.select %115, %108, %113 : vector<8x128xi1>, vector<8x128xf32>
    %117 = vector.extract_strided_slice %116 {offsets = [0, 0], sizes = [8, 32], strides = [1, 1]} : vector<8x128xf32> to vector<8x32xf32>
    %118 = vector.extract_strided_slice %116 {offsets = [0, 32], sizes = [8, 32], strides = [1, 1]} : vector<8x128xf32> to vector<8x32xf32>
    %119 = vector.extract_strided_slice %116 {offsets = [0, 64], sizes = [8, 32], strides = [1, 1]} : vector<8x128xf32> to vector<8x32xf32>
    %120 = vector.extract_strided_slice %116 {offsets = [0, 96], sizes = [8, 32], strides = [1, 1]} : vector<8x128xf32> to vector<8x32xf32>
    %121 = arith.mulf %118, %85 : vector<8x32xf32>
    %122 = arith.mulf %117, %119 : vector<8x32xf32>
    %123 = arith.addf %121, %122 : vector<8x32xf32>
    %124 = math.tanh %123 : vector<8x32xf32>
    %125 = arith.mulf %120, %124 : vector<8x32xf32>
    %126 = arith.index_cast %c1_i32_30 : i32 to index
    %c0_38 = arith.constant 0 : index
    %c0_39 = arith.constant 0 : index
    %127 = vector.load %arg2[%126, %c0_38, %c0_39] : memref<8x8x1xf32, #tpu.memory_space<vmem>>, vector<1x8x1xf32>
    %128 = vector.shape_cast %127 : vector<1x8x1xf32> to vector<8x1xf32>
    %129 = arith.index_cast %94 : i32 to index
    %c0_40 = arith.constant 0 : index
    %c0_41 = arith.constant 0 : index
    %130 = vector.load %arg2[%129, %c0_40, %c0_41] : memref<8x8x1xf32, #tpu.memory_space<vmem>>, vector<1x8x1xf32>
    %131 = vector.shape_cast %130 : vector<1x8x1xf32> to vector<8x1xf32>
    %132 = vector.shape_cast %34 : vector<1x32xi1> to vector<1x32xi1>
    %133 = vector.broadcast %132 : vector<1x32xi1> to vector<8x32xi1>
    %134 = vector.shape_cast %128 : vector<8x1xf32> to vector<8x1xf32>
    %135 = vector.broadcast %134 : vector<8x1xf32> to vector<8x32xf32>
    %136 = vector.shape_cast %131 : vector<8x1xf32> to vector<8x1xf32>
    %137 = vector.broadcast %136 : vector<8x1xf32> to vector<8x32xf32>
    %138 = arith.select %133, %135, %137 : vector<8x32xi1>, vector<8x32xf32>
    %cst_42 = arith.constant 5.000000e-01 : f32
    %139 = vector.broadcast %cst_42 : f32 to vector<8x32xf32>
    %140 = arith.cmpf ogt, %138, %139 : vector<8x32xf32>
    %141 = arith.select %140, %125, %84 : vector<8x32xi1>, vector<8x32xf32>
    %142 = arith.select %140, %123, %85 : vector<8x32xi1>, vector<8x32xf32>
    %143 = arith.index_cast %c1_i32_30 : i32 to index
    %c0_43 = arith.constant 0 : index
    %c0_44 = arith.constant 0 : index
    %144 = vector.load %arg6[%143, %c0_43, %c0_44] : memref<8x8x32xf32, #tpu.memory_space<vmem>>, vector<1x8x32xf32>
    %145 = vector.shape_cast %144 : vector<1x8x32xf32> to vector<8x32xf32>
    %146 = vector.shape_cast %141 : vector<8x32xf32> to vector<1x8x32xf32>
    tpu.vector_store %arg6[%143, %c0_43, %c0_44], %146 {strides = array<i32>} : memref<8x8x32xf32, #tpu.memory_space<vmem>>, vector<1x8x32xf32>,
    %147 = arith.index_cast %94 : i32 to index
    %c0_45 = arith.constant 0 : index
    %c0_46 = arith.constant 0 : index
    %148 = vector.load %arg7[%147, %c0_45, %c0_46] : memref<8x8x32xf32, #tpu.memory_space<vmem>>, vector<1x8x32xf32>
    %149 = vector.shape_cast %148 : vector<1x8x32xf32> to vector<8x32xf32>
    %150 = vector.shape_cast %141 : vector<8x32xf32> to vector<1x8x32xf32>
    tpu.vector_store %arg7[%147, %c0_45, %c0_46], %150 {strides = array<i32>} : memref<8x8x32xf32, #tpu.memory_space<vmem>>, vector<1x8x32xf32>,
    %c2_i32 = arith.constant 2 : i32
    %c7_i32_47 = arith.constant 7 : i32
    %151 = arith.subi %c7_i32_47, %c2_i32 : i32
    %c8_i32_48 = arith.constant 8 : i32
    %152 = arith.muli %c2_i32, %c8_i32_48 : i32
    %153 = tpu.assume_multiple %152, 8 : i32
    %c8_i32_49 = arith.constant 8 : i32
    %154 = arith.muli %151, %c8_i32_49 : i32
    %155 = tpu.assume_multiple %154, 8 : i32
    %156 = arith.index_cast %153 : i32 to index
    %c0_50 = arith.constant 0 : index
    %157 = vector.load %arg9[%156, %c0_50] : memref<64x128xf32, #tpu.memory_space<vmem>>, vector<8x128xf32>
    %158 = arith.index_cast %155 : i32 to index
    %c0_51 = arith.constant 0 : index
    %159 = vector.load %arg9[%158, %c0_51] : memref<64x128xf32, #tpu.memory_space<vmem>>, vector<8x128xf32>
    %160 = vector.shape_cast %26 : vector<1x128xi1> to vector<1x128xi1>
    %161 = vector.broadcast %160 : vector<1x128xi1> to vector<8x128xi1>
    %162 = arith.select %161, %157, %159 : vector<8x128xi1>, vector<8x128xf32>
    %cst_52 = arith.constant dense<0.000000e+00> : vector<8x128xf32>
    %163 = tpu.matmul %141, %7, %cst_52 {dimension_numbers = #tpu.dot_dimension_numbers<[1], [0], [0], [1], [0, 0, 1, 1], [], []>} : vector<8x32xf32>, vector<32x128xf32>, vector<8x128xf32> -> vector<8x128xf32>
    %164 = arith.addf %162, %163 : vector<8x128xf32>
    %165 = math.tanh %164 : vector<8x128xf32>
    %166 = arith.negf %164 : vector<8x128xf32>
    %167 = math.exp %166 : vector<8x128xf32>
    %cst_53 = arith.constant 1.000000e+00 : f32
    %168 = vector.broadcast %cst_53 : f32 to vector<8x128xf32>
    %169 = arith.addf %168, %167 : vector<8x128xf32>
    %170 = arith.divf %168, %169 : vector<8x128xf32>
    %171 = vector.shape_cast %31 : vector<1x128xi1> to vector<1x128xi1>
    %172 = vector.broadcast %171 : vector<1x128xi1> to vector<8x128xi1>
    %173 = arith.select %172, %165, %170 : vector<8x128xi1>, vector<8x128xf32>
    %174 = vector.extract_strided_slice %173 {offsets = [0, 0], sizes = [8, 32], strides = [1, 1]} : vector<8x128xf32> to vector<8x32xf32>
    %175 = vector.extract_strided_slice %173 {offsets = [0, 32], sizes = [8, 32], strides = [1, 1]} : vector<8x128xf32> to vector<8x32xf32>
    %176 = vector.extract_strided_slice %173 {offsets = [0, 64], sizes = [8, 32], strides = [1, 1]} : vector<8x128xf32> to vector<8x32xf32>
    %177 = vector.extract_strided_slice %173 {offsets = [0, 96], sizes = [8, 32], strides = [1, 1]} : vector<8x128xf32> to vector<8x32xf32>
    %178 = arith.mulf %175, %142 : vector<8x32xf32>
    %179 = arith.mulf %174, %176 : vector<8x32xf32>
    %180 = arith.addf %178, %179 : vector<8x32xf32>
    %181 = math.tanh %180 : vector<8x32xf32>
    %182 = arith.mulf %177, %181 : vector<8x32xf32>
    %183 = arith.index_cast %c2_i32 : i32 to index
    %c0_54 = arith.constant 0 : index
    %c0_55 = arith.constant 0 : index
    %184 = vector.load %arg2[%183, %c0_54, %c0_55] : memref<8x8x1xf32, #tpu.memory_space<vmem>>, vector<1x8x1xf32>
    %185 = vector.shape_cast %184 : vector<1x8x1xf32> to vector<8x1xf32>
    %186 = arith.index_cast %151 : i32 to index
    %c0_56 = arith.constant 0 : index
    %c0_57 = arith.constant 0 : index
    %187 = vector.load %arg2[%186, %c0_56, %c0_57] : memref<8x8x1xf32, #tpu.memory_space<vmem>>, vector<1x8x1xf32>
    %188 = vector.shape_cast %187 : vector<1x8x1xf32> to vector<8x1xf32>
    %189 = vector.shape_cast %34 : vector<1x32xi1> to vector<1x32xi1>
    %190 = vector.broadcast %189 : vector<1x32xi1> to vector<8x32xi1>
    %191 = vector.shape_cast %185 : vector<8x1xf32> to vector<8x1xf32>
    %192 = vector.broadcast %191 : vector<8x1xf32> to vector<8x32xf32>
    %193 = vector.shape_cast %188 : vector<8x1xf32> to vector<8x1xf32>
    %194 = vector.broadcast %193 : vector<8x1xf32> to vector<8x32xf32>
    %195 = arith.select %190, %192, %194 : vector<8x32xi1>, vector<8x32xf32>
    %cst_58 = arith.constant 5.000000e-01 : f32
    %196 = vector.broadcast %cst_58 : f32 to vector<8x32xf32>
    %197 = arith.cmpf ogt, %195, %196 : vector<8x32xf32>
    %198 = arith.select %197, %182, %141 : vector<8x32xi1>, vector<8x32xf32>
    %199 = arith.select %197, %180, %142 : vector<8x32xi1>, vector<8x32xf32>
    %200 = arith.index_cast %c2_i32 : i32 to index
    %c0_59 = arith.constant 0 : index
    %c0_60 = arith.constant 0 : index
    %201 = vector.load %arg6[%200, %c0_59, %c0_60] : memref<8x8x32xf32, #tpu.memory_space<vmem>>, vector<1x8x32xf32>
    %202 = vector.shape_cast %201 : vector<1x8x32xf32> to vector<8x32xf32>
    %203 = vector.shape_cast %198 : vector<8x32xf32> to vector<1x8x32xf32>
    tpu.vector_store %arg6[%200, %c0_59, %c0_60], %203 {strides = array<i32>} : memref<8x8x32xf32, #tpu.memory_space<vmem>>, vector<1x8x32xf32>,
    %204 = arith.index_cast %151 : i32 to index
    %c0_61 = arith.constant 0 : index
    %c0_62 = arith.constant 0 : index
    %205 = vector.load %arg7[%204, %c0_61, %c0_62] : memref<8x8x32xf32, #tpu.memory_space<vmem>>, vector<1x8x32xf32>
    %206 = vector.shape_cast %205 : vector<1x8x32xf32> to vector<8x32xf32>
    %207 = vector.shape_cast %198 : vector<8x32xf32> to vector<1x8x32xf32>
    tpu.vector_store %arg7[%204, %c0_61, %c0_62], %207 {strides = array<i32>} : memref<8x8x32xf32, #tpu.memory_space<vmem>>, vector<1x8x32xf32>,
    %c3_i32 = arith.constant 3 : i32
    %c7_i32_63 = arith.constant 7 : i32
    %208 = arith.subi %c7_i32_63, %c3_i32 : i32
    %c8_i32_64 = arith.constant 8 : i32
    %209 = arith.muli %c3_i32, %c8_i32_64 : i32
    %210 = tpu.assume_multiple %209, 8 : i32
    %c8_i32_65 = arith.constant 8 : i32
    %211 = arith.muli %208, %c8_i32_65 : i32
    %212 = tpu.assume_multiple %211, 8 : i32
    %213 = arith.index_cast %210 : i32 to index
    %c0_66 = arith.constant 0 : index
    %214 = vector.load %arg9[%213, %c0_66] : memref<64x128xf32, #tpu.memory_space<vmem>>, vector<8x128xf32>
    %215 = arith.index_cast %212 : i32 to index
    %c0_67 = arith.constant 0 : index
    %216 = vector.load %arg9[%215, %c0_67] : memref<64x128xf32, #tpu.memory_space<vmem>>, vector<8x128xf32>
    %217 = vector.shape_cast %26 : vector<1x128xi1> to vector<1x128xi1>
    %218 = vector.broadcast %217 : vector<1x128xi1> to vector<8x128xi1>
    %219 = arith.select %218, %214, %216 : vector<8x128xi1>, vector<8x128xf32>
    %cst_68 = arith.constant dense<0.000000e+00> : vector<8x128xf32>
    %220 = tpu.matmul %198, %7, %cst_68 {dimension_numbers = #tpu.dot_dimension_numbers<[1], [0], [0], [1], [0, 0, 1, 1], [], []>} : vector<8x32xf32>, vector<32x128xf32>, vector<8x128xf32> -> vector<8x128xf32>
    %221 = arith.addf %219, %220 : vector<8x128xf32>
    %222 = math.tanh %221 : vector<8x128xf32>
    %223 = arith.negf %221 : vector<8x128xf32>
    %224 = math.exp %223 : vector<8x128xf32>
    %cst_69 = arith.constant 1.000000e+00 : f32
    %225 = vector.broadcast %cst_69 : f32 to vector<8x128xf32>
    %226 = arith.addf %225, %224 : vector<8x128xf32>
    %227 = arith.divf %225, %226 : vector<8x128xf32>
    %228 = vector.shape_cast %31 : vector<1x128xi1> to vector<1x128xi1>
    %229 = vector.broadcast %228 : vector<1x128xi1> to vector<8x128xi1>
    %230 = arith.select %229, %222, %227 : vector<8x128xi1>, vector<8x128xf32>
    %231 = vector.extract_strided_slice %230 {offsets = [0, 0], sizes = [8, 32], strides = [1, 1]} : vector<8x128xf32> to vector<8x32xf32>
    %232 = vector.extract_strided_slice %230 {offsets = [0, 32], sizes = [8, 32], strides = [1, 1]} : vector<8x128xf32> to vector<8x32xf32>
    %233 = vector.extract_strided_slice %230 {offsets = [0, 64], sizes = [8, 32], strides = [1, 1]} : vector<8x128xf32> to vector<8x32xf32>
    %234 = vector.extract_strided_slice %230 {offsets = [0, 96], sizes = [8, 32], strides = [1, 1]} : vector<8x128xf32> to vector<8x32xf32>
    %235 = arith.mulf %232, %199 : vector<8x32xf32>
    %236 = arith.mulf %231, %233 : vector<8x32xf32>
    %237 = arith.addf %235, %236 : vector<8x32xf32>
    %238 = math.tanh %237 : vector<8x32xf32>
    %239 = arith.mulf %234, %238 : vector<8x32xf32>
    %240 = arith.index_cast %c3_i32 : i32 to index
    %c0_70 = arith.constant 0 : index
    %c0_71 = arith.constant 0 : index
    %241 = vector.load %arg2[%240, %c0_70, %c0_71] : memref<8x8x1xf32, #tpu.memory_space<vmem>>, vector<1x8x1xf32>
    %242 = vector.shape_cast %241 : vector<1x8x1xf32> to vector<8x1xf32>
    %243 = arith.index_cast %208 : i32 to index
    %c0_72 = arith.constant 0 : index
    %c0_73 = arith.constant 0 : index
    %244 = vector.load %arg2[%243, %c0_72, %c0_73] : memref<8x8x1xf32, #tpu.memory_space<vmem>>, vector<1x8x1xf32>
    %245 = vector.shape_cast %244 : vector<1x8x1xf32> to vector<8x1xf32>
    %246 = vector.shape_cast %34 : vector<1x32xi1> to vector<1x32xi1>
    %247 = vector.broadcast %246 : vector<1x32xi1> to vector<8x32xi1>
    %248 = vector.shape_cast %242 : vector<8x1xf32> to vector<8x1xf32>
    %249 = vector.broadcast %248 : vector<8x1xf32> to vector<8x32xf32>
    %250 = vector.shape_cast %245 : vector<8x1xf32> to vector<8x1xf32>
    %251 = vector.broadcast %250 : vector<8x1xf32> to vector<8x32xf32>
    %252 = arith.select %247, %249, %251 : vector<8x32xi1>, vector<8x32xf32>
    %cst_74 = arith.constant 5.000000e-01 : f32
    %253 = vector.broadcast %cst_74 : f32 to vector<8x32xf32>
    %254 = arith.cmpf ogt, %252, %253 : vector<8x32xf32>
    %255 = arith.select %254, %239, %198 : vector<8x32xi1>, vector<8x32xf32>
    %256 = arith.select %254, %237, %199 : vector<8x32xi1>, vector<8x32xf32>
    %257 = arith.index_cast %c3_i32 : i32 to index
    %c0_75 = arith.constant 0 : index
    %c0_76 = arith.constant 0 : index
    %258 = vector.load %arg6[%257, %c0_75, %c0_76] : memref<8x8x32xf32, #tpu.memory_space<vmem>>, vector<1x8x32xf32>
    %259 = vector.shape_cast %258 : vector<1x8x32xf32> to vector<8x32xf32>
    %260 = vector.shape_cast %255 : vector<8x32xf32> to vector<1x8x32xf32>
    tpu.vector_store %arg6[%257, %c0_75, %c0_76], %260 {strides = array<i32>} : memref<8x8x32xf32, #tpu.memory_space<vmem>>, vector<1x8x32xf32>,
    %261 = arith.index_cast %208 : i32 to index
    %c0_77 = arith.constant 0 : index
    %c0_78 = arith.constant 0 : index
    %262 = vector.load %arg7[%261, %c0_77, %c0_78] : memref<8x8x32xf32, #tpu.memory_space<vmem>>, vector<1x8x32xf32>
    %263 = vector.shape_cast %262 : vector<1x8x32xf32> to vector<8x32xf32>
    %264 = vector.shape_cast %255 : vector<8x32xf32> to vector<1x8x32xf32>
    tpu.vector_store %arg7[%261, %c0_77, %c0_78], %264 {strides = array<i32>} : memref<8x8x32xf32, #tpu.memory_space<vmem>>, vector<1x8x32xf32>,
    %c4_i32 = arith.constant 4 : i32
    %c7_i32_79 = arith.constant 7 : i32
    %265 = arith.subi %c7_i32_79, %c4_i32 : i32
    %c8_i32_80 = arith.constant 8 : i32
    %266 = arith.muli %c4_i32, %c8_i32_80 : i32
    %267 = tpu.assume_multiple %266, 8 : i32
    %c8_i32_81 = arith.constant 8 : i32
    %268 = arith.muli %265, %c8_i32_81 : i32
    %269 = tpu.assume_multiple %268, 8 : i32
    %270 = arith.index_cast %267 : i32 to index
    %c0_82 = arith.constant 0 : index
    %271 = vector.load %arg9[%270, %c0_82] : memref<64x128xf32, #tpu.memory_space<vmem>>, vector<8x128xf32>
    %272 = arith.index_cast %269 : i32 to index
    %c0_83 = arith.constant 0 : index
    %273 = vector.load %arg9[%272, %c0_83] : memref<64x128xf32, #tpu.memory_space<vmem>>, vector<8x128xf32>
    %274 = vector.shape_cast %26 : vector<1x128xi1> to vector<1x128xi1>
    %275 = vector.broadcast %274 : vector<1x128xi1> to vector<8x128xi1>
    %276 = arith.select %275, %271, %273 : vector<8x128xi1>, vector<8x128xf32>
    %cst_84 = arith.constant dense<0.000000e+00> : vector<8x128xf32>
    %277 = tpu.matmul %255, %7, %cst_84 {dimension_numbers = #tpu.dot_dimension_numbers<[1], [0], [0], [1], [0, 0, 1, 1], [], []>} : vector<8x32xf32>, vector<32x128xf32>, vector<8x128xf32> -> vector<8x128xf32>
    %278 = arith.addf %276, %277 : vector<8x128xf32>
    %279 = math.tanh %278 : vector<8x128xf32>
    %280 = arith.negf %278 : vector<8x128xf32>
    %281 = math.exp %280 : vector<8x128xf32>
    %cst_85 = arith.constant 1.000000e+00 : f32
    %282 = vector.broadcast %cst_85 : f32 to vector<8x128xf32>
    %283 = arith.addf %282, %281 : vector<8x128xf32>
    %284 = arith.divf %282, %283 : vector<8x128xf32>
    %285 = vector.shape_cast %31 : vector<1x128xi1> to vector<1x128xi1>
    %286 = vector.broadcast %285 : vector<1x128xi1> to vector<8x128xi1>
    %287 = arith.select %286, %279, %284 : vector<8x128xi1>, vector<8x128xf32>
    %288 = vector.extract_strided_slice %287 {offsets = [0, 0], sizes = [8, 32], strides = [1, 1]} : vector<8x128xf32> to vector<8x32xf32>
    %289 = vector.extract_strided_slice %287 {offsets = [0, 32], sizes = [8, 32], strides = [1, 1]} : vector<8x128xf32> to vector<8x32xf32>
    %290 = vector.extract_strided_slice %287 {offsets = [0, 64], sizes = [8, 32], strides = [1, 1]} : vector<8x128xf32> to vector<8x32xf32>
    %291 = vector.extract_strided_slice %287 {offsets = [0, 96], sizes = [8, 32], strides = [1, 1]} : vector<8x128xf32> to vector<8x32xf32>
    %292 = arith.mulf %289, %256 : vector<8x32xf32>
    %293 = arith.mulf %288, %290 : vector<8x32xf32>
    %294 = arith.addf %292, %293 : vector<8x32xf32>
    %295 = math.tanh %294 : vector<8x32xf32>
    %296 = arith.mulf %291, %295 : vector<8x32xf32>
    %297 = arith.index_cast %c4_i32 : i32 to index
    %c0_86 = arith.constant 0 : index
    %c0_87 = arith.constant 0 : index
    %298 = vector.load %arg2[%297, %c0_86, %c0_87] : memref<8x8x1xf32, #tpu.memory_space<vmem>>, vector<1x8x1xf32>
    %299 = vector.shape_cast %298 : vector<1x8x1xf32> to vector<8x1xf32>
    %300 = arith.index_cast %265 : i32 to index
    %c0_88 = arith.constant 0 : index
    %c0_89 = arith.constant 0 : index
    %301 = vector.load %arg2[%300, %c0_88, %c0_89] : memref<8x8x1xf32, #tpu.memory_space<vmem>>, vector<1x8x1xf32>
    %302 = vector.shape_cast %301 : vector<1x8x1xf32> to vector<8x1xf32>
    %303 = vector.shape_cast %34 : vector<1x32xi1> to vector<1x32xi1>
    %304 = vector.broadcast %303 : vector<1x32xi1> to vector<8x32xi1>
    %305 = vector.shape_cast %299 : vector<8x1xf32> to vector<8x1xf32>
    %306 = vector.broadcast %305 : vector<8x1xf32> to vector<8x32xf32>
    %307 = vector.shape_cast %302 : vector<8x1xf32> to vector<8x1xf32>
    %308 = vector.broadcast %307 : vector<8x1xf32> to vector<8x32xf32>
    %309 = arith.select %304, %306, %308 : vector<8x32xi1>, vector<8x32xf32>
    %cst_90 = arith.constant 5.000000e-01 : f32
    %310 = vector.broadcast %cst_90 : f32 to vector<8x32xf32>
    %311 = arith.cmpf ogt, %309, %310 : vector<8x32xf32>
    %312 = arith.select %311, %296, %255 : vector<8x32xi1>, vector<8x32xf32>
    %313 = arith.select %311, %294, %256 : vector<8x32xi1>, vector<8x32xf32>
    %314 = arith.index_cast %c4_i32 : i32 to index
    %c0_91 = arith.constant 0 : index
    %c0_92 = arith.constant 0 : index
    %315 = vector.load %arg6[%314, %c0_91, %c0_92] : memref<8x8x32xf32, #tpu.memory_space<vmem>>, vector<1x8x32xf32>
    %316 = vector.shape_cast %315 : vector<1x8x32xf32> to vector<8x32xf32>
    %317 = vector.shape_cast %312 : vector<8x32xf32> to vector<1x8x32xf32>
    tpu.vector_store %arg6[%314, %c0_91, %c0_92], %317 {strides = array<i32>} : memref<8x8x32xf32, #tpu.memory_space<vmem>>, vector<1x8x32xf32>,
    %318 = arith.index_cast %265 : i32 to index
    %c0_93 = arith.constant 0 : index
    %c0_94 = arith.constant 0 : index
    %319 = vector.load %arg7[%318, %c0_93, %c0_94] : memref<8x8x32xf32, #tpu.memory_space<vmem>>, vector<1x8x32xf32>
    %320 = vector.shape_cast %319 : vector<1x8x32xf32> to vector<8x32xf32>
    %321 = vector.shape_cast %312 : vector<8x32xf32> to vector<1x8x32xf32>
    tpu.vector_store %arg7[%318, %c0_93, %c0_94], %321 {strides = array<i32>} : memref<8x8x32xf32, #tpu.memory_space<vmem>>, vector<1x8x32xf32>,
    %c5_i32 = arith.constant 5 : i32
    %c7_i32_95 = arith.constant 7 : i32
    %322 = arith.subi %c7_i32_95, %c5_i32 : i32
    %c8_i32_96 = arith.constant 8 : i32
    %323 = arith.muli %c5_i32, %c8_i32_96 : i32
    %324 = tpu.assume_multiple %323, 8 : i32
    %c8_i32_97 = arith.constant 8 : i32
    %325 = arith.muli %322, %c8_i32_97 : i32
    %326 = tpu.assume_multiple %325, 8 : i32
    %327 = arith.index_cast %324 : i32 to index
    %c0_98 = arith.constant 0 : index
    %328 = vector.load %arg9[%327, %c0_98] : memref<64x128xf32, #tpu.memory_space<vmem>>, vector<8x128xf32>
    %329 = arith.index_cast %326 : i32 to index
    %c0_99 = arith.constant 0 : index
    %330 = vector.load %arg9[%329, %c0_99] : memref<64x128xf32, #tpu.memory_space<vmem>>, vector<8x128xf32>
    %331 = vector.shape_cast %26 : vector<1x128xi1> to vector<1x128xi1>
    %332 = vector.broadcast %331 : vector<1x128xi1> to vector<8x128xi1>
    %333 = arith.select %332, %328, %330 : vector<8x128xi1>, vector<8x128xf32>
    %cst_100 = arith.constant dense<0.000000e+00> : vector<8x128xf32>
    %334 = tpu.matmul %312, %7, %cst_100 {dimension_numbers = #tpu.dot_dimension_numbers<[1], [0], [0], [1], [0, 0, 1, 1], [], []>} : vector<8x32xf32>, vector<32x128xf32>, vector<8x128xf32> -> vector<8x128xf32>
    %335 = arith.addf %333, %334 : vector<8x128xf32>
    %336 = math.tanh %335 : vector<8x128xf32>
    %337 = arith.negf %335 : vector<8x128xf32>
    %338 = math.exp %337 : vector<8x128xf32>
    %cst_101 = arith.constant 1.000000e+00 : f32
    %339 = vector.broadcast %cst_101 : f32 to vector<8x128xf32>
    %340 = arith.addf %339, %338 : vector<8x128xf32>
    %341 = arith.divf %339, %340 : vector<8x128xf32>
    %342 = vector.shape_cast %31 : vector<1x128xi1> to vector<1x128xi1>
    %343 = vector.broadcast %342 : vector<1x128xi1> to vector<8x128xi1>
    %344 = arith.select %343, %336, %341 : vector<8x128xi1>, vector<8x128xf32>
    %345 = vector.extract_strided_slice %344 {offsets = [0, 0], sizes = [8, 32], strides = [1, 1]} : vector<8x128xf32> to vector<8x32xf32>
    %346 = vector.extract_strided_slice %344 {offsets = [0, 32], sizes = [8, 32], strides = [1, 1]} : vector<8x128xf32> to vector<8x32xf32>
    %347 = vector.extract_strided_slice %344 {offsets = [0, 64], sizes = [8, 32], strides = [1, 1]} : vector<8x128xf32> to vector<8x32xf32>
    %348 = vector.extract_strided_slice %344 {offsets = [0, 96], sizes = [8, 32], strides = [1, 1]} : vector<8x128xf32> to vector<8x32xf32>
    %349 = arith.mulf %346, %313 : vector<8x32xf32>
    %350 = arith.mulf %345, %347 : vector<8x32xf32>
    %351 = arith.addf %349, %350 : vector<8x32xf32>
    %352 = math.tanh %351 : vector<8x32xf32>
    %353 = arith.mulf %348, %352 : vector<8x32xf32>
    %354 = arith.index_cast %c5_i32 : i32 to index
    %c0_102 = arith.constant 0 : index
    %c0_103 = arith.constant 0 : index
    %355 = vector.load %arg2[%354, %c0_102, %c0_103] : memref<8x8x1xf32, #tpu.memory_space<vmem>>, vector<1x8x1xf32>
    %356 = vector.shape_cast %355 : vector<1x8x1xf32> to vector<8x1xf32>
    %357 = arith.index_cast %322 : i32 to index
    %c0_104 = arith.constant 0 : index
    %c0_105 = arith.constant 0 : index
    %358 = vector.load %arg2[%357, %c0_104, %c0_105] : memref<8x8x1xf32, #tpu.memory_space<vmem>>, vector<1x8x1xf32>
    %359 = vector.shape_cast %358 : vector<1x8x1xf32> to vector<8x1xf32>
    %360 = vector.shape_cast %34 : vector<1x32xi1> to vector<1x32xi1>
    %361 = vector.broadcast %360 : vector<1x32xi1> to vector<8x32xi1>
    %362 = vector.shape_cast %356 : vector<8x1xf32> to vector<8x1xf32>
    %363 = vector.broadcast %362 : vector<8x1xf32> to vector<8x32xf32>
    %364 = vector.shape_cast %359 : vector<8x1xf32> to vector<8x1xf32>
    %365 = vector.broadcast %364 : vector<8x1xf32> to vector<8x32xf32>
    %366 = arith.select %361, %363, %365 : vector<8x32xi1>, vector<8x32xf32>
    %cst_106 = arith.constant 5.000000e-01 : f32
    %367 = vector.broadcast %cst_106 : f32 to vector<8x32xf32>
    %368 = arith.cmpf ogt, %366, %367 : vector<8x32xf32>
    %369 = arith.select %368, %353, %312 : vector<8x32xi1>, vector<8x32xf32>
    %370 = arith.select %368, %351, %313 : vector<8x32xi1>, vector<8x32xf32>
    %371 = arith.index_cast %c5_i32 : i32 to index
    %c0_107 = arith.constant 0 : index
    %c0_108 = arith.constant 0 : index
    %372 = vector.load %arg6[%371, %c0_107, %c0_108] : memref<8x8x32xf32, #tpu.memory_space<vmem>>, vector<1x8x32xf32>
    %373 = vector.shape_cast %372 : vector<1x8x32xf32> to vector<8x32xf32>
    %374 = vector.shape_cast %369 : vector<8x32xf32> to vector<1x8x32xf32>
    tpu.vector_store %arg6[%371, %c0_107, %c0_108], %374 {strides = array<i32>} : memref<8x8x32xf32, #tpu.memory_space<vmem>>, vector<1x8x32xf32>,
    %375 = arith.index_cast %322 : i32 to index
    %c0_109 = arith.constant 0 : index
    %c0_110 = arith.constant 0 : index
    %376 = vector.load %arg7[%375, %c0_109, %c0_110] : memref<8x8x32xf32, #tpu.memory_space<vmem>>, vector<1x8x32xf32>
    %377 = vector.shape_cast %376 : vector<1x8x32xf32> to vector<8x32xf32>
    %378 = vector.shape_cast %369 : vector<8x32xf32> to vector<1x8x32xf32>
    tpu.vector_store %arg7[%375, %c0_109, %c0_110], %378 {strides = array<i32>} : memref<8x8x32xf32, #tpu.memory_space<vmem>>, vector<1x8x32xf32>,
    %c6_i32 = arith.constant 6 : i32
    %c7_i32_111 = arith.constant 7 : i32
    %379 = arith.subi %c7_i32_111, %c6_i32 : i32
    %c8_i32_112 = arith.constant 8 : i32
    %380 = arith.muli %c6_i32, %c8_i32_112 : i32
    %381 = tpu.assume_multiple %380, 8 : i32
    %c8_i32_113 = arith.constant 8 : i32
    %382 = arith.muli %379, %c8_i32_113 : i32
    %383 = tpu.assume_multiple %382, 8 : i32
    %384 = arith.index_cast %381 : i32 to index
    %c0_114 = arith.constant 0 : index
    %385 = vector.load %arg9[%384, %c0_114] : memref<64x128xf32, #tpu.memory_space<vmem>>, vector<8x128xf32>
    %386 = arith.index_cast %383 : i32 to index
    %c0_115 = arith.constant 0 : index
    %387 = vector.load %arg9[%386, %c0_115] : memref<64x128xf32, #tpu.memory_space<vmem>>, vector<8x128xf32>
    %388 = vector.shape_cast %26 : vector<1x128xi1> to vector<1x128xi1>
    %389 = vector.broadcast %388 : vector<1x128xi1> to vector<8x128xi1>
    %390 = arith.select %389, %385, %387 : vector<8x128xi1>, vector<8x128xf32>
    %cst_116 = arith.constant dense<0.000000e+00> : vector<8x128xf32>
    %391 = tpu.matmul %369, %7, %cst_116 {dimension_numbers = #tpu.dot_dimension_numbers<[1], [0], [0], [1], [0, 0, 1, 1], [], []>} : vector<8x32xf32>, vector<32x128xf32>, vector<8x128xf32> -> vector<8x128xf32>
    %392 = arith.addf %390, %391 : vector<8x128xf32>
    %393 = math.tanh %392 : vector<8x128xf32>
    %394 = arith.negf %392 : vector<8x128xf32>
    %395 = math.exp %394 : vector<8x128xf32>
    %cst_117 = arith.constant 1.000000e+00 : f32
    %396 = vector.broadcast %cst_117 : f32 to vector<8x128xf32>
    %397 = arith.addf %396, %395 : vector<8x128xf32>
    %398 = arith.divf %396, %397 : vector<8x128xf32>
    %399 = vector.shape_cast %31 : vector<1x128xi1> to vector<1x128xi1>
    %400 = vector.broadcast %399 : vector<1x128xi1> to vector<8x128xi1>
    %401 = arith.select %400, %393, %398 : vector<8x128xi1>, vector<8x128xf32>
    %402 = vector.extract_strided_slice %401 {offsets = [0, 0], sizes = [8, 32], strides = [1, 1]} : vector<8x128xf32> to vector<8x32xf32>
    %403 = vector.extract_strided_slice %401 {offsets = [0, 32], sizes = [8, 32], strides = [1, 1]} : vector<8x128xf32> to vector<8x32xf32>
    %404 = vector.extract_strided_slice %401 {offsets = [0, 64], sizes = [8, 32], strides = [1, 1]} : vector<8x128xf32> to vector<8x32xf32>
    %405 = vector.extract_strided_slice %401 {offsets = [0, 96], sizes = [8, 32], strides = [1, 1]} : vector<8x128xf32> to vector<8x32xf32>
    %406 = arith.mulf %403, %370 : vector<8x32xf32>
    %407 = arith.mulf %402, %404 : vector<8x32xf32>
    %408 = arith.addf %406, %407 : vector<8x32xf32>
    %409 = math.tanh %408 : vector<8x32xf32>
    %410 = arith.mulf %405, %409 : vector<8x32xf32>
    %411 = arith.index_cast %c6_i32 : i32 to index
    %c0_118 = arith.constant 0 : index
    %c0_119 = arith.constant 0 : index
    %412 = vector.load %arg2[%411, %c0_118, %c0_119] : memref<8x8x1xf32, #tpu.memory_space<vmem>>, vector<1x8x1xf32>
    %413 = vector.shape_cast %412 : vector<1x8x1xf32> to vector<8x1xf32>
    %414 = arith.index_cast %379 : i32 to index
    %c0_120 = arith.constant 0 : index
    %c0_121 = arith.constant 0 : index
    %415 = vector.load %arg2[%414, %c0_120, %c0_121] : memref<8x8x1xf32, #tpu.memory_space<vmem>>, vector<1x8x1xf32>
    %416 = vector.shape_cast %415 : vector<1x8x1xf32> to vector<8x1xf32>
    %417 = vector.shape_cast %34 : vector<1x32xi1> to vector<1x32xi1>
    %418 = vector.broadcast %417 : vector<1x32xi1> to vector<8x32xi1>
    %419 = vector.shape_cast %413 : vector<8x1xf32> to vector<8x1xf32>
    %420 = vector.broadcast %419 : vector<8x1xf32> to vector<8x32xf32>
    %421 = vector.shape_cast %416 : vector<8x1xf32> to vector<8x1xf32>
    %422 = vector.broadcast %421 : vector<8x1xf32> to vector<8x32xf32>
    %423 = arith.select %418, %420, %422 : vector<8x32xi1>, vector<8x32xf32>
    %cst_122 = arith.constant 5.000000e-01 : f32
    %424 = vector.broadcast %cst_122 : f32 to vector<8x32xf32>
    %425 = arith.cmpf ogt, %423, %424 : vector<8x32xf32>
    %426 = arith.select %425, %410, %369 : vector<8x32xi1>, vector<8x32xf32>
    %427 = arith.select %425, %408, %370 : vector<8x32xi1>, vector<8x32xf32>
    %428 = arith.index_cast %c6_i32 : i32 to index
    %c0_123 = arith.constant 0 : index
    %c0_124 = arith.constant 0 : index
    %429 = vector.load %arg6[%428, %c0_123, %c0_124] : memref<8x8x32xf32, #tpu.memory_space<vmem>>, vector<1x8x32xf32>
    %430 = vector.shape_cast %429 : vector<1x8x32xf32> to vector<8x32xf32>
    %431 = vector.shape_cast %426 : vector<8x32xf32> to vector<1x8x32xf32>
    tpu.vector_store %arg6[%428, %c0_123, %c0_124], %431 {strides = array<i32>} : memref<8x8x32xf32, #tpu.memory_space<vmem>>, vector<1x8x32xf32>,
    %432 = arith.index_cast %379 : i32 to index
    %c0_125 = arith.constant 0 : index
    %c0_126 = arith.constant 0 : index
    %433 = vector.load %arg7[%432, %c0_125, %c0_126] : memref<8x8x32xf32, #tpu.memory_space<vmem>>, vector<1x8x32xf32>
    %434 = vector.shape_cast %433 : vector<1x8x32xf32> to vector<8x32xf32>
    %435 = vector.shape_cast %426 : vector<8x32xf32> to vector<1x8x32xf32>
    tpu.vector_store %arg7[%432, %c0_125, %c0_126], %435 {strides = array<i32>} : memref<8x8x32xf32, #tpu.memory_space<vmem>>, vector<1x8x32xf32>,
    %c7_i32_127 = arith.constant 7 : i32
    %c7_i32_128 = arith.constant 7 : i32
    %436 = arith.subi %c7_i32_128, %c7_i32_127 : i32
    %c8_i32_129 = arith.constant 8 : i32
    %437 = arith.muli %c7_i32_127, %c8_i32_129 : i32
    %438 = tpu.assume_multiple %437, 8 : i32
    %c8_i32_130 = arith.constant 8 : i32
    %439 = arith.muli %436, %c8_i32_130 : i32
    %440 = tpu.assume_multiple %439, 8 : i32
    %441 = arith.index_cast %438 : i32 to index
    %c0_131 = arith.constant 0 : index
    %442 = vector.load %arg9[%441, %c0_131] : memref<64x128xf32, #tpu.memory_space<vmem>>, vector<8x128xf32>
    %443 = arith.index_cast %440 : i32 to index
    %c0_132 = arith.constant 0 : index
    %444 = vector.load %arg9[%443, %c0_132] : memref<64x128xf32, #tpu.memory_space<vmem>>, vector<8x128xf32>
    %445 = vector.shape_cast %26 : vector<1x128xi1> to vector<1x128xi1>
    %446 = vector.broadcast %445 : vector<1x128xi1> to vector<8x128xi1>
    %447 = arith.select %446, %442, %444 : vector<8x128xi1>, vector<8x128xf32>
    %cst_133 = arith.constant dense<0.000000e+00> : vector<8x128xf32>
    %448 = tpu.matmul %426, %7, %cst_133 {dimension_numbers = #tpu.dot_dimension_numbers<[1], [0], [0], [1], [0, 0, 1, 1], [], []>} : vector<8x32xf32>, vector<32x128xf32>, vector<8x128xf32> -> vector<8x128xf32>
    %449 = arith.addf %447, %448 : vector<8x128xf32>
    %450 = math.tanh %449 : vector<8x128xf32>
    %451 = arith.negf %449 : vector<8x128xf32>
    %452 = math.exp %451 : vector<8x128xf32>
    %cst_134 = arith.constant 1.000000e+00 : f32
    %453 = vector.broadcast %cst_134 : f32 to vector<8x128xf32>
    %454 = arith.addf %453, %452 : vector<8x128xf32>
    %455 = arith.divf %453, %454 : vector<8x128xf32>
    %456 = vector.shape_cast %31 : vector<1x128xi1> to vector<1x128xi1>
    %457 = vector.broadcast %456 : vector<1x128xi1> to vector<8x128xi1>
    %458 = arith.select %457, %450, %455 : vector<8x128xi1>, vector<8x128xf32>
    %459 = vector.extract_strided_slice %458 {offsets = [0, 0], sizes = [8, 32], strides = [1, 1]} : vector<8x128xf32> to vector<8x32xf32>
    %460 = vector.extract_strided_slice %458 {offsets = [0, 32], sizes = [8, 32], strides = [1, 1]} : vector<8x128xf32> to vector<8x32xf32>
    %461 = vector.extract_strided_slice %458 {offsets = [0, 64], sizes = [8, 32], strides = [1, 1]} : vector<8x128xf32> to vector<8x32xf32>
    %462 = vector.extract_strided_slice %458 {offsets = [0, 96], sizes = [8, 32], strides = [1, 1]} : vector<8x128xf32> to vector<8x32xf32>
    %463 = arith.mulf %460, %427 : vector<8x32xf32>
    %464 = arith.mulf %459, %461 : vector<8x32xf32>
    %465 = arith.addf %463, %464 : vector<8x32xf32>
    %466 = math.tanh %465 : vector<8x32xf32>
    %467 = arith.mulf %462, %466 : vector<8x32xf32>
    %468 = arith.index_cast %c7_i32_127 : i32 to index
    %c0_135 = arith.constant 0 : index
    %c0_136 = arith.constant 0 : index
    %469 = vector.load %arg2[%468, %c0_135, %c0_136] : memref<8x8x1xf32, #tpu.memory_space<vmem>>, vector<1x8x1xf32>
    %470 = vector.shape_cast %469 : vector<1x8x1xf32> to vector<8x1xf32>
    %471 = arith.index_cast %436 : i32 to index
    %c0_137 = arith.constant 0 : index
    %c0_138 = arith.constant 0 : index
    %472 = vector.load %arg2[%471, %c0_137, %c0_138] : memref<8x8x1xf32, #tpu.memory_space<vmem>>, vector<1x8x1xf32>
    %473 = vector.shape_cast %472 : vector<1x8x1xf32> to vector<8x1xf32>
    %474 = vector.shape_cast %34 : vector<1x32xi1> to vector<1x32xi1>
    %475 = vector.broadcast %474 : vector<1x32xi1> to vector<8x32xi1>
    %476 = vector.shape_cast %470 : vector<8x1xf32> to vector<8x1xf32>
    %477 = vector.broadcast %476 : vector<8x1xf32> to vector<8x32xf32>
    %478 = vector.shape_cast %473 : vector<8x1xf32> to vector<8x1xf32>
    %479 = vector.broadcast %478 : vector<8x1xf32> to vector<8x32xf32>
    %480 = arith.select %475, %477, %479 : vector<8x32xi1>, vector<8x32xf32>
    %cst_139 = arith.constant 5.000000e-01 : f32
    %481 = vector.broadcast %cst_139 : f32 to vector<8x32xf32>
    %482 = arith.cmpf ogt, %480, %481 : vector<8x32xf32>
    %483 = arith.select %482, %467, %426 : vector<8x32xi1>, vector<8x32xf32>
    %484 = arith.select %482, %465, %427 : vector<8x32xi1>, vector<8x32xf32>
    %485 = arith.index_cast %c7_i32_127 : i32 to index
    %c0_140 = arith.constant 0 : index
    %c0_141 = arith.constant 0 : index
    %486 = vector.load %arg6[%485, %c0_140, %c0_141] : memref<8x8x32xf32, #tpu.memory_space<vmem>>, vector<1x8x32xf32>
    %487 = vector.shape_cast %486 : vector<1x8x32xf32> to vector<8x32xf32>
    %488 = vector.shape_cast %483 : vector<8x32xf32> to vector<1x8x32xf32>
    tpu.vector_store %arg6[%485, %c0_140, %c0_141], %488 {strides = array<i32>} : memref<8x8x32xf32, #tpu.memory_space<vmem>>, vector<1x8x32xf32>,
    %489 = arith.index_cast %436 : i32 to index
    %c0_142 = arith.constant 0 : index
    %c0_143 = arith.constant 0 : index
    %490 = vector.load %arg7[%489, %c0_142, %c0_143] : memref<8x8x32xf32, #tpu.memory_space<vmem>>, vector<1x8x32xf32>
    %491 = vector.shape_cast %490 : vector<1x8x32xf32> to vector<8x32xf32>
    %492 = vector.shape_cast %483 : vector<8x32xf32> to vector<1x8x32xf32>
    tpu.vector_store %arg7[%489, %c0_142, %c0_143], %492 {strides = array<i32>} : memref<8x8x32xf32, #tpu.memory_space<vmem>>, vector<1x8x32xf32>,
    %c8_i32_144 = arith.constant 8 : i32
    %c0_145 = arith.constant 0 : index
    %c0_146 = arith.constant 0 : index
    %493 = vector.load %arg8[%c0_145, %c0_146] : memref<8x32xf32, #tpu.memory_space<vmem>>, vector<8x32xf32>
    tpu.vector_store %arg8[%c0_145, %c0_146], %483 {strides = array<i32>} : memref<8x32xf32, #tpu.memory_space<vmem>>, vector<8x32xf32>,
    return
  }
  func.func @transform_0(%arg0: i32) -> (i32, i32) {
    %c0_i32 = arith.constant 0 : i32
    %c0_i32_0 = arith.constant 0 : i32
    %c0_i32_1 = arith.constant 0 : i32
    return %c0_i32, %c0_i32_0 : i32, i32
  }
  func.func @transform_1(%arg0: i32) -> (i32, i32, i32) {
    %c0_i32 = arith.constant 0 : i32
    %c0_i32_0 = arith.constant 0 : i32
    %c0_i32_1 = arith.constant 0 : i32
    %c0_i32_2 = arith.constant 0 : i32
    return %c0_i32, %c0_i32_0, %c0_i32_1 : i32, i32, i32
  }
  func.func @transform_2(%arg0: i32) -> (i32, i32) {
    %c0_i32 = arith.constant 0 : i32
    %c0_i32_0 = arith.constant 0 : i32
    %c0_i32_1 = arith.constant 0 : i32
    return %c0_i32, %c0_i32_0 : i32, i32
  }
  func.func @transform_3(%arg0: i32) -> (i32, i32) {
    %c0_i32 = arith.constant 0 : i32
    %c0_i32_0 = arith.constant 0 : i32
    %c0_i32_1 = arith.constant 0 : i32
    return %c0_i32, %c0_i32_0 : i32, i32
  }
  func.func @transform_4(%arg0: i32) -> (i32, i32) {
    %c0_i32 = arith.constant 0 : i32
    %c0_i32_0 = arith.constant 0 : i32
    %c0_i32_1 = arith.constant 0 : i32
    return %c0_i32, %c0_i32_0 : i32, i32
  }
  func.func @transform_5(%arg0: i32) -> (i32, i32, i32) {
    %c0_i32 = arith.constant 0 : i32
    %c0_i32_0 = arith.constant 0 : i32
    %c0_i32_1 = arith.constant 0 : i32
    %c0_i32_2 = arith.constant 0 : i32
    return %c0_i32, %c0_i32_0, %c0_i32_1 : i32, i32, i32
  }
  func.func @transform_6(%arg0: i32) -> (i32, i32, i32) {
    %c0_i32 = arith.constant 0 : i32
    %c0_i32_0 = arith.constant 0 : i32
    %c0_i32_1 = arith.constant 0 : i32
    %c0_i32_2 = arith.constant 0 : i32
    return %c0_i32, %c0_i32_0, %c0_i32_1 : i32, i32, i32
  }
  func.func @transform_7(%arg0: i32) -> (i32, i32) {
    %c0_i32 = arith.constant 0 : i32
    %c0_i32_0 = arith.constant 0 : i32
    %c0_i32_1 = arith.constant 0 : i32
    return %c0_i32, %c0_i32_0 : i32, i32
  }
}

module attributes {stable_mosaic.version = 11 : i64} {
  func.func @_bilstm_layer_kernel(%arg0: i32, %arg1: memref<64x16xf32, #tpu.memory_space<vmem>>, %arg2: memref<8x8x1xf32, #tpu.memory_space<vmem>>, %arg3: memref<16x128xf32, #tpu.memory_space<vmem>>, %arg4: memref<1x128xf32, #tpu.memory_space<vmem>>, %arg5: memref<32x128xf32, #tpu.memory_space<vmem>>, %arg6: memref<8x8x32xf32, #tpu.memory_space<vmem>>, %arg7: memref<8x8x32xf32, #tpu.memory_space<vmem>>, %arg8: memref<8x32xf32, #tpu.memory_space<vmem>>, %arg9: memref<64x128xf32, #tpu.memory_space<vmem>>) attributes {dimension_semantics = [#tpu.dimension_semantics<arbitrary>], iteration_bounds = array<i64: 1>, scalar_prefetch = 0 : i64, scratch_operands = 1 : i64, tpu.core_type = #tpu.core_type<tc>, window_params = [{pipeline_mode = #tpu.pipeline_mode<synchronous>, transform_indices = @transform_0, window_bounds = array<i64: 64, 16>}, {pipeline_mode = #tpu.pipeline_mode<synchronous>, transform_indices = @transform_1, window_bounds = array<i64: 8, 8, 1>}, {pipeline_mode = #tpu.pipeline_mode<synchronous>, transform_indices = @transform_2, window_bounds = array<i64: 16, 128>}, {pipeline_mode = #tpu.pipeline_mode<synchronous>, transform_indices = @transform_3, window_bounds = array<i64: 1, 128>}, {pipeline_mode = #tpu.pipeline_mode<synchronous>, transform_indices = @transform_4, window_bounds = array<i64: 32, 128>}, {pipeline_mode = #tpu.pipeline_mode<synchronous>, transform_indices = @transform_5, window_bounds = array<i64: 8, 8, 32>}, {pipeline_mode = #tpu.pipeline_mode<synchronous>, transform_indices = @transform_6, window_bounds = array<i64: 8, 8, 32>}, {pipeline_mode = #tpu.pipeline_mode<synchronous>, transform_indices = @transform_7, window_bounds = array<i64: 8, 32>}]} {
    %c0 = arith.constant 0 : index
    %c0_0 = arith.constant 0 : index
    %0 = vector.load %arg1[%c0, %c0_0] : memref<64x16xf32, #tpu.memory_space<vmem>>, vector<64x16xf32>
    %c0_1 = arith.constant 0 : index
    %c0_2 = arith.constant 0 : index
    %1 = vector.load %arg3[%c0_1, %c0_2] : memref<16x128xf32, #tpu.memory_space<vmem>>, vector<16x128xf32>
    %cst = arith.constant dense<0.000000e+00> : vector<64x128xf32>
    %2 = tpu.matmul %0, %1, %cst {dimension_numbers = #tpu.dot_dimension_numbers<[1], [0], [0], [1], [0, 0, 1, 1], [], []>} : vector<64x16xf32>, vector<16x128xf32>, vector<64x128xf32> -> vector<64x128xf32>
    %c0_3 = arith.constant 0 : index
    %c0_4 = arith.constant 0 : index
    %3 = vector.load %arg4[%c0_3, %c0_4] : memref<1x128xf32, #tpu.memory_space<vmem>>, vector<1x128xf32>
    %4 = vector.broadcast %3 : vector<1x128xf32> to vector<64x128xf32>
    %5 = arith.addf %2, %4 : vector<64x128xf32>
    %c0_5 = arith.constant 0 : index
    %c0_6 = arith.constant 0 : index
    %6 = vector.load %arg9[%c0_5, %c0_6] : memref<64x128xf32, #tpu.memory_space<vmem>>, vector<64x128xf32>
    tpu.vector_store %arg9[%c0_5, %c0_6], %5 {strides = array<i32>} : memref<64x128xf32, #tpu.memory_space<vmem>>, vector<64x128xf32>,
    %c0_7 = arith.constant 0 : index
    %c0_8 = arith.constant 0 : index
    %7 = vector.load %arg5[%c0_7, %c0_8] : memref<32x128xf32, #tpu.memory_space<vmem>>, vector<32x128xf32>
    %8 = tpu.iota {dimensions = array<i32: 1>} : vector<1x128xi32>
    %c32_i32 = arith.constant 32 : i32
    %c0_i32 = arith.constant 0 : i32
    %9 = arith.cmpi eq, %c32_i32, %c0_i32 : i32
    %c1_i32 = arith.constant 1 : i32
    %10 = arith.select %9, %c1_i32, %c32_i32 : i32
    %11 = vector.broadcast %10 : i32 to vector<1x128xi32>
    %12 = arith.remsi %8, %11 : vector<1x128xi32>
    %c0_i32_9 = arith.constant 0 : i32
    %13 = vector.broadcast %c0_i32_9 : i32 to vector<1x128xi32>
    %14 = arith.cmpi ne, %12, %13 : vector<1x128xi32>
    %c0_i32_10 = arith.constant 0 : i32
    %15 = vector.broadcast %c0_i32_10 : i32 to vector<1x128xi32>
    %16 = arith.cmpi slt, %12, %15 : vector<1x128xi32>
    %c0_i32_11 = arith.constant 0 : i32
    %17 = arith.cmpi slt, %10, %c0_i32_11 : i32
    %18 = vector.broadcast %17 : i1 to vector<1x128xi1>
    %19 = vector.broadcast %18 : vector<1x128xi1> to vector<1x128xi1>
    %20 = arith.xori %16, %19 : vector<1x128xi1>
    %21 = arith.andi %20, %14 : vector<1x128xi1>
    %22 = vector.broadcast %10 : i32 to vector<1x128xi32>
    %23 = arith.addi %12, %22 : vector<1x128xi32>
    %24 = arith.select %21, %23, %12 : vector<1x128xi1>, vector<1x128xi32>
    %c16_i32 = arith.constant 16 : i32
    %25 = vector.broadcast %c16_i32 : i32 to vector<1x128xi32>
    %26 = arith.cmpi slt, %24, %25 : vector<1x128xi32>
    %c64_i32 = arith.constant 64 : i32
    %27 = vector.broadcast %c64_i32 : i32 to vector<1x128xi32>
    %28 = arith.cmpi sge, %8, %27 : vector<1x128xi32>
    %c96_i32 = arith.constant 96 : i32
    %29 = vector.broadcast %c96_i32 : i32 to vector<1x128xi32>
    %30 = arith.cmpi slt, %8, %29 : vector<1x128xi32>
    %31 = arith.andi %28, %30 : vector<1x128xi1>
    %32 = tpu.iota {dimensions = array<i32: 1>} : vector<1x32xi32>
    %c16_i32_12 = arith.constant 16 : i32
    %33 = vector.broadcast %c16_i32_12 : i32 to vector<1x32xi32>
    %34 = arith.cmpi slt, %32, %33 : vector<1x32xi32>
    %cst_13 = arith.constant 0.000000e+00 : f32
    %35 = vector.broadcast %cst_13 : f32 to vector<8x32xf32>
    %cst_14 = arith.constant 0.000000e+00 : f32
    %36 = vector.broadcast %cst_14 : f32 to vector<8x32xf32>
    %c0_i32_15 = arith.constant 0 : i32
    %c7_i32 = arith.constant 7 : i32
    %37 = arith.subi %c7_i32, %c0_i32_15 : i32
    %c8_i32 = arith.constant 8 : i32
    %38 = arith.muli %c0_i32_15, %c8_i32 : i32
    %39 = tpu.assume_multiple %38, 8 : i32
    %c8_i32_16 = arith.constant 8 : i32
    %40 = arith.muli %37, %c8_i32_16 : i32
    %41 = tpu.assume_multiple %40, 8 : i32
    %42 = arith.index_cast %39 : i32 to index
    %c0_17 = arith.constant 0 : index
    %43 = vector.load %arg9[%42, %c0_17] : memref<64x128xf32, #tpu.memory_space<vmem>>, vector<8x128xf32>
    %44 = arith.index_cast %41 : i32 to index
    %c0_18 = arith.constant 0 : index
    %45 = vector.load %arg9[%44, %c0_18] : memref<64x128xf32, #tpu.memory_space<vmem>>, vector<8x128xf32>
    %46 = vector.shape_cast %26 : vector<1x128xi1> to vector<1x128xi1>
    %47 = vector.broadcast %46 : vector<1x128xi1> to vector<8x128xi1>
    %48 = arith.select %47, %43, %45 : vector<8x128xi1>, vector<8x128xf32>
    %cst_19 = arith.constant dense<0.000000e+00> : vector<8x128xf32>
    %49 = tpu.matmul %35, %7, %cst_19 {dimension_numbers = #tpu.dot_dimension_numbers<[1], [0], [0], [1], [0, 0, 1, 1], [], []>} : vector<8x32xf32>, vector<32x128xf32>, vector<8x128xf32> -> vector<8x128xf32>
    %50 = arith.addf %48, %49 : vector<8x128xf32>
    %51 = math.tanh %50 : vector<8x128xf32>
    %52 = arith.negf %50 : vector<8x128xf32>
    %53 = math.exp %52 : vector<8x128xf32>
    %cst_20 = arith.constant 1.000000e+00 : f32
    %54 = vector.broadcast %cst_20 : f32 to vector<8x128xf32>
    %55 = arith.addf %54, %53 : vector<8x128xf32>
    %56 = arith.divf %54, %55 : vector<8x128xf32>
    %57 = vector.shape_cast %31 : vector<1x128xi1> to vector<1x128xi1>
    %58 = vector.broadcast %57 : vector<1x128xi1> to vector<8x128xi1>
    %59 = arith.select %58, %51, %56 : vector<8x128xi1>, vector<8x128xf32>
    %60 = vector.extract_strided_slice %59 {offsets = [0, 0], sizes = [8, 32], strides = [1, 1]} : vector<8x128xf32> to vector<8x32xf32>
    %61 = vector.extract_strided_slice %59 {offsets = [0, 32], sizes = [8, 32], strides = [1, 1]} : vector<8x128xf32> to vector<8x32xf32>
    %62 = vector.extract_strided_slice %59 {offsets = [0, 64], sizes = [8, 32], strides = [1, 1]} : vector<8x128xf32> to vector<8x32xf32>
    %63 = vector.extract_strided_slice %59 {offsets = [0, 96], sizes = [8, 32], strides = [1, 1]} : vector<8x128xf32> to vector<8x32xf32>
    %64 = arith.mulf %61, %36 : vector<8x32xf32>
    %65 = arith.mulf %60, %62 : vector<8x32xf32>
    %66 = arith.addf %64, %65 : vector<8x32xf32>
    %67 = math.tanh %66 : vector<8x32xf32>
    %68 = arith.mulf %63, %67 : vector<8x32xf32>
    %69 = arith.index_cast %c0_i32_15 : i32 to index
    %c0_21 = arith.constant 0 : index
    %c0_22 = arith.constant 0 : index
    %70 = vector.load %arg2[%69, %c0_21, %c0_22] : memref<8x8x1xf32, #tpu.memory_space<vmem>>, vector<1x8x1xf32>
    %71 = vector.shape_cast %70 : vector<1x8x1xf32> to vector<8x1xf32>
    %72 = arith.index_cast %37 : i32 to index
    %c0_23 = arith.constant 0 : index
    %c0_24 = arith.constant 0 : index
    %73 = vector.load %arg2[%72, %c0_23, %c0_24] : memref<8x8x1xf32, #tpu.memory_space<vmem>>, vector<1x8x1xf32>
    %74 = vector.shape_cast %73 : vector<1x8x1xf32> to vector<8x1xf32>
    %75 = vector.shape_cast %34 : vector<1x32xi1> to vector<1x32xi1>
    %76 = vector.broadcast %75 : vector<1x32xi1> to vector<8x32xi1>
    %77 = vector.shape_cast %71 : vector<8x1xf32> to vector<8x1xf32>
    %78 = vector.broadcast %77 : vector<8x1xf32> to vector<8x32xf32>
    %79 = vector.shape_cast %74 : vector<8x1xf32> to vector<8x1xf32>
    %80 = vector.broadcast %79 : vector<8x1xf32> to vector<8x32xf32>
    %81 = arith.select %76, %78, %80 : vector<8x32xi1>, vector<8x32xf32>
    %cst_25 = arith.constant 5.000000e-01 : f32
    %82 = vector.broadcast %cst_25 : f32 to vector<8x32xf32>
    %83 = arith.cmpf ogt, %81, %82 : vector<8x32xf32>
    %84 = arith.select %83, %68, %35 : vector<8x32xi1>, vector<8x32xf32>
    %85 = arith.select %83, %66, %36 : vector<8x32xi1>, vector<8x32xf32>
    %86 = arith.index_cast %c0_i32_15 : i32 to index
    %c0_26 = arith.constant 0 : index
    %c0_27 = arith.constant 0 : index
    %87 = vector.load %arg6[%86, %c0_26, %c0_27] : memref<8x8x32xf32, #tpu.memory_space<vmem>>, vector<1x8x32xf32>
    %88 = vector.shape_cast %87 : vector<1x8x32xf32> to vector<8x32xf32>
    %89 = vector.shape_cast %84 : vector<8x32xf32> to vector<1x8x32xf32>
    tpu.vector_store %arg6[%86, %c0_26, %c0_27], %89 {strides = array<i32>} : memref<8x8x32xf32, #tpu.memory_space<vmem>>, vector<1x8x32xf32>,
    %90 = arith.index_cast %37 : i32 to index
    %c0_28 = arith.constant 0 : index
    %c0_29 = arith.constant 0 : index
    %91 = vector.load %arg7[%90, %c0_28, %c0_29] : memref<8x8x32xf32, #tpu.memory_space<vmem>>, vector<1x8x32xf32>
    %92 = vector.shape_cast %91 : vector<1x8x32xf32> to vector<8x32xf32>
    %93 = vector.shape_cast %84 : vector<8x32xf32> to vector<1x8x32xf32>
    tpu.vector_store %arg7[%90, %c0_28, %c0_29], %93 {strides = array<i32>} : memref<8x8x32xf32, #tpu.memory_space<vmem>>, vector<1x8x32xf32>,
    %c1_i32_30 = arith.constant 1 : i32
    %c7_i32_31 = arith.constant 7 : i32
    %94 = arith.subi %c7_i32_31, %c1_i32_30 : i32
    %c8_i32_32 = arith.constant 8 : i32
    %95 = arith.muli %c1_i32_30, %c8_i32_32 : i32
    %96 = tpu.assume_multiple %95, 8 : i32
    %c8_i32_33 = arith.constant 8 : i32
    %97 = arith.muli %94, %c8_i32_33 : i32
    %98 = tpu.assume_multiple %97, 8 : i32
    %99 = arith.index_cast %96 : i32 to index
    %c0_34 = arith.constant 0 : index
    %100 = vector.load %arg9[%99, %c0_34] : memref<64x128xf32, #tpu.memory_space<vmem>>, vector<8x128xf32>
    %101 = arith.index_cast %98 : i32 to index
    %c0_35 = arith.constant 0 : index
    %102 = vector.load %arg9[%101, %c0_35] : memref<64x128xf32, #tpu.memory_space<vmem>>, vector<8x128xf32>
    %103 = vector.shape_cast %26 : vector<1x128xi1> to vector<1x128xi1>
    %104 = vector.broadcast %103 : vector<1x128xi1> to vector<8x128xi1>
    %105 = arith.select %104, %100, %102 : vector<8x128xi1>, vector<8x128xf32>
    %cst_36 = arith.constant dense<0.000000e+00> : vector<8x128xf32>
    %106 = tpu.matmul %84, %7, %cst_36 {dimension_numbers = #tpu.dot_dimension_numbers<[1], [0], [0], [1], [0, 0, 1, 1], [], []>} : vector<8x32xf32>, vector<32x128xf32>, vector<8x128xf32> -> vector<8x128xf32>
    %107 = arith.addf %105, %106 : vector<8x128xf32>
    %108 = math.tanh %107 : vector<8x128xf32>
    %109 = arith.negf %107 : vector<8x128xf32>
    %110 = math.exp %109 : vector<8x128xf32>
    %cst_37 = arith.constant 1.000000e+00 : f32
    %111 = vector.broadcast %cst_37 : f32 to vector<8x128xf32>
    %112 = arith.addf %111, %110 : vector<8x128xf32>
    %113 = arith.divf %111, %112 : vector<8x128xf32>
    %114 = vector.shape_cast %31 : vector<1x128xi1> to vector<1x128xi1>
    %115 = vector.broadcast %114 : vector<1x128xi1> to vector<8x128xi1>
    %116 = arith.select %115, %108, %113 : vector<8x128xi1>, vector<8x128xf32>
    %117 = vector.extract_strided_slice %116 {offsets = [0, 0], sizes = [8, 32], strides = [1, 1]} : vector<8x128xf32> to vector<8x32xf32>
    %118 = vector.extract_strided_slice %116 {offsets = [0, 32], sizes = [8, 32], strides = [1, 1]} : vector<8x128xf32> to vector<8x32xf32>
    %119 = vector.extract_strided_slice %116 {offsets = [0, 64], sizes = [8, 32], strides = [1, 1]} : vector<8x128xf32> to vector<8x32xf32>
    %120 = vector.extract_strided_slice %116 {offsets = [0, 96], sizes = [8, 32], strides = [1, 1]} : vector<8x128xf32> to vector<8x32xf32>
    %121 = arith.mulf %118, %85 : vector<8x32xf32>
    %122 = arith.mulf %117, %119 : vector<8x32xf32>
    %123 = arith.addf %121, %122 : vector<8x32xf32>
    %124 = math.tanh %123 : vector<8x32xf32>
    %125 = arith.mulf %120, %124 : vector<8x32xf32>
    %126 = arith.index_cast %c1_i32_30 : i32 to index
    %c0_38 = arith.constant 0 : index
    %c0_39 = arith.constant 0 : index
    %127 = vector.load %arg2[%126, %c0_38, %c0_39] : memref<8x8x1xf32, #tpu.memory_space<vmem>>, vector<1x8x1xf32>
    %128 = vector.shape_cast %127 : vector<1x8x1xf32> to vector<8x1xf32>
    %129 = arith.index_cast %94 : i32 to index
    %c0_40 = arith.constant 0 : index
    %c0_41 = arith.constant 0 : index
    %130 = vector.load %arg2[%129, %c0_40, %c0_41] : memref<8x8x1xf32, #tpu.memory_space<vmem>>, vector<1x8x1xf32>
    %131 = vector.shape_cast %130 : vector<1x8x1xf32> to vector<8x1xf32>
    %132 = vector.shape_cast %34 : vector<1x32xi1> to vector<1x32xi1>
    %133 = vector.broadcast %132 : vector<1x32xi1> to vector<8x32xi1>
    %134 = vector.shape_cast %128 : vector<8x1xf32> to vector<8x1xf32>
    %135 = vector.broadcast %134 : vector<8x1xf32> to vector<8x32xf32>
    %136 = vector.shape_cast %131 : vector<8x1xf32> to vector<8x1xf32>
    %137 = vector.broadcast %136 : vector<8x1xf32> to vector<8x32xf32>
    %138 = arith.select %133, %135, %137 : vector<8x32xi1>, vector<8x32xf32>
    %cst_42 = arith.constant 5.000000e-01 : f32
    %139 = vector.broadcast %cst_42 : f32 to vector<8x32xf32>
    %140 = arith.cmpf ogt, %138, %139 : vector<8x32xf32>
    %141 = arith.select %140, %125, %84 : vector<8x32xi1>, vector<8x32xf32>
    %142 = arith.select %140, %123, %85 : vector<8x32xi1>, vector<8x32xf32>
    %143 = arith.index_cast %c1_i32_30 : i32 to index
    %c0_43 = arith.constant 0 : index
    %c0_44 = arith.constant 0 : index
    %144 = vector.load %arg6[%143, %c0_43, %c0_44] : memref<8x8x32xf32, #tpu.memory_space<vmem>>, vector<1x8x32xf32>
    %145 = vector.shape_cast %144 : vector<1x8x32xf32> to vector<8x32xf32>
    %146 = vector.shape_cast %141 : vector<8x32xf32> to vector<1x8x32xf32>
    tpu.vector_store %arg6[%143, %c0_43, %c0_44], %146 {strides = array<i32>} : memref<8x8x32xf32, #tpu.memory_space<vmem>>, vector<1x8x32xf32>,
    %147 = arith.index_cast %94 : i32 to index
    %c0_45 = arith.constant 0 : index
    %c0_46 = arith.constant 0 : index
    %148 = vector.load %arg7[%147, %c0_45, %c0_46] : memref<8x8x32xf32, #tpu.memory_space<vmem>>, vector<1x8x32xf32>
    %149 = vector.shape_cast %148 : vector<1x8x32xf32> to vector<8x32xf32>
    %150 = vector.shape_cast %141 : vector<8x32xf32> to vector<1x8x32xf32>
    tpu.vector_store %arg7[%147, %c0_45, %c0_46], %150 {strides = array<i32>} : memref<8x8x32xf32, #tpu.memory_space<vmem>>, vector<1x8x32xf32>,
    %c2_i32 = arith.constant 2 : i32
    %c7_i32_47 = arith.constant 7 : i32
    %151 = arith.subi %c7_i32_47, %c2_i32 : i32
    %c8_i32_48 = arith.constant 8 : i32
    %152 = arith.muli %c2_i32, %c8_i32_48 : i32
    %153 = tpu.assume_multiple %152, 8 : i32
    %c8_i32_49 = arith.constant 8 : i32
    %154 = arith.muli %151, %c8_i32_49 : i32
    %155 = tpu.assume_multiple %154, 8 : i32
    %156 = arith.index_cast %153 : i32 to index
    %c0_50 = arith.constant 0 : index
    %157 = vector.load %arg9[%156, %c0_50] : memref<64x128xf32, #tpu.memory_space<vmem>>, vector<8x128xf32>
    %158 = arith.index_cast %155 : i32 to index
    %c0_51 = arith.constant 0 : index
    %159 = vector.load %arg9[%158, %c0_51] : memref<64x128xf32, #tpu.memory_space<vmem>>, vector<8x128xf32>
    %160 = vector.shape_cast %26 : vector<1x128xi1> to vector<1x128xi1>
    %161 = vector.broadcast %160 : vector<1x128xi1> to vector<8x128xi1>
    %162 = arith.select %161, %157, %159 : vector<8x128xi1>, vector<8x128xf32>
    %cst_52 = arith.constant dense<0.000000e+00> : vector<8x128xf32>
    %163 = tpu.matmul %141, %7, %cst_52 {dimension_numbers = #tpu.dot_dimension_numbers<[1], [0], [0], [1], [0, 0, 1, 1], [], []>} : vector<8x32xf32>, vector<32x128xf32>, vector<8x128xf32> -> vector<8x128xf32>
    %164 = arith.addf %162, %163 : vector<8x128xf32>
    %165 = math.tanh %164 : vector<8x128xf32>
    %166 = arith.negf %164 : vector<8x128xf32>
    %167 = math.exp %166 : vector<8x128xf32>
    %cst_53 = arith.constant 1.000000e+00 : f32
    %168 = vector.broadcast %cst_53 : f32 to vector<8x128xf32>
    %169 = arith.addf %168, %167 : vector<8x128xf32>
    %170 = arith.divf %168, %169 : vector<8x128xf32>
    %171 = vector.shape_cast %31 : vector<1x128xi1> to vector<1x128xi1>
    %172 = vector.broadcast %171 : vector<1x128xi1> to vector<8x128xi1>
    %173 = arith.select %172, %165, %170 : vector<8x128xi1>, vector<8x128xf32>
    %174 = vector.extract_strided_slice %173 {offsets = [0, 0], sizes = [8, 32], strides = [1, 1]} : vector<8x128xf32> to vector<8x32xf32>
    %175 = vector.extract_strided_slice %173 {offsets = [0, 32], sizes = [8, 32], strides = [1, 1]} : vector<8x128xf32> to vector<8x32xf32>
    %176 = vector.extract_strided_slice %173 {offsets = [0, 64], sizes = [8, 32], strides = [1, 1]} : vector<8x128xf32> to vector<8x32xf32>
    %177 = vector.extract_strided_slice %173 {offsets = [0, 96], sizes = [8, 32], strides = [1, 1]} : vector<8x128xf32> to vector<8x32xf32>
    %178 = arith.mulf %175, %142 : vector<8x32xf32>
    %179 = arith.mulf %174, %176 : vector<8x32xf32>
    %180 = arith.addf %178, %179 : vector<8x32xf32>
    %181 = math.tanh %180 : vector<8x32xf32>
    %182 = arith.mulf %177, %181 : vector<8x32xf32>
    %183 = arith.index_cast %c2_i32 : i32 to index
    %c0_54 = arith.constant 0 : index
    %c0_55 = arith.constant 0 : index
    %184 = vector.load %arg2[%183, %c0_54, %c0_55] : memref<8x8x1xf32, #tpu.memory_space<vmem>>, vector<1x8x1xf32>
    %185 = vector.shape_cast %184 : vector<1x8x1xf32> to vector<8x1xf32>
    %186 = arith.index_cast %151 : i32 to index
    %c0_56 = arith.constant 0 : index
    %c0_57 = arith.constant 0 : index
    %187 = vector.load %arg2[%186, %c0_56, %c0_57] : memref<8x8x1xf32, #tpu.memory_space<vmem>>, vector<1x8x1xf32>
    %188 = vector.shape_cast %187 : vector<1x8x1xf32> to vector<8x1xf32>
    %189 = vector.shape_cast %34 : vector<1x32xi1> to vector<1x32xi1>
    %190 = vector.broadcast %189 : vector<1x32xi1> to vector<8x32xi1>
    %191 = vector.shape_cast %185 : vector<8x1xf32> to vector<8x1xf32>
    %192 = vector.broadcast %191 : vector<8x1xf32> to vector<8x32xf32>
    %193 = vector.shape_cast %188 : vector<8x1xf32> to vector<8x1xf32>
    %194 = vector.broadcast %193 : vector<8x1xf32> to vector<8x32xf32>
    %195 = arith.select %190, %192, %194 : vector<8x32xi1>, vector<8x32xf32>
    %cst_58 = arith.constant 5.000000e-01 : f32
    %196 = vector.broadcast %cst_58 : f32 to vector<8x32xf32>
    %197 = arith.cmpf ogt, %195, %196 : vector<8x32xf32>
    %198 = arith.select %197, %182, %141 : vector<8x32xi1>, vector<8x32xf32>
    %199 = arith.select %197, %180, %142 : vector<8x32xi1>, vector<8x32xf32>
    %200 = arith.index_cast %c2_i32 : i32 to index
    %c0_59 = arith.constant 0 : index
    %c0_60 = arith.constant 0 : index
    %201 = vector.load %arg6[%200, %c0_59, %c0_60] : memref<8x8x32xf32, #tpu.memory_space<vmem>>, vector<1x8x32xf32>
    %202 = vector.shape_cast %201 : vector<1x8x32xf32> to vector<8x32xf32>
    %203 = vector.shape_cast %198 : vector<8x32xf32> to vector<1x8x32xf32>
    tpu.vector_store %arg6[%200, %c0_59, %c0_60], %203 {strides = array<i32>} : memref<8x8x32xf32, #tpu.memory_space<vmem>>, vector<1x8x32xf32>,
    %204 = arith.index_cast %151 : i32 to index
    %c0_61 = arith.constant 0 : index
    %c0_62 = arith.constant 0 : index
    %205 = vector.load %arg7[%204, %c0_61, %c0_62] : memref<8x8x32xf32, #tpu.memory_space<vmem>>, vector<1x8x32xf32>
    %206 = vector.shape_cast %205 : vector<1x8x32xf32> to vector<8x32xf32>
    %207 = vector.shape_cast %198 : vector<8x32xf32> to vector<1x8x32xf32>
    tpu.vector_store %arg7[%204, %c0_61, %c0_62], %207 {strides = array<i32>} : memref<8x8x32xf32, #tpu.memory_space<vmem>>, vector<1x8x32xf32>,
    %c3_i32 = arith.constant 3 : i32
    %c7_i32_63 = arith.constant 7 : i32
    %208 = arith.subi %c7_i32_63, %c3_i32 : i32
    %c8_i32_64 = arith.constant 8 : i32
    %209 = arith.muli %c3_i32, %c8_i32_64 : i32
    %210 = tpu.assume_multiple %209, 8 : i32
    %c8_i32_65 = arith.constant 8 : i32
    %211 = arith.muli %208, %c8_i32_65 : i32
    %212 = tpu.assume_multiple %211, 8 : i32
    %213 = arith.index_cast %210 : i32 to index
    %c0_66 = arith.constant 0 : index
    %214 = vector.load %arg9[%213, %c0_66] : memref<64x128xf32, #tpu.memory_space<vmem>>, vector<8x128xf32>
    %215 = arith.index_cast %212 : i32 to index
    %c0_67 = arith.constant 0 : index
    %216 = vector.load %arg9[%215, %c0_67] : memref<64x128xf32, #tpu.memory_space<vmem>>, vector<8x128xf32>
    %217 = vector.shape_cast %26 : vector<1x128xi1> to vector<1x128xi1>
    %218 = vector.broadcast %217 : vector<1x128xi1> to vector<8x128xi1>
    %219 = arith.select %218, %214, %216 : vector<8x128xi1>, vector<8x128xf32>
    %cst_68 = arith.constant dense<0.000000e+00> : vector<8x128xf32>
    %220 = tpu.matmul %198, %7, %cst_68 {dimension_numbers = #tpu.dot_dimension_numbers<[1], [0], [0], [1], [0, 0, 1, 1], [], []>} : vector<8x32xf32>, vector<32x128xf32>, vector<8x128xf32> -> vector<8x128xf32>
    %221 = arith.addf %219, %220 : vector<8x128xf32>
    %222 = math.tanh %221 : vector<8x128xf32>
    %223 = arith.negf %221 : vector<8x128xf32>
    %224 = math.exp %223 : vector<8x128xf32>
    %cst_69 = arith.constant 1.000000e+00 : f32
    %225 = vector.broadcast %cst_69 : f32 to vector<8x128xf32>
    %226 = arith.addf %225, %224 : vector<8x128xf32>
    %227 = arith.divf %225, %226 : vector<8x128xf32>
    %228 = vector.shape_cast %31 : vector<1x128xi1> to vector<1x128xi1>
    %229 = vector.broadcast %228 : vector<1x128xi1> to vector<8x128xi1>
    %230 = arith.select %229, %222, %227 : vector<8x128xi1>, vector<8x128xf32>
    %231 = vector.extract_strided_slice %230 {offsets = [0, 0], sizes = [8, 32], strides = [1, 1]} : vector<8x128xf32> to vector<8x32xf32>
    %232 = vector.extract_strided_slice %230 {offsets = [0, 32], sizes = [8, 32], strides = [1, 1]} : vector<8x128xf32> to vector<8x32xf32>
    %233 = vector.extract_strided_slice %230 {offsets = [0, 64], sizes = [8, 32], strides = [1, 1]} : vector<8x128xf32> to vector<8x32xf32>
    %234 = vector.extract_strided_slice %230 {offsets = [0, 96], sizes = [8, 32], strides = [1, 1]} : vector<8x128xf32> to vector<8x32xf32>
    %235 = arith.mulf %232, %199 : vector<8x32xf32>
    %236 = arith.mulf %231, %233 : vector<8x32xf32>
    %237 = arith.addf %235, %236 : vector<8x32xf32>
    %238 = math.tanh %237 : vector<8x32xf32>
    %239 = arith.mulf %234, %238 : vector<8x32xf32>
    %240 = arith.index_cast %c3_i32 : i32 to index
    %c0_70 = arith.constant 0 : index
    %c0_71 = arith.constant 0 : index
    %241 = vector.load %arg2[%240, %c0_70, %c0_71] : memref<8x8x1xf32, #tpu.memory_space<vmem>>, vector<1x8x1xf32>
    %242 = vector.shape_cast %241 : vector<1x8x1xf32> to vector<8x1xf32>
    %243 = arith.index_cast %208 : i32 to index
    %c0_72 = arith.constant 0 : index
    %c0_73 = arith.constant 0 : index
    %244 = vector.load %arg2[%243, %c0_72, %c0_73] : memref<8x8x1xf32, #tpu.memory_space<vmem>>, vector<1x8x1xf32>
    %245 = vector.shape_cast %244 : vector<1x8x1xf32> to vector<8x1xf32>
    %246 = vector.shape_cast %34 : vector<1x32xi1> to vector<1x32xi1>
    %247 = vector.broadcast %246 : vector<1x32xi1> to vector<8x32xi1>
    %248 = vector.shape_cast %242 : vector<8x1xf32> to vector<8x1xf32>
    %249 = vector.broadcast %248 : vector<8x1xf32> to vector<8x32xf32>
    %250 = vector.shape_cast %245 : vector<8x1xf32> to vector<8x1xf32>
    %251 = vector.broadcast %250 : vector<8x1xf32> to vector<8x32xf32>
    %252 = arith.select %247, %249, %251 : vector<8x32xi1>, vector<8x32xf32>
    %cst_74 = arith.constant 5.000000e-01 : f32
    %253 = vector.broadcast %cst_74 : f32 to vector<8x32xf32>
    %254 = arith.cmpf ogt, %252, %253 : vector<8x32xf32>
    %255 = arith.select %254, %239, %198 : vector<8x32xi1>, vector<8x32xf32>
    %256 = arith.select %254, %237, %199 : vector<8x32xi1>, vector<8x32xf32>
    %257 = arith.index_cast %c3_i32 : i32 to index
    %c0_75 = arith.constant 0 : index
    %c0_76 = arith.constant 0 : index
    %258 = vector.load %arg6[%257, %c0_75, %c0_76] : memref<8x8x32xf32, #tpu.memory_space<vmem>>, vector<1x8x32xf32>
    %259 = vector.shape_cast %258 : vector<1x8x32xf32> to vector<8x32xf32>
    %260 = vector.shape_cast %255 : vector<8x32xf32> to vector<1x8x32xf32>
    tpu.vector_store %arg6[%257, %c0_75, %c0_76], %260 {strides = array<i32>} : memref<8x8x32xf32, #tpu.memory_space<vmem>>, vector<1x8x32xf32>,
    %261 = arith.index_cast %208 : i32 to index
    %c0_77 = arith.constant 0 : index
    %c0_78 = arith.constant 0 : index
    %262 = vector.load %arg7[%261, %c0_77, %c0_78] : memref<8x8x32xf32, #tpu.memory_space<vmem>>, vector<1x8x32xf32>
    %263 = vector.shape_cast %262 : vector<1x8x32xf32> to vector<8x32xf32>
    %264 = vector.shape_cast %255 : vector<8x32xf32> to vector<1x8x32xf32>
    tpu.vector_store %arg7[%261, %c0_77, %c0_78], %264 {strides = array<i32>} : memref<8x8x32xf32, #tpu.memory_space<vmem>>, vector<1x8x32xf32>,
    %c4_i32 = arith.constant 4 : i32
    %c7_i32_79 = arith.constant 7 : i32
    %265 = arith.subi %c7_i32_79, %c4_i32 : i32
    %c8_i32_80 = arith.constant 8 : i32
    %266 = arith.muli %c4_i32, %c8_i32_80 : i32
    %267 = tpu.assume_multiple %266, 8 : i32
    %c8_i32_81 = arith.constant 8 : i32
    %268 = arith.muli %265, %c8_i32_81 : i32
    %269 = tpu.assume_multiple %268, 8 : i32
    %270 = arith.index_cast %267 : i32 to index
    %c0_82 = arith.constant 0 : index
    %271 = vector.load %arg9[%270, %c0_82] : memref<64x128xf32, #tpu.memory_space<vmem>>, vector<8x128xf32>
    %272 = arith.index_cast %269 : i32 to index
    %c0_83 = arith.constant 0 : index
    %273 = vector.load %arg9[%272, %c0_83] : memref<64x128xf32, #tpu.memory_space<vmem>>, vector<8x128xf32>
    %274 = vector.shape_cast %26 : vector<1x128xi1> to vector<1x128xi1>
    %275 = vector.broadcast %274 : vector<1x128xi1> to vector<8x128xi1>
    %276 = arith.select %275, %271, %273 : vector<8x128xi1>, vector<8x128xf32>
    %cst_84 = arith.constant dense<0.000000e+00> : vector<8x128xf32>
    %277 = tpu.matmul %255, %7, %cst_84 {dimension_numbers = #tpu.dot_dimension_numbers<[1], [0], [0], [1], [0, 0, 1, 1], [], []>} : vector<8x32xf32>, vector<32x128xf32>, vector<8x128xf32> -> vector<8x128xf32>
    %278 = arith.addf %276, %277 : vector<8x128xf32>
    %279 = math.tanh %278 : vector<8x128xf32>
    %280 = arith.negf %278 : vector<8x128xf32>
    %281 = math.exp %280 : vector<8x128xf32>
    %cst_85 = arith.constant 1.000000e+00 : f32
    %282 = vector.broadcast %cst_85 : f32 to vector<8x128xf32>
    %283 = arith.addf %282, %281 : vector<8x128xf32>
    %284 = arith.divf %282, %283 : vector<8x128xf32>
    %285 = vector.shape_cast %31 : vector<1x128xi1> to vector<1x128xi1>
    %286 = vector.broadcast %285 : vector<1x128xi1> to vector<8x128xi1>
    %287 = arith.select %286, %279, %284 : vector<8x128xi1>, vector<8x128xf32>
    %288 = vector.extract_strided_slice %287 {offsets = [0, 0], sizes = [8, 32], strides = [1, 1]} : vector<8x128xf32> to vector<8x32xf32>
    %289 = vector.extract_strided_slice %287 {offsets = [0, 32], sizes = [8, 32], strides = [1, 1]} : vector<8x128xf32> to vector<8x32xf32>
    %290 = vector.extract_strided_slice %287 {offsets = [0, 64], sizes = [8, 32], strides = [1, 1]} : vector<8x128xf32> to vector<8x32xf32>
    %291 = vector.extract_strided_slice %287 {offsets = [0, 96], sizes = [8, 32], strides = [1, 1]} : vector<8x128xf32> to vector<8x32xf32>
    %292 = arith.mulf %289, %256 : vector<8x32xf32>
    %293 = arith.mulf %288, %290 : vector<8x32xf32>
    %294 = arith.addf %292, %293 : vector<8x32xf32>
    %295 = math.tanh %294 : vector<8x32xf32>
    %296 = arith.mulf %291, %295 : vector<8x32xf32>
    %297 = arith.index_cast %c4_i32 : i32 to index
    %c0_86 = arith.constant 0 : index
    %c0_87 = arith.constant 0 : index
    %298 = vector.load %arg2[%297, %c0_86, %c0_87] : memref<8x8x1xf32, #tpu.memory_space<vmem>>, vector<1x8x1xf32>
    %299 = vector.shape_cast %298 : vector<1x8x1xf32> to vector<8x1xf32>
    %300 = arith.index_cast %265 : i32 to index
    %c0_88 = arith.constant 0 : index
    %c0_89 = arith.constant 0 : index
    %301 = vector.load %arg2[%300, %c0_88, %c0_89] : memref<8x8x1xf32, #tpu.memory_space<vmem>>, vector<1x8x1xf32>
    %302 = vector.shape_cast %301 : vector<1x8x1xf32> to vector<8x1xf32>
    %303 = vector.shape_cast %34 : vector<1x32xi1> to vector<1x32xi1>
    %304 = vector.broadcast %303 : vector<1x32xi1> to vector<8x32xi1>
    %305 = vector.shape_cast %299 : vector<8x1xf32> to vector<8x1xf32>
    %306 = vector.broadcast %305 : vector<8x1xf32> to vector<8x32xf32>
    %307 = vector.shape_cast %302 : vector<8x1xf32> to vector<8x1xf32>
    %308 = vector.broadcast %307 : vector<8x1xf32> to vector<8x32xf32>
    %309 = arith.select %304, %306, %308 : vector<8x32xi1>, vector<8x32xf32>
    %cst_90 = arith.constant 5.000000e-01 : f32
    %310 = vector.broadcast %cst_90 : f32 to vector<8x32xf32>
    %311 = arith.cmpf ogt, %309, %310 : vector<8x32xf32>
    %312 = arith.select %311, %296, %255 : vector<8x32xi1>, vector<8x32xf32>
    %313 = arith.select %311, %294, %256 : vector<8x32xi1>, vector<8x32xf32>
    %314 = arith.index_cast %c4_i32 : i32 to index
    %c0_91 = arith.constant 0 : index
    %c0_92 = arith.constant 0 : index
    %315 = vector.load %arg6[%314, %c0_91, %c0_92] : memref<8x8x32xf32, #tpu.memory_space<vmem>>, vector<1x8x32xf32>
    %316 = vector.shape_cast %315 : vector<1x8x32xf32> to vector<8x32xf32>
    %317 = vector.shape_cast %312 : vector<8x32xf32> to vector<1x8x32xf32>
    tpu.vector_store %arg6[%314, %c0_91, %c0_92], %317 {strides = array<i32>} : memref<8x8x32xf32, #tpu.memory_space<vmem>>, vector<1x8x32xf32>,
    %318 = arith.index_cast %265 : i32 to index
    %c0_93 = arith.constant 0 : index
    %c0_94 = arith.constant 0 : index
    %319 = vector.load %arg7[%318, %c0_93, %c0_94] : memref<8x8x32xf32, #tpu.memory_space<vmem>>, vector<1x8x32xf32>
    %320 = vector.shape_cast %319 : vector<1x8x32xf32> to vector<8x32xf32>
    %321 = vector.shape_cast %312 : vector<8x32xf32> to vector<1x8x32xf32>
    tpu.vector_store %arg7[%318, %c0_93, %c0_94], %321 {strides = array<i32>} : memref<8x8x32xf32, #tpu.memory_space<vmem>>, vector<1x8x32xf32>,
    %c5_i32 = arith.constant 5 : i32
    %c7_i32_95 = arith.constant 7 : i32
    %322 = arith.subi %c7_i32_95, %c5_i32 : i32
    %c8_i32_96 = arith.constant 8 : i32
    %323 = arith.muli %c5_i32, %c8_i32_96 : i32
    %324 = tpu.assume_multiple %323, 8 : i32
    %c8_i32_97 = arith.constant 8 : i32
    %325 = arith.muli %322, %c8_i32_97 : i32
    %326 = tpu.assume_multiple %325, 8 : i32
    %327 = arith.index_cast %324 : i32 to index
    %c0_98 = arith.constant 0 : index
    %328 = vector.load %arg9[%327, %c0_98] : memref<64x128xf32, #tpu.memory_space<vmem>>, vector<8x128xf32>
    %329 = arith.index_cast %326 : i32 to index
    %c0_99 = arith.constant 0 : index
    %330 = vector.load %arg9[%329, %c0_99] : memref<64x128xf32, #tpu.memory_space<vmem>>, vector<8x128xf32>
    %331 = vector.shape_cast %26 : vector<1x128xi1> to vector<1x128xi1>
    %332 = vector.broadcast %331 : vector<1x128xi1> to vector<8x128xi1>
    %333 = arith.select %332, %328, %330 : vector<8x128xi1>, vector<8x128xf32>
    %cst_100 = arith.constant dense<0.000000e+00> : vector<8x128xf32>
    %334 = tpu.matmul %312, %7, %cst_100 {dimension_numbers = #tpu.dot_dimension_numbers<[1], [0], [0], [1], [0, 0, 1, 1], [], []>} : vector<8x32xf32>, vector<32x128xf32>, vector<8x128xf32> -> vector<8x128xf32>
    %335 = arith.addf %333, %334 : vector<8x128xf32>
    %336 = math.tanh %335 : vector<8x128xf32>
    %337 = arith.negf %335 : vector<8x128xf32>
    %338 = math.exp %337 : vector<8x128xf32>
    %cst_101 = arith.constant 1.000000e+00 : f32
    %339 = vector.broadcast %cst_101 : f32 to vector<8x128xf32>
    %340 = arith.addf %339, %338 : vector<8x128xf32>
    %341 = arith.divf %339, %340 : vector<8x128xf32>
    %342 = vector.shape_cast %31 : vector<1x128xi1> to vector<1x128xi1>
    %343 = vector.broadcast %342 : vector<1x128xi1> to vector<8x128xi1>
    %344 = arith.select %343, %336, %341 : vector<8x128xi1>, vector<8x128xf32>
    %345 = vector.extract_strided_slice %344 {offsets = [0, 0], sizes = [8, 32], strides = [1, 1]} : vector<8x128xf32> to vector<8x32xf32>
    %346 = vector.extract_strided_slice %344 {offsets = [0, 32], sizes = [8, 32], strides = [1, 1]} : vector<8x128xf32> to vector<8x32xf32>
    %347 = vector.extract_strided_slice %344 {offsets = [0, 64], sizes = [8, 32], strides = [1, 1]} : vector<8x128xf32> to vector<8x32xf32>
    %348 = vector.extract_strided_slice %344 {offsets = [0, 96], sizes = [8, 32], strides = [1, 1]} : vector<8x128xf32> to vector<8x32xf32>
    %349 = arith.mulf %346, %313 : vector<8x32xf32>
    %350 = arith.mulf %345, %347 : vector<8x32xf32>
    %351 = arith.addf %349, %350 : vector<8x32xf32>
    %352 = math.tanh %351 : vector<8x32xf32>
    %353 = arith.mulf %348, %352 : vector<8x32xf32>
    %354 = arith.index_cast %c5_i32 : i32 to index
    %c0_102 = arith.constant 0 : index
    %c0_103 = arith.constant 0 : index
    %355 = vector.load %arg2[%354, %c0_102, %c0_103] : memref<8x8x1xf32, #tpu.memory_space<vmem>>, vector<1x8x1xf32>
    %356 = vector.shape_cast %355 : vector<1x8x1xf32> to vector<8x1xf32>
    %357 = arith.index_cast %322 : i32 to index
    %c0_104 = arith.constant 0 : index
    %c0_105 = arith.constant 0 : index
    %358 = vector.load %arg2[%357, %c0_104, %c0_105] : memref<8x8x1xf32, #tpu.memory_space<vmem>>, vector<1x8x1xf32>
    %359 = vector.shape_cast %358 : vector<1x8x1xf32> to vector<8x1xf32>
    %360 = vector.shape_cast %34 : vector<1x32xi1> to vector<1x32xi1>
    %361 = vector.broadcast %360 : vector<1x32xi1> to vector<8x32xi1>
    %362 = vector.shape_cast %356 : vector<8x1xf32> to vector<8x1xf32>
    %363 = vector.broadcast %362 : vector<8x1xf32> to vector<8x32xf32>
    %364 = vector.shape_cast %359 : vector<8x1xf32> to vector<8x1xf32>
    %365 = vector.broadcast %364 : vector<8x1xf32> to vector<8x32xf32>
    %366 = arith.select %361, %363, %365 : vector<8x32xi1>, vector<8x32xf32>
    %cst_106 = arith.constant 5.000000e-01 : f32
    %367 = vector.broadcast %cst_106 : f32 to vector<8x32xf32>
    %368 = arith.cmpf ogt, %366, %367 : vector<8x32xf32>
    %369 = arith.select %368, %353, %312 : vector<8x32xi1>, vector<8x32xf32>
    %370 = arith.select %368, %351, %313 : vector<8x32xi1>, vector<8x32xf32>
    %371 = arith.index_cast %c5_i32 : i32 to index
    %c0_107 = arith.constant 0 : index
    %c0_108 = arith.constant 0 : index
    %372 = vector.load %arg6[%371, %c0_107, %c0_108] : memref<8x8x32xf32, #tpu.memory_space<vmem>>, vector<1x8x32xf32>
    %373 = vector.shape_cast %372 : vector<1x8x32xf32> to vector<8x32xf32>
    %374 = vector.shape_cast %369 : vector<8x32xf32> to vector<1x8x32xf32>
    tpu.vector_store %arg6[%371, %c0_107, %c0_108], %374 {strides = array<i32>} : memref<8x8x32xf32, #tpu.memory_space<vmem>>, vector<1x8x32xf32>,
    %375 = arith.index_cast %322 : i32 to index
    %c0_109 = arith.constant 0 : index
    %c0_110 = arith.constant 0 : index
    %376 = vector.load %arg7[%375, %c0_109, %c0_110] : memref<8x8x32xf32, #tpu.memory_space<vmem>>, vector<1x8x32xf32>
    %377 = vector.shape_cast %376 : vector<1x8x32xf32> to vector<8x32xf32>
    %378 = vector.shape_cast %369 : vector<8x32xf32> to vector<1x8x32xf32>
    tpu.vector_store %arg7[%375, %c0_109, %c0_110], %378 {strides = array<i32>} : memref<8x8x32xf32, #tpu.memory_space<vmem>>, vector<1x8x32xf32>,
    %c6_i32 = arith.constant 6 : i32
    %c7_i32_111 = arith.constant 7 : i32
    %379 = arith.subi %c7_i32_111, %c6_i32 : i32
    %c8_i32_112 = arith.constant 8 : i32
    %380 = arith.muli %c6_i32, %c8_i32_112 : i32
    %381 = tpu.assume_multiple %380, 8 : i32
    %c8_i32_113 = arith.constant 8 : i32
    %382 = arith.muli %379, %c8_i32_113 : i32
    %383 = tpu.assume_multiple %382, 8 : i32
    %384 = arith.index_cast %381 : i32 to index
    %c0_114 = arith.constant 0 : index
    %385 = vector.load %arg9[%384, %c0_114] : memref<64x128xf32, #tpu.memory_space<vmem>>, vector<8x128xf32>
    %386 = arith.index_cast %383 : i32 to index
    %c0_115 = arith.constant 0 : index
    %387 = vector.load %arg9[%386, %c0_115] : memref<64x128xf32, #tpu.memory_space<vmem>>, vector<8x128xf32>
    %388 = vector.shape_cast %26 : vector<1x128xi1> to vector<1x128xi1>
    %389 = vector.broadcast %388 : vector<1x128xi1> to vector<8x128xi1>
    %390 = arith.select %389, %385, %387 : vector<8x128xi1>, vector<8x128xf32>
    %cst_116 = arith.constant dense<0.000000e+00> : vector<8x128xf32>
    %391 = tpu.matmul %369, %7, %cst_116 {dimension_numbers = #tpu.dot_dimension_numbers<[1], [0], [0], [1], [0, 0, 1, 1], [], []>} : vector<8x32xf32>, vector<32x128xf32>, vector<8x128xf32> -> vector<8x128xf32>
    %392 = arith.addf %390, %391 : vector<8x128xf32>
    %393 = math.tanh %392 : vector<8x128xf32>
    %394 = arith.negf %392 : vector<8x128xf32>
    %395 = math.exp %394 : vector<8x128xf32>
    %cst_117 = arith.constant 1.000000e+00 : f32
    %396 = vector.broadcast %cst_117 : f32 to vector<8x128xf32>
    %397 = arith.addf %396, %395 : vector<8x128xf32>
    %398 = arith.divf %396, %397 : vector<8x128xf32>
    %399 = vector.shape_cast %31 : vector<1x128xi1> to vector<1x128xi1>
    %400 = vector.broadcast %399 : vector<1x128xi1> to vector<8x128xi1>
    %401 = arith.select %400, %393, %398 : vector<8x128xi1>, vector<8x128xf32>
    %402 = vector.extract_strided_slice %401 {offsets = [0, 0], sizes = [8, 32], strides = [1, 1]} : vector<8x128xf32> to vector<8x32xf32>
    %403 = vector.extract_strided_slice %401 {offsets = [0, 32], sizes = [8, 32], strides = [1, 1]} : vector<8x128xf32> to vector<8x32xf32>
    %404 = vector.extract_strided_slice %401 {offsets = [0, 64], sizes = [8, 32], strides = [1, 1]} : vector<8x128xf32> to vector<8x32xf32>
    %405 = vector.extract_strided_slice %401 {offsets = [0, 96], sizes = [8, 32], strides = [1, 1]} : vector<8x128xf32> to vector<8x32xf32>
    %406 = arith.mulf %403, %370 : vector<8x32xf32>
    %407 = arith.mulf %402, %404 : vector<8x32xf32>
    %408 = arith.addf %406, %407 : vector<8x32xf32>
    %409 = math.tanh %408 : vector<8x32xf32>
    %410 = arith.mulf %405, %409 : vector<8x32xf32>
    %411 = arith.index_cast %c6_i32 : i32 to index
    %c0_118 = arith.constant 0 : index
    %c0_119 = arith.constant 0 : index
    %412 = vector.load %arg2[%411, %c0_118, %c0_119] : memref<8x8x1xf32, #tpu.memory_space<vmem>>, vector<1x8x1xf32>
    %413 = vector.shape_cast %412 : vector<1x8x1xf32> to vector<8x1xf32>
    %414 = arith.index_cast %379 : i32 to index
    %c0_120 = arith.constant 0 : index
    %c0_121 = arith.constant 0 : index
    %415 = vector.load %arg2[%414, %c0_120, %c0_121] : memref<8x8x1xf32, #tpu.memory_space<vmem>>, vector<1x8x1xf32>
    %416 = vector.shape_cast %415 : vector<1x8x1xf32> to vector<8x1xf32>
    %417 = vector.shape_cast %34 : vector<1x32xi1> to vector<1x32xi1>
    %418 = vector.broadcast %417 : vector<1x32xi1> to vector<8x32xi1>
    %419 = vector.shape_cast %413 : vector<8x1xf32> to vector<8x1xf32>
    %420 = vector.broadcast %419 : vector<8x1xf32> to vector<8x32xf32>
    %421 = vector.shape_cast %416 : vector<8x1xf32> to vector<8x1xf32>
    %422 = vector.broadcast %421 : vector<8x1xf32> to vector<8x32xf32>
    %423 = arith.select %418, %420, %422 : vector<8x32xi1>, vector<8x32xf32>
    %cst_122 = arith.constant 5.000000e-01 : f32
    %424 = vector.broadcast %cst_122 : f32 to vector<8x32xf32>
    %425 = arith.cmpf ogt, %423, %424 : vector<8x32xf32>
    %426 = arith.select %425, %410, %369 : vector<8x32xi1>, vector<8x32xf32>
    %427 = arith.select %425, %408, %370 : vector<8x32xi1>, vector<8x32xf32>
    %428 = arith.index_cast %c6_i32 : i32 to index
    %c0_123 = arith.constant 0 : index
    %c0_124 = arith.constant 0 : index
    %429 = vector.load %arg6[%428, %c0_123, %c0_124] : memref<8x8x32xf32, #tpu.memory_space<vmem>>, vector<1x8x32xf32>
    %430 = vector.shape_cast %429 : vector<1x8x32xf32> to vector<8x32xf32>
    %431 = vector.shape_cast %426 : vector<8x32xf32> to vector<1x8x32xf32>
    tpu.vector_store %arg6[%428, %c0_123, %c0_124], %431 {strides = array<i32>} : memref<8x8x32xf32, #tpu.memory_space<vmem>>, vector<1x8x32xf32>,
    %432 = arith.index_cast %379 : i32 to index
    %c0_125 = arith.constant 0 : index
    %c0_126 = arith.constant 0 : index
    %433 = vector.load %arg7[%432, %c0_125, %c0_126] : memref<8x8x32xf32, #tpu.memory_space<vmem>>, vector<1x8x32xf32>
    %434 = vector.shape_cast %433 : vector<1x8x32xf32> to vector<8x32xf32>
    %435 = vector.shape_cast %426 : vector<8x32xf32> to vector<1x8x32xf32>
    tpu.vector_store %arg7[%432, %c0_125, %c0_126], %435 {strides = array<i32>} : memref<8x8x32xf32, #tpu.memory_space<vmem>>, vector<1x8x32xf32>,
    %c7_i32_127 = arith.constant 7 : i32
    %c7_i32_128 = arith.constant 7 : i32
    %436 = arith.subi %c7_i32_128, %c7_i32_127 : i32
    %c8_i32_129 = arith.constant 8 : i32
    %437 = arith.muli %c7_i32_127, %c8_i32_129 : i32
    %438 = tpu.assume_multiple %437, 8 : i32
    %c8_i32_130 = arith.constant 8 : i32
    %439 = arith.muli %436, %c8_i32_130 : i32
    %440 = tpu.assume_multiple %439, 8 : i32
    %441 = arith.index_cast %438 : i32 to index
    %c0_131 = arith.constant 0 : index
    %442 = vector.load %arg9[%441, %c0_131] : memref<64x128xf32, #tpu.memory_space<vmem>>, vector<8x128xf32>
    %443 = arith.index_cast %440 : i32 to index
    %c0_132 = arith.constant 0 : index
    %444 = vector.load %arg9[%443, %c0_132] : memref<64x128xf32, #tpu.memory_space<vmem>>, vector<8x128xf32>
    %445 = vector.shape_cast %26 : vector<1x128xi1> to vector<1x128xi1>
    %446 = vector.broadcast %445 : vector<1x128xi1> to vector<8x128xi1>
    %447 = arith.select %446, %442, %444 : vector<8x128xi1>, vector<8x128xf32>
    %cst_133 = arith.constant dense<0.000000e+00> : vector<8x128xf32>
    %448 = tpu.matmul %426, %7, %cst_133 {dimension_numbers = #tpu.dot_dimension_numbers<[1], [0], [0], [1], [0, 0, 1, 1], [], []>} : vector<8x32xf32>, vector<32x128xf32>, vector<8x128xf32> -> vector<8x128xf32>
    %449 = arith.addf %447, %448 : vector<8x128xf32>
    %450 = math.tanh %449 : vector<8x128xf32>
    %451 = arith.negf %449 : vector<8x128xf32>
    %452 = math.exp %451 : vector<8x128xf32>
    %cst_134 = arith.constant 1.000000e+00 : f32
    %453 = vector.broadcast %cst_134 : f32 to vector<8x128xf32>
    %454 = arith.addf %453, %452 : vector<8x128xf32>
    %455 = arith.divf %453, %454 : vector<8x128xf32>
    %456 = vector.shape_cast %31 : vector<1x128xi1> to vector<1x128xi1>
    %457 = vector.broadcast %456 : vector<1x128xi1> to vector<8x128xi1>
    %458 = arith.select %457, %450, %455 : vector<8x128xi1>, vector<8x128xf32>
    %459 = vector.extract_strided_slice %458 {offsets = [0, 0], sizes = [8, 32], strides = [1, 1]} : vector<8x128xf32> to vector<8x32xf32>
    %460 = vector.extract_strided_slice %458 {offsets = [0, 32], sizes = [8, 32], strides = [1, 1]} : vector<8x128xf32> to vector<8x32xf32>
    %461 = vector.extract_strided_slice %458 {offsets = [0, 64], sizes = [8, 32], strides = [1, 1]} : vector<8x128xf32> to vector<8x32xf32>
    %462 = vector.extract_strided_slice %458 {offsets = [0, 96], sizes = [8, 32], strides = [1, 1]} : vector<8x128xf32> to vector<8x32xf32>
    %463 = arith.mulf %460, %427 : vector<8x32xf32>
    %464 = arith.mulf %459, %461 : vector<8x32xf32>
    %465 = arith.addf %463, %464 : vector<8x32xf32>
    %466 = math.tanh %465 : vector<8x32xf32>
    %467 = arith.mulf %462, %466 : vector<8x32xf32>
    %468 = arith.index_cast %c7_i32_127 : i32 to index
    %c0_135 = arith.constant 0 : index
    %c0_136 = arith.constant 0 : index
    %469 = vector.load %arg2[%468, %c0_135, %c0_136] : memref<8x8x1xf32, #tpu.memory_space<vmem>>, vector<1x8x1xf32>
    %470 = vector.shape_cast %469 : vector<1x8x1xf32> to vector<8x1xf32>
    %471 = arith.index_cast %436 : i32 to index
    %c0_137 = arith.constant 0 : index
    %c0_138 = arith.constant 0 : index
    %472 = vector.load %arg2[%471, %c0_137, %c0_138] : memref<8x8x1xf32, #tpu.memory_space<vmem>>, vector<1x8x1xf32>
    %473 = vector.shape_cast %472 : vector<1x8x1xf32> to vector<8x1xf32>
    %474 = vector.shape_cast %34 : vector<1x32xi1> to vector<1x32xi1>
    %475 = vector.broadcast %474 : vector<1x32xi1> to vector<8x32xi1>
    %476 = vector.shape_cast %470 : vector<8x1xf32> to vector<8x1xf32>
    %477 = vector.broadcast %476 : vector<8x1xf32> to vector<8x32xf32>
    %478 = vector.shape_cast %473 : vector<8x1xf32> to vector<8x1xf32>
    %479 = vector.broadcast %478 : vector<8x1xf32> to vector<8x32xf32>
    %480 = arith.select %475, %477, %479 : vector<8x32xi1>, vector<8x32xf32>
    %cst_139 = arith.constant 5.000000e-01 : f32
    %481 = vector.broadcast %cst_139 : f32 to vector<8x32xf32>
    %482 = arith.cmpf ogt, %480, %481 : vector<8x32xf32>
    %483 = arith.select %482, %467, %426 : vector<8x32xi1>, vector<8x32xf32>
    %484 = arith.select %482, %465, %427 : vector<8x32xi1>, vector<8x32xf32>
    %485 = arith.index_cast %c7_i32_127 : i32 to index
    %c0_140 = arith.constant 0 : index
    %c0_141 = arith.constant 0 : index
    %486 = vector.load %arg6[%485, %c0_140, %c0_141] : memref<8x8x32xf32, #tpu.memory_space<vmem>>, vector<1x8x32xf32>
    %487 = vector.shape_cast %486 : vector<1x8x32xf32> to vector<8x32xf32>
    %488 = vector.shape_cast %483 : vector<8x32xf32> to vector<1x8x32xf32>
    tpu.vector_store %arg6[%485, %c0_140, %c0_141], %488 {strides = array<i32>} : memref<8x8x32xf32, #tpu.memory_space<vmem>>, vector<1x8x32xf32>,
    %489 = arith.index_cast %436 : i32 to index
    %c0_142 = arith.constant 0 : index
    %c0_143 = arith.constant 0 : index
    %490 = vector.load %arg7[%489, %c0_142, %c0_143] : memref<8x8x32xf32, #tpu.memory_space<vmem>>, vector<1x8x32xf32>
    %491 = vector.shape_cast %490 : vector<1x8x32xf32> to vector<8x32xf32>
    %492 = vector.shape_cast %483 : vector<8x32xf32> to vector<1x8x32xf32>
    tpu.vector_store %arg7[%489, %c0_142, %c0_143], %492 {strides = array<i32>} : memref<8x8x32xf32, #tpu.memory_space<vmem>>, vector<1x8x32xf32>,
    %c8_i32_144 = arith.constant 8 : i32
    %c0_145 = arith.constant 0 : index
    %c0_146 = arith.constant 0 : index
    %493 = vector.load %arg8[%c0_145, %c0_146] : memref<8x32xf32, #tpu.memory_space<vmem>>, vector<8x32xf32>
    tpu.vector_store %arg8[%c0_145, %c0_146], %483 {strides = array<i32>} : memref<8x32xf32, #tpu.memory_space<vmem>>, vector<8x32xf32>,
    return
  }
  func.func @transform_0(%arg0: i32) -> (i32, i32) {
    %c0_i32 = arith.constant 0 : i32
    %c0_i32_0 = arith.constant 0 : i32
    %c0_i32_1 = arith.constant 0 : i32
    return %c0_i32, %c0_i32_0 : i32, i32
  }
  func.func @transform_1(%arg0: i32) -> (i32, i32, i32) {
    %c0_i32 = arith.constant 0 : i32
    %c0_i32_0 = arith.constant 0 : i32
    %c0_i32_1 = arith.constant 0 : i32
    %c0_i32_2 = arith.constant 0 : i32
    return %c0_i32, %c0_i32_0, %c0_i32_1 : i32, i32, i32
  }
  func.func @transform_2(%arg0: i32) -> (i32, i32) {
    %c0_i32 = arith.constant 0 : i32
    %c0_i32_0 = arith.constant 0 : i32
    %c0_i32_1 = arith.constant 0 : i32
    return %c0_i32, %c0_i32_0 : i32, i32
  }
  func.func @transform_3(%arg0: i32) -> (i32, i32) {
    %c0_i32 = arith.constant 0 : i32
    %c0_i32_0 = arith.constant 0 : i32
    %c0_i32_1 = arith.constant 0 : i32
    return %c0_i32, %c0_i32_0 : i32, i32
  }
  func.func @transform_4(%arg0: i32) -> (i32, i32) {
    %c0_i32 = arith.constant 0 : i32
    %c0_i32_0 = arith.constant 0 : i32
    %c0_i32_1 = arith.constant 0 : i32
    return %c0_i32, %c0_i32_0 : i32, i32
  }
  func.func @transform_5(%arg0: i32) -> (i32, i32, i32) {
    %c0_i32 = arith.constant 0 : i32
    %c0_i32_0 = arith.constant 0 : i32
    %c0_i32_1 = arith.constant 0 : i32
    %c0_i32_2 = arith.constant 0 : i32
    return %c0_i32, %c0_i32_0, %c0_i32_1 : i32, i32, i32
  }
  func.func @transform_6(%arg0: i32) -> (i32, i32, i32) {
    %c0_i32 = arith.constant 0 : i32
    %c0_i32_0 = arith.constant 0 : i32
    %c0_i32_1 = arith.constant 0 : i32
    %c0_i32_2 = arith.constant 0 : i32
    return %c0_i32, %c0_i32_0, %c0_i32_1 : i32, i32, i32
  }
  func.func @transform_7(%arg0: i32) -> (i32, i32) {
    %c0_i32 = arith.constant 0 : i32
    %c0_i32_0 = arith.constant 0 : i32
    %c0_i32_1 = arith.constant 0 : i32
    return %c0_i32, %c0_i32_0 : i32, i32
  }
}

</mosaic_0001>

<bundles_post_ra>
// kernel: encoder_forward.2
= control target key start
LH: loop header
LB: loop body
LE: loop exit
PB: predicated region body
PF: predicated region fallthrough
CT: control target
= control target key end

     0   :  { %13 = vsyncpa [#allocation4], 0  ;;  %s2378_s0 = inlined_call_operand.hbm [shape: f32[64,16], index: 0, kind: input, shape index: {}]   ;;  %s2379_s1 = inlined_call_operand.hbm [shape: f32[8,8,1], index: 1, kind: input, shape index: {}]   ;;  %s2380_s2 = inlined_call_operand.hbm [shape: f32[16,128], index: 2, kind: input, shape index: {}]   ;;  %s2381_s3 = inlined_call_operand.hbm [shape: f32[1,128], index: 3, kind: input, shape index: {}]   ;;  %s2382_s4 = inlined_call_operand.hbm [shape: f32[32,128], index: 4, kind: input, shape index: {}]   ;;  %s2383_s5 = inlined_call_operand.hbm [shape: f32[8,8,32], index: 5, kind: output, shape index: {0}]   ;;  %s2384_s6 = inlined_call_operand.hbm [shape: f32[8,8,32], index: 6, kind: output, shape index: {1}]   ;;  %s2385_s7 = inlined_call_operand.hbm [shape: f32[8,32], index: 7, kind: output, shape index: {2}]  }
   0x1   :  { %14 = vsyncpa [#allocation7], 0 }
   0x2   :  { %15 = vsyncpa [#allocation10], 0 }
   0x3   :  { %16 = vsyncpa [#allocation5], 0 }
   0x4   :  { %17 = vsyncpa [#allocation14], 0  ;;  %s1899_s24 = smov [#allocation6]   ;;  %s1900_s26 = smov [#allocation9]  }
   0x5   :  { %s35_s25 = sshll.u32 %s1899_s24, 4  ;;  %s60_s27 = sshll.u32 %s1900_s26, 4  ;;  %s36_s25 = int_to_ptr.vmem [resolvable:$true] %s35_s25  ;;  %s1956_s27 = int_to_ptr.vmem [resolvable:$true] %s60_s27 }
   0x6   :  { %s1713_s30 = scalar_lea.hbm %s2379_s1, 1024 }
   0x7   :  { %p1714_p0 = scmp.ne.s32.totalorder %s2379_s1, %s1713_s30  ;;  %p1717_p1 = scmp.lt.u32.totalorder %s1713_s30, %s2379_s1 }
   0x9   :  { %p1719_p2 = pnand %p1717_p1, %p1714_p0 }
   0xb   :  { %1722 = shalt.err (!%p1719_p2)
}
   0xc   :  { %s1723_s12 = scalar_lea.vmem %s36_s25, 1024  ;;  %p1728_p4 = scmp.lt.s32.totalorder %s36_s25, %s36_s25 }
   0xd   :  { %p1724_p3 = scmp.ne.s32.totalorder %s36_s25, %s1723_s12  ;;  %p1729_p5 = scmp.lt.s32.totalorder %s1723_s12, %s1723_s12 }
   0xf   :  { %p1730_p6 = por %p1729_p5, %p1728_p4 }
  0x11   :  { %p1731_p7 = pnand %p1730_p6, %p1724_p3 }
  0x13   :  { %1734 = shalt.err (!%p1731_p7)
}
  0x14   :  { %s1901_s13 = smov 128   ;;  %s1902_s14 = smov 8  }
  0x15   :  { %41 = dma.hbm_to_vmem [thread:$0]  %s2379_s1, 1024, %s36_s25, [#allocation7], %s1901_s13, %s1901_s13, %s1902_s14  }
  0x16   :  { %s1735_s19 = scalar_lea.hbm %s2381_s3, 16 }
  0x17   :  { %p1736_p8 = scmp.ne.s32.totalorder %s2381_s3, %s1735_s19  ;;  %p1739_p9 = scmp.lt.u32.totalorder %s1735_s19, %s2381_s3 }
  0x19   :  { %p1741_p10 = pnand %p1739_p9, %p1736_p8 }
  0x1b   :  { %1744 = shalt.err (!%p1741_p10)
}
  0x1c   :  { %s1745_s24 = scalar_lea.vmem %s1956_s27, 16  ;;  %s1749_s1 = scalar_lea.vmem %s1956_s27, 32 }
  0x1d   :  { %p1746_p11 = scmp.ne.s32.totalorder %s1956_s27, %s1745_s24  ;;  %p1750_p12 = scmp.lt.s32.totalorder %s1956_s27, %s1956_s27 }
  0x1e   :  { %p1751_p13 = scmp.lt.s32.totalorder %s1749_s1, %s1745_s24 }
  0x20   :  { %p1752_p0 = por %p1751_p13, %p1750_p12 }
  0x22   :  { %p1753_p1 = pnand %p1752_p0, %p1746_p11 }
  0x24   :  { %1756 = shalt.err (!%p1753_p1)
}
  0x25   :  { %63 = dma.hbm_to_vmem [thread:$0]  %s2381_s3, 16, %s1956_s27, [#allocation10]  }
  0x26   :  { %s1903_s28 = smov [#allocation3]   ;;  %s1904_s30 = smov [#allocation8]  }
  0x27   :  { %s23_s29 = sshll.u32 %s1903_s28, 4  ;;  %s47_s8 = sshll.u32 %s1904_s30, 4  ;;  %s24_s29 = int_to_ptr.vmem [resolvable:$true] %s23_s29  ;;  %s1991_s8 = int_to_ptr.vmem [resolvable:$true] %s47_s8 }
  0x28   :  { %s1757_s11 = scalar_lea.hbm %s2378_s0, 1024 }
  0x29   :  { %p1758_p2 = scmp.ne.s32.totalorder %s2378_s0, %s1757_s11  ;;  %p1761_p3 = scmp.lt.u32.totalorder %s1757_s11, %s2378_s0 }
  0x2b   :  { %p1763_p4 = pnand %p1761_p3, %p1758_p2 }
  0x2d   :  { %1766 = shalt.err (!%p1763_p4)
}
  0x2e   :  { %s1767_s3 = scalar_lea.vmem %s24_s29, 1024  ;;  %p1772_p6 = scmp.lt.s32.totalorder %s24_s29, %s24_s29 }
  0x2f   :  { %p1768_p5 = scmp.ne.s32.totalorder %s24_s29, %s1767_s3  ;;  %p1773_p7 = scmp.lt.s32.totalorder %s1767_s3, %s1767_s3 }
  0x31   :  { %p1774_p8 = por %p1773_p7, %p1772_p6 }
  0x33   :  { %p1775_p9 = pnand %p1774_p8, %p1768_p5 }
  0x35   :  { %1778 = shalt.err (!%p1775_p9)
}
  0x36   :  { %29 = dma.hbm_to_vmem [thread:$0]  %s2378_s0, 1024, %s24_s29, [#allocation4], %s1901_s13, %s1901_s13, %s1902_s14  }
  0x37   :  { %s1779_s21 = scalar_lea.hbm %s2380_s2, 256 }
  0x38   :  { %p1780_p10 = scmp.ne.s32.totalorder %s2380_s2, %s1779_s21  ;;  %p1783_p11 = scmp.lt.u32.totalorder %s1779_s21, %s2380_s2 }
  0x3a   :  { %p1785_p12 = pnand %p1783_p11, %p1780_p10 }
  0x3c   :  { %1788 = shalt.err (!%p1785_p12)
}
  0x3d   :  { %s1789_s25 = scalar_lea.vmem %s1991_s8, 256  ;;  %p1794_p0 = scmp.lt.s32.totalorder %s1991_s8, %s1991_s8 }
  0x3e   :  { %p1790_p13 = scmp.ne.s32.totalorder %s1991_s8, %s1789_s25  ;;  %p1795_p1 = scmp.lt.s32.totalorder %s1789_s25, %s1789_s25 }
  0x40   :  { %p1796_p2 = por %p1795_p1, %p1794_p0 }
  0x42   :  { %p1797_p3 = pnand %p1796_p2, %p1790_p13 }
  0x44   :  { %1800 = shalt.err (!%p1797_p3)
}
  0x45   :  { %53 = dma.hbm_to_vmem [thread:$0]  %s2380_s2, 256, %s1991_s8, [#allocation7], %s1901_s13, %s1901_s13, %s1902_s14  }
  0x46   :  { %s1905_s28 = smov [#allocation11]   ;;  %s1801_s10 = scalar_lea.hbm %s2382_s4, 512 }
  0x47   :  { %s69_s29 = sshll.u32 %s1905_s28, 4  ;;  %p1802_p4 = scmp.ne.s32.totalorder %s2382_s4, %s1801_s10  ;;  %s70_s29 = int_to_ptr.vmem [resolvable:$true] %s69_s29 }
  0x48   :  { %p1805_p5 = scmp.lt.u32.totalorder %s1801_s10, %s2382_s4 }
  0x4a   :  { %p1807_p6 = pnand %p1805_p5, %p1802_p4 }
  0x4c   :  { %1810 = shalt.err (!%p1807_p6)
}
  0x4d   :  { %s1811_s17 = scalar_lea.vmem %s70_s29, 512  ;;  %p1816_p8 = scmp.lt.s32.totalorder %s70_s29, %s70_s29 }
  0x4e   :  { %p1812_p7 = scmp.ne.s32.totalorder %s70_s29, %s1811_s17  ;;  %p1817_p9 = scmp.lt.s32.totalorder %s1811_s17, %s1811_s17 }
  0x50   :  { %p1818_p10 = por %p1817_p9, %p1816_p8 }
  0x52   :  { %p1819_p11 = pnand %p1818_p10, %p1812_p7 }
  0x54   :  { %1822 = shalt.err (!%p1819_p11)
}
  0x55   :  { %75 = dma.hbm_to_vmem [thread:$0]  %s2382_s4, 512, %s70_s29, [#allocation10], %s1901_s13, %s1901_s13, %s1902_s14  }
  0x56   :  { %1889 = dma.done.wait [#allocation4], 1024  }
  0x57   :  { %1890 = vsyncadd [#allocation4], 4294966272 }
  0x58   :  { %1891 = dma.done.wait [#allocation7], 1280  }
  0x59   :  { %1892 = vsyncadd [#allocation7], 4294966016 }
  0x5a   :  { %1893 = dma.done.wait [#allocation10], 528  }
  0x5b   :  { %1894 = vsyncadd [#allocation10], 4294966768  ;;  %v1906_v0 = vmov 0.0|0.0   ;;  %vm1907_vm0 = vmmov 0   ;;  %v1908_v1 = vmov 0.0   ;;  %vm108_vm1 = vcmask 130048  }
  0x5c   :  { %1582 = vmatprep.subr.bf16.mxu1 %v1906_v0  ;;  %1498 = vmatprep.mubr.msk.f32.mxu1 %vm1907_vm0, %v1908_v1  ;;  %v99_v2 = vld [vmem:[#allocation8] sm:$0xff]  ;;  %v100_v3 = vld [vmem:[#allocation8 + $0x8] sm:$0xff]  ;;  %v246_v6 = vld [vmem:[#allocation11] sm:$0xff]  ;;  %v250_v19 = vlaneseq  ;;  %s1909_s4 = smov 64   ;;  %s1910_s3 = smov 32   ;;  %v1911_v60 = vmov 0  }
  0x5d   :  { %v91_v4 = vld [vmem:[#allocation3] sm:$0xff]  ;;  %v1578_v5 = vpack.c.bf16 %v100_v3, %v99_v2  ;;  %v92_v10 = vld [vmem:[#allocation3 + $0x8] sm:$0xff]  ;;  %v93_v12 = vld [vmem:[#allocation3 + $0x10] sm:$0xff]  ;;  %1648 = vset.pattern.permute.xlu0 %v1911_v60  ;;  %1647 = vset.pattern.permute.xlu1 %v1911_v60  ;;  %s1912_s27 = smov 96   ;;  %vm275_vm7 = vcmask 261120   ;;  %s1913_s18 = smov [#allocation13]  }
  0x5e   :  { %1478 = vmatprep.mubr.msk.f32.mxu0 %vm108_vm1, %v91_v4  ;;  %v247_v7 = vld [vmem:[#allocation11 + $0x8] sm:$0xff]  ;;  %v248_v9 = vld [vmem:[#allocation11 + $0x10] sm:$0xff]  ;;  %v249_v11 = vld [vmem:[#allocation11 + $0x18] sm:$0xff]  ;;  %v2076_v22 = vand.u32 127, %v250_v19  ;;  %s1369_s19 = sshll.u32 %s1913_s18, 4  ;;  %s1914_s20 = smov [#allocation12]   ;;  %s1370_s19 = int_to_ptr.vmem [resolvable:$true] %s1369_s19 }
  0x5f   :  { %1579 = vmatprep.subr.bf16.mxu0 %v1578_v5  ;;  %v2047_v8 = vpack.c.bf16 %v247_v7, %v246_v6  ;;  %v2050_v13 = vpack.c.bf16 %v249_v11, %v248_v9  ;;  %v94_v14 = vld [vmem:[#allocation3 + $0x18] sm:$0xff]  ;;  %v95_v15 = vld [vmem:[#allocation3 + $0x20] sm:$0xff]  ;;  %v96_v16 = vld [vmem:[#allocation3 + $0x28] sm:$0xff]  ;;  %s1357_s21 = sshll.u32 %s1914_s20, 4  ;;  %s1915_s22 = smov [#allocation15]   ;;  %s2319_s21 = int_to_ptr.vmem [resolvable:$true] %s1357_s21 }
  0x60   :  { %1581 = vmatpush3.bf16.msra.mxu0 %v1578_v5  ;;  %v97_v17 = vld [vmem:[#allocation3 + $0x30] sm:$0xff]  ;;  %v98_v18 = vld [vmem:[#allocation3 + $0x38] sm:$0xff]  ;;  %v256_v26 = vand.u32 31, %v2076_v22  ;;  %vm265_vm3 = vcmp.ge.s32.totalorder %v2076_v22, 64  ;;  %vm266_vm4 = vcmp.lt.s32.totalorder %v2076_v22, 96  ;;  %v2145_v4 = vld [vmem:[#allocation6] sm:$0xff]  ;;  %p1828_p13 = scmp.lt.s32.totalorder %s1370_s19, %s1370_s19 }
  0x61   :  { %1584 = vmatpush3.bf16.msra.mxu1 %v2047_v8  ;;  %1594 = vmatprep.subr.bf16.mxu0 %v1906_v0  ;;  %v1400_v20 = vld [vmem:[#allocation9] ss:$0 sm:$0xff]  ;;  %vm2133_vm5 = vmand %vm265_vm3, %vm266_vm4  ;;  %v2141_v61 = vld [vmem:[#allocation6 + $0x38] sm:$0xff]  ;;  %vm268_vm6 = vcmp.lt.s32.totalorder %v2076_v22, 16  ;;  %s1382_s23 = sshll.u32 %s1915_s22, 4  ;;  %s1823_s24 = scalar_lea.vmem %s1370_s19, 1024  ;;  %s2324_s23 = int_to_ptr.vmem [resolvable:$true] %s1382_s23 }
  0x62   :  { %1585 = vmatprep.subr.bf16.mxu1 %v1906_v0  ;;  %vm2085_vm2 = vcmp.lt.s32.totalorder %v256_v26, 16  ;;  %p1824_p12 = scmp.ne.s32.totalorder %s1370_s19, %s1823_s24  ;;  %p1829_p0 = scmp.lt.s32.totalorder %s1823_s24, %s1823_s24 }
  0x63   :  { %1479 = vmatmul.mubr.msk.f32.vlgmr.msra.gmra.mrb[0].mxu0 %vm108_vm1, %v92_v10 }
  0x64   :  { %1481 = vmatprep.mubr.msk.f32.mxu0 %vm108_vm1, %v93_v12  ;;  %1596 = vmatpush3.bf16.msra.mxu0 %v2047_v8  ;;  %p1830_p1 = por %p1829_p0, %p1828_p13 }
  0x65   :  { %1587 = vmatpush3.bf16.msra.mxu1 %v2050_v13  ;;  %1597 = vmatprep.subr.bf16.mxu0 %v1906_v0 }
  0x66   :  { %1588 = vmatprep.subr.bf16.mxu1 %v1906_v0  ;;  %p1831_p2 = pnand %p1830_p1, %p1824_p12 }
  0x67   :  { %1482 = vmatmul.mubr.msk.f32.gmra.mrb[2].mxu0 %vm108_vm1, %v94_v14 }
  0x68   :  { %1484 = vmatprep.mubr.msk.f32.mxu0 %vm108_vm1, %v95_v15  ;;  %1499 = vmatmul.mubr.f32.vlgmr.msra.gmra.mrb[0].mxu1 %v1908_v1 }
  0x69   :  { %1590 = vmatpush3.bf16.msra.mxu1 %v2047_v8  ;;  %1509 = vmatprep.mubr.msk.f32.mxu1 %vm1907_vm0, %v1908_v1 }
  0x6a   :  { %1591 = vmatprep.subr.bf16.mxu1 %v1906_v0  ;;  %1599 = vmatpush3.bf16.msra.mxu0 %v2050_v13 }
  0x6b   :  { %1485 = vmatmul.mubr.msk.f32.gmra.mrb[4].mxu0 %vm108_vm1, %v96_v16  ;;  %1606 = vmatprep.subr.bf16.mxu0 %v1906_v0 }
  0x6c   :  { %1487 = vmatprep.mubr.msk.f32.mxu0 %vm108_vm1, %v97_v17 }
  0x6d   :  { %1593 = vmatpush3.bf16.msra.mxu1 %v2050_v13 }
  0x6e   :  { %1600 = vmatprep.subr.bf16.mxu1 %v1906_v0 }
  0x6f   :  { %1488 = vmatmul.mubr.msk.f32.gmra.mrb[6].mxu0 %vm108_vm1, %v98_v18 }
  0x70   :  { %1520 = vmatprep.mubr.msk.f32.mxu0 %vm1907_vm0, %v1908_v1 }
 0x136   :  { %v1480_v21 = vpop.f32.mrb[0].mxu0 }
 0x137   :  { %v2078_v23 = vadd.f32 %v1480_v21, %v1400_v20  ;;  %v199_v24 = vpop.f32.mrb[1].mxu0 }
 0x138   :  { %v2109_v42 = vadd.f32 %v1400_v20, %v199_v24 }
 0x13a   :  { %v1483_v25 = vpop.f32.mrb[2].mxu0 }
 0x13b   :  { %v2081_v27 = vadd.f32 %v1483_v25, %v1400_v20  ;;  %v209_v28 = vpop.f32.mrb[3].mxu0  ;;  %v345_v29 = vpop.f32.mrb[0].mxu1 }
 0x13c   :  { %v2083_v30 = vadd.f32 %v1400_v20, %v209_v28  ;;  %v1500_v31 = vpop.f32.mrb[1].mxu1 }
 0x13d   :  { %v2167_v31 = vld [vmem:[#allocation6 + $0x8] sm:$0xff] }
 0x13e   :  { %v1486_v32 = vpop.f32.mrb[4].mxu0 }
 0x13f   :  { %v2089_v34 = vadd.f32 %v1486_v32, %v1400_v20  ;;  %v219_v35 = vpop.f32.mrb[5].mxu0 }
 0x140   :  { %v2091_v36 = vadd.f32 %v1400_v20, %v219_v35 }
 0x141   :  { %v549_v37 = vsel %vm2085_vm2, %v2083_v30, %v2089_v34  ;;  %v957_v38 = vsel %vm2085_vm2, %v2089_v34, %v2083_v30 }
 0x142   :  { %v1489_v39 = vpop.f32.mrb[6].mxu0  ;;  %v687_v40 = vsel %vm2085_vm2, %v2081_v27, %v2091_v36  ;;  %v823_v41 = vsel %vm2085_vm2, %v2091_v36, %v2081_v27 }
 0x143   :  { %v2111_v43 = vadd.f32 %v1489_v39, %v1400_v20  ;;  %v229_v44 = vpop.f32.mrb[7].mxu0 }
 0x144   :  { %v2113_v45 = vadd.f32 %v1400_v20, %v229_v44 }
 0x145   :  { %v274_v46 = vsel %vm2085_vm2, %v2109_v42, %v2111_v43  ;;  %v1225_v47 = vsel %vm2085_vm2, %v2111_v43, %v2109_v42 }
 0x146   :  { %v349_v48 = vadd.f32 %v345_v29, %v274_v46  ;;  %v411_v49 = vsel %vm2085_vm2, %v2078_v23, %v2113_v45  ;;  %v1091_v50 = vsel %vm2085_vm2, %v2113_v45, %v2078_v23 }
 0x148   :  { %v1409_v51 = vmul.f32 -1.442695, %v349_v48 }
 0x14a   :  { %1649 = vpow2.f32 %v1409_v51 }
 0x14b   :  { %1651 = vtanh.f32 %v349_v48  ;;  %v2171_v48 = vld [vmem:[#allocation6 + $0x30] sm:$0xff] }
 0x154   :  { %v1650_v52 = vpop.eup %1649 }
 0x155   :  { %v354_v53 = vadd.f32 1.0, %v1650_v52  ;;  %v1652_v55 = vpop.eup %1651 }
 0x157   :  { %1653 = vrcp.f32 %v354_v53 }
 0x161   :  { %v1654_v56 = vpop.eup %1653 }
 0x162   :  { %v359_v57 = vsel %vm2133_vm5, %v1652_v55, %v1654_v56 }
 0x163   :  { %362 = vrot.lane.b32.xlu0 %v359_v57, %s1909_s4  ;;  %v360_v62 = vmul.f32 0.0, %v359_v57 }
 0x1d5   :  { %v363_v58 = vpop.permute.xlu0 %362 }
 0x1d6   :  { %v365_v59 = vmul.f32 %v363_v58, %v359_v57 }
 0x1d8   :  { %367 = vrot.lane.b32.xlu0 %v365_v59, %s1910_s3 }
 0x1dc   :  { %389 = vperm.xlu0 %1648, %v2141_v61  }
 0x24a   :  { %v368_v63 = vpop.permute.xlu0 %367 }
 0x24b   :  { %v370_v2 = vadd.f32 %v368_v63, %v360_v62 }
 0x24d   :  { %1655 = vtanh.f32 %v370_v2 }
 0x257   :  { %v1656_v3 = vpop.eup %1655 }
 0x258   :  { %373 = vrot.lane.b32.xlu1 %v1656_v3, %s1909_s4 }
 0x25b   :  { %v390_v7 = vpop.permute.xlu0 %389 }
 0x25c   :  { %384 = vperm.xlu1 %1647, %v2145_v4  }
 0x2ca   :  { %v374_v5 = vpop.permute.xlu1 %373 }
 0x2cb   :  { %v376_v6 = vmul.f32 %v374_v5, %v359_v57 }
 0x2cd   :  { %395 = vrot.lane.b32.xlu1 %v376_v6, %s1910_s3 }
 0x2d1   :  { %400 = vrot.lane.b32.xlu1 %v370_v2, %s1912_s27 }
 0x2db   :  { %v385_v9 = vpop.permute.xlu1 %384 }
 0x2dc   :  { %v392_v10 = vsel %vm268_vm6, %v385_v9, %v390_v7 }
 0x2dd   :  { %vm393_vm8 = vcmp.gt.f32.partialorder %v392_v10, 0.5 }
 0x33f   :  { %v396_v11 = vpop.permute.xlu1 %395 }
 0x340   :  { %v398_v12 = vsel %vm393_vm8, %v396_v11, 0.0 }
 0x341   :  { %404 = vst.msk [vmem:[#allocation12] sm:$0xff] %vm275_vm7, %v398_v12  ;;  %406 = vst.msk [vmem:[#allocation13 + $0x38] sm:$0xff] %vm275_vm7, %v398_v12  ;;  %1510 = vmatmul.mubr.msk.f32.vlgmr.msra.gmra.mrb[2].mxu1 %vm275_vm7, %v398_v12 }
 0x342   :  { %1602 = vmatpush3.bf16.msra.mxu1 %v2047_v8  ;;  %1531 = vmatprep.mubr.msk.f32.mxu1 %vm1907_vm0, %v1908_v1 }
 0x343   :  { %v401_v14 = vpop.permute.xlu1 %400  ;;  %1603 = vmatprep.subr.bf16.mxu1 %v1906_v0 }
 0x344   :  { %v403_v15 = vsel %vm393_vm8, %v401_v14, 0.0 }
 0x345   :  { %495 = vrot.lane.b32.xlu1 %v403_v15, %s1910_s3 }
 0x346   :  { %1605 = vmatpush3.bf16.msra.mxu1 %v2050_v13 }
 0x347   :  { %1612 = vmatprep.subr.bf16.mxu1 %v1906_v0 }
 0x3b7   :  { %v496_v32 = vpop.permute.xlu1 %495 }
 0x414   :  { %v481_v16 = vpop.f32.mrb[2].mxu1 }
 0x415   :  { %v485_v17 = vadd.f32 %v481_v16, %v411_v49  ;;  %v1511_v18 = vpop.f32.mrb[3].mxu1 }
 0x416   :  { %v2201_v18 = vld [vmem:[#allocation6 + $0x28] sm:$0xff] }
 0x417   :  { %v1411_v19 = vmul.f32 -1.442695, %v485_v17 }
 0x419   :  { %1657 = vpow2.f32 %v1411_v19 }
 0x41a   :  { %1659 = vtanh.f32 %v485_v17 }
 0x423   :  { %v1658_v20 = vpop.eup %1657 }
 0x424   :  { %v490_v21 = vadd.f32 1.0, %v1658_v20  ;;  %v1660_v24 = vpop.eup %1659 }
 0x426   :  { %1661 = vrcp.f32 %v490_v21 }
 0x430   :  { %v1662_v25 = vpop.eup %1661 }
 0x431   :  { %v493_v26 = vsel %vm2133_vm5, %v1660_v24, %v1662_v25 }
 0x432   :  { %500 = vrot.lane.b32.xlu0 %v493_v26, %s1909_s4  ;;  %v498_v35 = vmul.f32 %v496_v32, %v493_v26 }
 0x4a4   :  { %v501_v28 = vpop.permute.xlu0 %500 }
 0x4a5   :  { %v503_v29 = vmul.f32 %v501_v28, %v493_v26 }
 0x4a7   :  { %505 = vrot.lane.b32.xlu0 %v503_v29, %s1910_s3 }
 0x4ab   :  { %521 = vperm.xlu0 %1648, %v2167_v31  }
 0x519   :  { %v506_v39 = vpop.permute.xlu0 %505 }
 0x51a   :  { %v508_v44 = vadd.f32 %v506_v39, %v498_v35 }
 0x51c   :  { %1663 = vtanh.f32 %v508_v44 }
 0x526   :  { %v1664_v46 = vpop.eup %1663 }
 0x527   :  { %511 = vrot.lane.b32.xlu1 %v1664_v46, %s1909_s4 }
 0x52a   :  { %v522_v52 = vpop.permute.xlu0 %521 }
 0x52b   :  { %526 = vperm.xlu1 %1647, %v2171_v48  }
 0x52f   :  { %537 = vrot.lane.b32.xlu1 %v508_v44, %s1912_s27 }
 0x599   :  { %v512_v49 = vpop.permute.xlu1 %511 }
 0x59a   :  { %v514_v51 = vmul.f32 %v512_v49, %v493_v26 }
 0x59c   :  { %532 = vrot.lane.b32.xlu0 %v514_v51, %s1910_s3 }
 0x5aa   :  { %v527_v53 = vpop.permute.xlu1 %526 }
 0x5ab   :  { %v529_v55 = vsel %vm268_vm6, %v522_v52, %v527_v53 }
 0x5ac   :  { %vm530_vm9 = vcmp.gt.f32.partialorder %v529_v55, 0.5 }
 0x5ae   :  { %v538_v56 = vpop.permute.xlu1 %537 }
 0x5af   :  { %v540_v57 = vsel %vm530_vm9, %v538_v56, %v403_v15 }
 0x5b0   :  { %633 = vrot.lane.b32.xlu1 %v540_v57, %s1910_s3 }
 0x60e   :  { %v533_v58 = vpop.permute.xlu0 %532 }
 0x60f   :  { %v535_v59 = vsel %vm530_vm9, %v533_v58, %v398_v12  ;;  %v2197_v12 = vld [vmem:[#allocation6 + $0x10] sm:$0xff]  ;;  %v792_v58 = vld [vmem:[#allocation6 + $0x18] sm:$0xff] }
 0x610   :  { %542 = vst.msk [vmem:[#allocation12 + $0x8] sm:$0xff] %vm275_vm7, %v535_v59  ;;  %544 = vst.msk [vmem:[#allocation13 + $0x30] sm:$0xff] %vm275_vm7, %v535_v59  ;;  %1521 = vmatmul.mubr.msk.f32.vlgmr.msra.gmra.mrb[8].mxu0 %vm275_vm7, %v535_v59 }
 0x611   :  { %1608 = vmatpush3.bf16.msra.mxu0 %v2047_v8  ;;  %1542 = vmatprep.mubr.msk.f32.mxu0 %vm1907_vm0, %v1908_v1 }
 0x612   :  { %1609 = vmatprep.subr.bf16.mxu0 %v1906_v0 }
 0x615   :  { %1611 = vmatpush3.bf16.msra.mxu0 %v2050_v13 }
 0x616   :  { %1618 = vmatprep.subr.bf16.mxu0 %v1906_v0 }
 0x6e3   :  { %v619_v60 = vpop.f32.mrb[8].mxu0 }
 0x6e4   :  { %v623_v62 = vadd.f32 %v619_v60, %v549_v37  ;;  %v1522_v63 = vpop.f32.mrb[9].mxu0  ;;  %v634_v37 = vpop.permute.xlu1 %633 }
 0x6e6   :  { %v1413_v2 = vmul.f32 -1.442695, %v623_v62 }
 0x6e8   :  { %1665 = vpow2.f32 %v1413_v2  ;;  %v794_v2 = vld [vmem:[#allocation6 + $0x20] sm:$0xff] }
 0x6e9   :  { %1667 = vtanh.f32 %v623_v62 }
 0x6f2   :  { %v1666_v3 = vpop.eup %1665 }
 0x6f3   :  { %v628_v5 = vadd.f32 1.0, %v1666_v3  ;;  %v1668_v6 = vpop.eup %1667 }
 0x6f5   :  { %1669 = vrcp.f32 %v628_v5 }
 0x6ff   :  { %v1670_v7 = vpop.eup %1669 }
 0x700   :  { %v631_v9 = vsel %vm2133_vm5, %v1668_v6, %v1670_v7 }
 0x701   :  { %638 = vrot.lane.b32.xlu0 %v631_v9, %s1909_s4  ;;  %v636_v14 = vmul.f32 %v634_v37, %v631_v9 }
 0x773   :  { %v639_v10 = vpop.permute.xlu0 %638 }
 0x774   :  { %v641_v11 = vmul.f32 %v639_v10, %v631_v9 }
 0x776   :  { %643 = vrot.lane.b32.xlu0 %v641_v11, %s1910_s3 }
 0x77a   :  { %659 = vperm.xlu0 %1648, %v2197_v12  }
 0x7e8   :  { %v644_v15 = vpop.permute.xlu0 %643 }
 0x7e9   :  { %v646_v16 = vadd.f32 %v644_v15, %v636_v14 }
 0x7eb   :  { %1671 = vtanh.f32 %v646_v16 }
 0x7f5   :  { %v1672_v17 = vpop.eup %1671 }
 0x7f6   :  { %649 = vrot.lane.b32.xlu1 %v1672_v17, %s1909_s4 }
 0x7f9   :  { %v660_v21 = vpop.permute.xlu0 %659 }
 0x7fa   :  { %664 = vperm.xlu1 %1647, %v2201_v18  }
 0x7fe   :  { %675 = vrot.lane.b32.xlu1 %v646_v16, %s1912_s27 }
 0x868   :  { %v650_v19 = vpop.permute.xlu1 %649 }
 0x869   :  { %v652_v20 = vmul.f32 %v650_v19, %v631_v9 }
 0x86b   :  { %670 = vrot.lane.b32.xlu0 %v652_v20, %s1910_s3 }
 0x879   :  { %v665_v24 = vpop.permute.xlu1 %664 }
 0x87a   :  { %v667_v25 = vsel %vm268_vm6, %v660_v21, %v665_v24 }
 0x87b   :  { %vm668_vm10 = vcmp.gt.f32.partialorder %v667_v25, 0.5 }
 0x87d   :  { %v676_v26 = vpop.permute.xlu1 %675 }
 0x87e   :  { %v678_v28 = vsel %vm668_vm10, %v676_v26, %v540_v57 }
 0x87f   :  { %771 = vrot.lane.b32.xlu1 %v678_v28, %s1910_s3 }
 0x8dd   :  { %v671_v29 = vpop.permute.xlu0 %670 }
 0x8de   :  { %v673_v32 = vsel %vm668_vm10, %v671_v29, %v535_v59 }
 0x8df   :  { %680 = vst.msk [vmem:[#allocation12 + $0x10] sm:$0xff] %vm275_vm7, %v673_v32  ;;  %682 = vst.msk [vmem:[#allocation13 + $0x28] sm:$0xff] %vm275_vm7, %v673_v32  ;;  %1532 = vmatmul.mubr.msk.f32.vlgmr.msra.gmra.mrb[4].mxu1 %vm275_vm7, %v673_v32 }
 0x8e0   :  { %1614 = vmatpush3.bf16.msra.mxu1 %v2047_v8  ;;  %1553 = vmatprep.mubr.msk.f32.mxu1 %vm1907_vm0, %v1908_v1 }
 0x8e1   :  { %1615 = vmatprep.subr.bf16.mxu1 %v1906_v0 }
 0x8e4   :  { %1617 = vmatpush3.bf16.msra.mxu1 %v2050_v13 }
 0x8e5   :  { %1624 = vmatprep.subr.bf16.mxu1 %v1906_v0 }
 0x9b2   :  { %v757_v35 = vpop.f32.mrb[4].mxu1 }
 0x9b3   :  { %v761_v39 = vadd.f32 %v757_v35, %v687_v40  ;;  %v1533_v44 = vpop.f32.mrb[5].mxu1  ;;  %v772_v40 = vpop.permute.xlu1 %771 }
 0x9b5   :  { %v1415_v46 = vmul.f32 -1.442695, %v761_v39 }
 0x9b7   :  { %1673 = vpow2.f32 %v1415_v46 }
 0x9b8   :  { %1675 = vtanh.f32 %v761_v39 }
 0x9c1   :  { %v1674_v49 = vpop.eup %1673 }
 0x9c2   :  { %v766_v51 = vadd.f32 1.0, %v1674_v49  ;;  %v1676_v52 = vpop.eup %1675 }
 0x9c4   :  { %1677 = vrcp.f32 %v766_v51 }
 0x9ce   :  { %v1678_v53 = vpop.eup %1677 }
 0x9cf   :  { %v769_v55 = vsel %vm2133_vm5, %v1676_v52, %v1678_v53 }
 0x9d0   :  { %776 = vrot.lane.b32.xlu0 %v769_v55, %s1909_s4  ;;  %v774_v59 = vmul.f32 %v772_v40, %v769_v55 }
 0xa42   :  { %v777_v56 = vpop.permute.xlu0 %776 }
 0xa43   :  { %v779_v57 = vmul.f32 %v777_v56, %v769_v55 }
 0xa45   :  { %781 = vrot.lane.b32.xlu0 %v779_v57, %s1910_s3 }
 0xa49   :  { %797 = vperm.xlu0 %1648, %v792_v58  }
 0xab7   :  { %v782_v60 = vpop.permute.xlu0 %781 }
 0xab8   :  { %v784_v62 = vadd.f32 %v782_v60, %v774_v59 }
 0xaba   :  { %1679 = vtanh.f32 %v784_v62 }
 0xac4   :  { %v1680_v63 = vpop.eup %1679 }
 0xac5   :  { %787 = vrot.lane.b32.xlu1 %v1680_v63, %s1909_s4 }
 0xac8   :  { %v798_v6 = vpop.permute.xlu0 %797 }
 0xac9   :  { %802 = vperm.xlu1 %1647, %v794_v2  }
 0xacd   :  { %813 = vrot.lane.b32.xlu1 %v784_v62, %s1912_s27 }
 0xb37   :  { %v788_v3 = vpop.permute.xlu1 %787 }
 0xb38   :  { %v790_v5 = vmul.f32 %v788_v3, %v769_v55 }
 0xb3a   :  { %808 = vrot.lane.b32.xlu0 %v790_v5, %s1910_s3 }
 0xb48   :  { %v803_v7 = vpop.permute.xlu1 %802 }
 0xb49   :  { %v805_v9 = vsel %vm268_vm6, %v798_v6, %v803_v7 }
 0xb4a   :  { %vm806_vm11 = vcmp.gt.f32.partialorder %v805_v9, 0.5 }
 0xb4c   :  { %v814_v10 = vpop.permute.xlu1 %813 }
 0xb4d   :  { %v816_v11 = vsel %vm806_vm11, %v814_v10, %v678_v28 }
 0xb4e   :  { %907 = vrot.lane.b32.xlu1 %v816_v11, %s1910_s3 }
 0xbac   :  { %v809_v37 = vpop.permute.xlu0 %808 }
 0xbad   :  { %v811_v14 = vsel %vm806_vm11, %v809_v37, %v673_v32 }
 0xbae   :  { %818 = vst.msk [vmem:[#allocation12 + $0x18] sm:$0xff] %vm275_vm7, %v811_v14  ;;  %820 = vst.msk [vmem:[#allocation13 + $0x20] sm:$0xff] %vm275_vm7, %v811_v14  ;;  %1543 = vmatmul.mubr.msk.f32.vlgmr.msra.gmra.mrb[10].mxu0 %vm275_vm7, %v811_v14 }
 0xbaf   :  { %1620 = vmatpush3.bf16.msra.mxu0 %v2047_v8  ;;  %1564 = vmatprep.mubr.msk.f32.mxu0 %vm1907_vm0, %v1908_v1 }
 0xbb0   :  { %1621 = vmatprep.subr.bf16.mxu0 %v1906_v0 }
 0xbb3   :  { %1623 = vmatpush3.bf16.msra.mxu0 %v2050_v13 }
 0xbc0   :  { %v908_v27 = vpop.permute.xlu1 %907 }
 0xc81   :  { %v893_v15 = vpop.f32.mrb[10].mxu0 }
 0xc82   :  { %v897_v16 = vadd.f32 %v893_v15, %v823_v41  ;;  %v1544_v17 = vpop.f32.mrb[11].mxu0 }
 0xc84   :  { %v1417_v19 = vmul.f32 -1.442695, %v897_v16 }
 0xc86   :  { %1681 = vpow2.f32 %v1417_v19 }
 0xc87   :  { %1683 = vtanh.f32 %v897_v16 }
 0xc90   :  { %v1682_v20 = vpop.eup %1681 }
 0xc91   :  { %v902_v21 = vadd.f32 1.0, %v1682_v20  ;;  %v1684_v24 = vpop.eup %1683 }
 0xc93   :  { %1685 = vrcp.f32 %v902_v21 }
 0xc9d   :  { %v1686_v25 = vpop.eup %1685 }
 0xc9e   :  { %v905_v26 = vsel %vm2133_vm5, %v1684_v24, %v1686_v25 }
 0xc9f   :  { %912 = vrot.lane.b32.xlu0 %v905_v26, %s1909_s4  ;;  %v910_v36 = vmul.f32 %v908_v27, %v905_v26 }
 0xd11   :  { %v913_v28 = vpop.permute.xlu0 %912 }
 0xd12   :  { %v915_v29 = vmul.f32 %v913_v28, %v905_v26 }
 0xd14   :  { %917 = vrot.lane.b32.xlu0 %v915_v29, %s1910_s3 }
 0xd18   :  { %931 = vperm.xlu0 %1648, %v794_v2  }
 0xd86   :  { %v918_v41 = vpop.permute.xlu0 %917 }
 0xd87   :  { %v920_v32 = vadd.f32 %v918_v41, %v910_v36 }
 0xd89   :  { %1687 = vtanh.f32 %v920_v32 }
 0xd93   :  { %v1688_v35 = vpop.eup %1687 }
 0xd94   :  { %923 = vrot.lane.b32.xlu1 %v1688_v35, %s1909_s4 }
 0xd97   :  { %v932_v46 = vpop.permute.xlu0 %931 }
 0xd98   :  { %936 = vperm.xlu1 %1647, %v792_v58  }
 0xd9c   :  { %947 = vrot.lane.b32.xlu1 %v920_v32, %s1912_s27 }
 0xe06   :  { %v924_v39 = vpop.permute.xlu1 %923 }
 0xe07   :  { %v926_v44 = vmul.f32 %v924_v39, %v905_v26 }
 0xe09   :  { %942 = vrot.lane.b32.xlu0 %v926_v44, %s1910_s3 }
 0xe17   :  { %v937_v49 = vpop.permute.xlu1 %936 }
 0xe18   :  { %v939_v51 = vsel %vm268_vm6, %v932_v46, %v937_v49 }
 0xe19   :  { %vm940_vm12 = vcmp.gt.f32.partialorder %v939_v51, 0.5 }
 0xe1b   :  { %v948_v52 = vpop.permute.xlu1 %947 }
 0xe1c   :  { %v950_v53 = vsel %vm940_vm12, %v948_v52, %v816_v11 }
 0xe1d   :  { %1041 = vrot.lane.b32.xlu1 %v950_v53, %s1910_s3 }
 0xe7b   :  { %v943_v55 = vpop.permute.xlu0 %942 }
 0xe7c   :  { %v945_v56 = vsel %vm940_vm12, %v943_v55, %v811_v14 }
 0xe7d   :  { %952 = vst.msk [vmem:[#allocation12 + $0x20] sm:$0xff] %vm275_vm7, %v945_v56  ;;  %954 = vst.msk [vmem:[#allocation13 + $0x18] sm:$0xff] %vm275_vm7, %v945_v56  ;;  %1554 = vmatmul.mubr.msk.f32.vlgmr.msra.gmra.mrb[6].mxu1 %vm275_vm7, %v945_v56 }
 0xe7e   :  { %1626 = vmatpush3.bf16.msra.mxu1 %v2047_v8  ;;  %1575 = vmatprep.mubr.msk.f32.mxu1 %vm1907_vm0, %v1908_v1 }
 0xe7f   :  { %1627 = vmatprep.subr.bf16.mxu1 %v1906_v0 }
 0xe82   :  { %1629 = vmatpush3.bf16.msra.mxu1 %v2050_v13 }
 0xe8f   :  { %v1042_v30 = vpop.permute.xlu1 %1041 }
 0xf50   :  { %v1027_v57 = vpop.f32.mrb[6].mxu1 }
 0xf51   :  { %v1031_v58 = vadd.f32 %v1027_v57, %v957_v38  ;;  %v1555_v40 = vpop.f32.mrb[7].mxu1 }
 0xf53   :  { %v1419_v59 = vmul.f32 -1.442695, %v1031_v58 }
 0xf55   :  { %1689 = vpow2.f32 %v1419_v59 }
 0xf56   :  { %1691 = vtanh.f32 %v1031_v58 }
 0xf5f   :  { %v1690_v60 = vpop.eup %1689 }
 0xf60   :  { %v1036_v62 = vadd.f32 1.0, %v1690_v60  ;;  %v1692_v8 = vpop.eup %1691 }
 0xf62   :  { %1693 = vrcp.f32 %v1036_v62 }
 0xf6c   :  { %v1694_v1 = vpop.eup %1693 }
 0xf6d   :  { %v1039_v0 = vsel %vm2133_vm5, %v1692_v8, %v1694_v1 }
 0xf6e   :  { %1046 = vrot.lane.b32.xlu0 %v1039_v0, %s1909_s4  ;;  %v1044_v34 = vmul.f32 %v1042_v30, %v1039_v0 }
 0xfe0   :  { %v1047_v13 = vpop.permute.xlu0 %1046 }
 0xfe1   :  { %v1049_v63 = vmul.f32 %v1047_v13, %v1039_v0 }
 0xfe3   :  { %1051 = vrot.lane.b32.xlu0 %v1049_v63, %s1910_s3 }
 0xfe7   :  { %1065 = vperm.xlu0 %1648, %v2201_v18  }
0x1055   :  { %v1052_v38 = vpop.permute.xlu0 %1051 }
0x1056   :  { %v1054_v2 = vadd.f32 %v1052_v38, %v1044_v34 }
0x1058   :  { %1695 = vtanh.f32 %v1054_v2 }
0x1062   :  { %v1696_v3 = vpop.eup %1695 }
0x1063   :  { %1057 = vrot.lane.b32.xlu1 %v1696_v3, %s1909_s4 }
0x1066   :  { %v1066_v7 = vpop.permute.xlu0 %1065 }
0x1067   :  { %1070 = vperm.xlu1 %1647, %v2197_v12  }
0x106b   :  { %1081 = vrot.lane.b32.xlu1 %v1054_v2, %s1912_s27 }
0x10d5   :  { %v1058_v5 = vpop.permute.xlu1 %1057 }
0x10d6   :  { %v1060_v6 = vmul.f32 %v1058_v5, %v1039_v0 }
0x10d8   :  { %1076 = vrot.lane.b32.xlu0 %v1060_v6, %s1910_s3 }
0x10e6   :  { %v1071_v9 = vpop.permute.xlu1 %1070 }
0x10e7   :  { %v1073_v18 = vsel %vm268_vm6, %v1066_v7, %v1071_v9 }
0x10e8   :  { %vm1074_vm13 = vcmp.gt.f32.partialorder %v1073_v18, 0.5 }
0x10ea   :  { %v1082_v10 = vpop.permute.xlu1 %1081 }
0x10eb   :  { %v1084_v11 = vsel %vm1074_vm13, %v1082_v10, %v950_v53 }
0x10ec   :  { %1175 = vrot.lane.b32.xlu1 %v1084_v11, %s1910_s3 }
0x114a   :  { %v1077_v37 = vpop.permute.xlu0 %1076 }
0x114b   :  { %v1079_v14 = vsel %vm1074_vm13, %v1077_v37, %v945_v56 }
0x114c   :  { %1086 = vst.msk [vmem:[#allocation12 + $0x28] sm:$0xff] %vm275_vm7, %v1079_v14  ;;  %1088 = vst.msk [vmem:[#allocation13 + $0x10] sm:$0xff] %vm275_vm7, %v1079_v14  ;;  %1565 = vmatmul.mubr.msk.f32.vlgmr.msra.gmra.mrb[12].mxu0 %vm275_vm7, %v1079_v14 }
0x115e   :  { %v1176_v23 = vpop.permute.xlu1 %1175 }
0x121f   :  { %v1161_v12 = vpop.f32.mrb[12].mxu0 }
0x1220   :  { %v1165_v15 = vadd.f32 %v1161_v12, %v1091_v50  ;;  %v1566_v16 = vpop.f32.mrb[13].mxu0 }
0x1222   :  { %v1421_v17 = vmul.f32 -1.442695, %v1165_v15 }
0x1224   :  { %1697 = vpow2.f32 %v1421_v17 }
0x1225   :  { %1699 = vtanh.f32 %v1165_v15 }
0x122e   :  { %v1698_v19 = vpop.eup %1697 }
0x122f   :  { %v1170_v20 = vadd.f32 1.0, %v1698_v19  ;;  %v1700_v21 = vpop.eup %1699 }
0x1231   :  { %1701 = vrcp.f32 %v1170_v20 }
0x123b   :  { %v1702_v24 = vpop.eup %1701 }
0x123c   :  { %v1173_v25 = vsel %vm2133_vm5, %v1700_v21, %v1702_v24 }
0x123d   :  { %1180 = vrot.lane.b32.xlu0 %v1173_v25, %s1909_s4  ;;  %v1178_v45 = vmul.f32 %v1176_v23, %v1173_v25 }
0x12af   :  { %v1181_v26 = vpop.permute.xlu0 %1180 }
0x12b0   :  { %v1183_v28 = vmul.f32 %v1181_v26, %v1173_v25 }
0x12b2   :  { %1185 = vrot.lane.b32.xlu0 %v1183_v28, %s1910_s3 }
0x12b6   :  { %1199 = vperm.xlu0 %1648, %v2171_v48  }
0x1324   :  { %v1186_v50 = vpop.permute.xlu0 %1185 }
0x1325   :  { %v1188_v29 = vadd.f32 %v1186_v50, %v1178_v45 }
0x1327   :  { %1703 = vtanh.f32 %v1188_v29 }
0x1331   :  { %v1704_v27 = vpop.eup %1703 }
0x1332   :  { %1191 = vrot.lane.b32.xlu1 %v1704_v27, %s1909_s4 }
0x1335   :  { %v1200_v32 = vpop.permute.xlu0 %1199 }
0x1336   :  { %1204 = vperm.xlu1 %1647, %v2167_v31  }
0x133a   :  { %1215 = vrot.lane.b32.xlu1 %v1188_v29, %s1912_s27 }
0x13a4   :  { %v1192_v36 = vpop.permute.xlu1 %1191 }
0x13a5   :  { %v1194_v41 = vmul.f32 %v1192_v36, %v1173_v25 }
0x13a7   :  { %1210 = vrot.lane.b32.xlu0 %v1194_v41, %s1910_s3 }
0x13b5   :  { %v1205_v35 = vpop.permute.xlu1 %1204 }
0x13b6   :  { %v1207_v48 = vsel %vm268_vm6, %v1200_v32, %v1205_v35 }
0x13b7   :  { %vm1208_vm14 = vcmp.gt.f32.partialorder %v1207_v48, 0.5 }
0x13b9   :  { %v1216_v39 = vpop.permute.xlu1 %1215 }
0x13ba   :  { %v1218_v44 = vsel %vm1208_vm14, %v1216_v39, %v1084_v11 }
0x13bb   :  { %1309 = vrot.lane.b32.xlu1 %v1218_v44, %s1910_s3 }
0x1419   :  { %v1211_v46 = vpop.permute.xlu0 %1210 }
0x141a   :  { %v1213_v49 = vsel %vm1208_vm14, %v1211_v46, %v1079_v14 }
0x141b   :  { %1220 = vst.msk [vmem:[#allocation12 + $0x30] sm:$0xff] %vm275_vm7, %v1213_v49  ;;  %1222 = vst.msk [vmem:[#allocation13 + $0x8] sm:$0xff] %vm275_vm7, %v1213_v49  ;;  %1576 = vmatmul.mubr.msk.f32.vlgmr.msra.gmra.mrb[8].mxu1 %vm275_vm7, %v1213_v49 }
0x142d   :  { %v1310_v42 = vpop.permute.xlu1 %1309 }
0x14ee   :  { %v1295_v31 = vpop.f32.mrb[8].mxu1 }
0x14ef   :  { %v1299_v51 = vadd.f32 %v1295_v31, %v1225_v47  ;;  %v1577_v52 = vpop.f32.mrb[9].mxu1 }
0x14f1   :  { %v1423_v53 = vmul.f32 -1.442695, %v1299_v51 }
0x14f3   :  { %1705 = vpow2.f32 %v1423_v53 }
0x14f4   :  { %1707 = vtanh.f32 %v1299_v51 }
0x14fd   :  { %v1706_v55 = vpop.eup %1705 }
0x14fe   :  { %v1304_v56 = vadd.f32 1.0, %v1706_v55  ;;  %v1708_v57 = vpop.eup %1707 }
0x1500   :  { %1709 = vrcp.f32 %v1304_v56 }
0x150a   :  { %v1710_v58 = vpop.eup %1709 }
0x150b   :  { %v1307_v40 = vsel %vm2133_vm5, %v1708_v57, %v1710_v58 }
0x150c   :  { %1314 = vrot.lane.b32.xlu0 %v1307_v40, %s1909_s4  ;;  %v1312_v43 = vmul.f32 %v1310_v42, %v1307_v40 }
0x157e   :  { %v1315_v59 = vpop.permute.xlu0 %1314 }
0x157f   :  { %v1317_v33 = vmul.f32 %v1315_v59, %v1307_v40 }
0x1581   :  { %1319 = vrot.lane.b32.xlu0 %v1317_v33, %s1910_s3 }
0x1585   :  { %1333 = vperm.xlu0 %1648, %v2141_v61  }
0x15f3   :  { %v1320_v47 = vpop.permute.xlu0 %1319 }
0x15f4   :  { %v1322_v60 = vadd.f32 %v1320_v47, %v1312_v43 }
0x15f6   :  { %1711 = vtanh.f32 %v1322_v60 }
0x1600   :  { %v1712_v62 = vpop.eup %1711 }
0x1601   :  { %1325 = vrot.lane.b32.xlu1 %v1712_v62, %s1909_s4 }
0x1604   :  { %v1334_v0 = vpop.permute.xlu0 %1333 }
0x1605   :  { %1338 = vperm.xlu1 %1647, %v2145_v4  }
0x1673   :  { %v1326_v54 = vpop.permute.xlu1 %1325 }
0x1674   :  { %v1328_v8 = vmul.f32 %v1326_v54, %v1307_v40 }
0x1676   :  { %1344 = vrot.lane.b32.xlu0 %v1328_v8, %s1910_s3 }
0x1684   :  { %v1339_v1 = vpop.permute.xlu1 %1338 }
0x1685   :  { %v1341_v13 = vsel %vm268_vm6, %v1334_v0, %v1339_v1 }
0x1686   :  { %vm1342_vm15 = vcmp.gt.f32.partialorder %v1341_v13, 0.5 }
0x16e8   :  { %v1345_v61 = vpop.permute.xlu0 %1344 }
0x16e9   :  { %v1347_v63 = vsel %vm1342_vm15, %v1345_v61, %v1213_v49 }
0x16ea   :  { %1349 = vst.msk [vmem:[#allocation12 + $0x38] sm:$0xff] %vm275_vm7, %v1347_v63  ;;  %1350 = vst.msk [vmem:[#allocation13] sm:$0xff] %vm275_vm7, %v1347_v63 }
0x16eb   :  { %1351 = vst.msk [vmem:[#allocation15] sm:$0xff] %vm275_vm7, %v1347_v63 }
0x16ec   :  { %1834 = shalt.err (!%p1831_p2)
}
0x16ed   :  { %s1835_s0 = scalar_lea.hbm %s2384_s6, 1024 }
0x16ee   :  { %p1836_p3 = scmp.ne.s32.totalorder %s2384_s6, %s1835_s0  ;;  %p1839_p4 = scmp.lt.u32.totalorder %s1835_s0, %s2384_s6 }
0x16f0   :  { %p1841_p5 = pnand %p1839_p4, %p1836_p3 }
0x16f2   :  { %1844 = shalt.err (!%p1841_p5)
}
0x16f3   :  { %1375 = dma.vmem_to_hbm [thread:$0]  %s1370_s19, 1024, %s2384_s6, [#allocation14], %s1901_s13, %s1901_s13, %s1902_s14  }
0x16f4   :  { %s1845_s11 = scalar_lea.vmem %s2319_s21, 1024  ;;  %p1850_p7 = scmp.lt.s32.totalorder %s2319_s21, %s2319_s21 }
0x16f5   :  { %p1846_p6 = scmp.ne.s32.totalorder %s2319_s21, %s1845_s11  ;;  %p1851_p8 = scmp.lt.s32.totalorder %s1845_s11, %s1845_s11 }
0x16f7   :  { %p1852_p9 = por %p1851_p8, %p1850_p7 }
0x16f9   :  { %p1853_p10 = pnand %p1852_p9, %p1846_p6 }
0x16fb   :  { %1856 = shalt.err (!%p1853_p10)
}
0x16fc   :  { %s1857_s16 = scalar_lea.hbm %s2383_s5, 1024 }
0x16fd   :  { %p1858_p11 = scmp.ne.s32.totalorder %s2383_s5, %s1857_s16  ;;  %p1861_p12 = scmp.lt.u32.totalorder %s1857_s16, %s2383_s5 }
0x16ff   :  { %p1863_p13 = pnand %p1861_p12, %p1858_p11 }
0x1701   :  { %1866 = shalt.err (!%p1863_p13)
}
0x1702   :  { %1363 = dma.vmem_to_hbm [thread:$0]  %s2319_s21, 1024, %s2383_s5, [#allocation5], %s1901_s13, %s1901_s13, %s1902_s14  }
0x1703   :  { %s1867_s27 = scalar_lea.vmem %s2324_s23, 128  ;;  %p1872_p1 = scmp.lt.s32.totalorder %s2324_s23, %s2324_s23 }
0x1704   :  { %p1868_p0 = scmp.ne.s32.totalorder %s2324_s23, %s1867_s27  ;;  %p1873_p2 = scmp.lt.s32.totalorder %s1867_s27, %s1867_s27 }
0x1706   :  { %p1874_p3 = por %p1873_p2, %p1872_p1 }
0x1708   :  { %p1875_p4 = pnand %p1874_p3, %p1868_p0 }
0x170a   :  { %1878 = shalt.err (!%p1875_p4)
}
0x170b   :  { %s1879_s20 = scalar_lea.hbm %s2385_s7, 128 }
0x170c   :  { %p1880_p5 = scmp.ne.s32.totalorder %s2385_s7, %s1879_s20  ;;  %p1883_p6 = scmp.lt.u32.totalorder %s1879_s20, %s2385_s7 }
0x170e   :  { %p1885_p7 = pnand %p1883_p6, %p1880_p5 }
0x1710   :  { %1888 = shalt.err (!%p1885_p7)
}
0x1711   :  { %1385 = dma.vmem_to_hbm [thread:$0]  %s2324_s23, 128, %s2385_s7, [#allocation14]  }
0x1712   :  { %1895 = dma.done.wait [#allocation5], 1024  }
0x1713   :  { %1896 = vsyncadd [#allocation5], 4294966272 }
0x1714   :  { %1897 = dma.done.wait [#allocation14], 1152  }
0x1715   :  { %1898 = vsyncadd [#allocation14], 4294966144 }
0x1716   :  { %1395 = vsyncpa [#allocation4], 1 }
0x1717   :  { %1396 = vsyncpa [#allocation7], 1 }
0x1718   :  { %1397 = vsyncpa [#allocation10], 1 }
0x1719   :  { %1398 = vsyncpa [#allocation5], 1 }
0x171a   :  { %1399 = vsyncpa [#allocation14], 1 }

// kernel: encoder_forward.3
= control target key start
LH: loop header
LB: loop body
LE: loop exit
PB: predicated region body
PF: predicated region fallthrough
CT: control target
= control target key end

     0   :  { %13 = vsyncpa [#allocation4], 0  ;;  %s2389_s0 = inlined_call_operand.hbm [shape: f32[64,32], index: 0, kind: input, shape index: {}]   ;;  %s2390_s1 = inlined_call_operand.hbm [shape: f32[8,8,1], index: 1, kind: input, shape index: {}]   ;;  %s2391_s2 = inlined_call_operand.hbm [shape: f32[32,128], index: 2, kind: input, shape index: {}]   ;;  %s2392_s3 = inlined_call_operand.hbm [shape: f32[1,128], index: 3, kind: input, shape index: {}]   ;;  %s2393_s4 = inlined_call_operand.hbm [shape: f32[32,128], index: 4, kind: input, shape index: {}]   ;;  %s2394_s5 = inlined_call_operand.hbm [shape: f32[8,8,32], index: 5, kind: output, shape index: {0}]   ;;  %s2395_s6 = inlined_call_operand.hbm [shape: f32[8,8,32], index: 6, kind: output, shape index: {1}]   ;;  %s2396_s7 = inlined_call_operand.hbm [shape: f32[8,32], index: 7, kind: output, shape index: {2}]  }
   0x1   :  { %14 = vsyncpa [#allocation7], 0 }
   0x2   :  { %15 = vsyncpa [#allocation10], 0 }
   0x3   :  { %16 = vsyncpa [#allocation5], 0 }
   0x4   :  { %17 = vsyncpa [#allocation14], 0  ;;  %s1910_s24 = smov [#allocation6]   ;;  %s1911_s26 = smov [#allocation9]  }
   0x5   :  { %s35_s25 = sshll.u32 %s1910_s24, 4  ;;  %s60_s27 = sshll.u32 %s1911_s26, 4  ;;  %s36_s25 = int_to_ptr.vmem [resolvable:$true] %s35_s25  ;;  %s1967_s27 = int_to_ptr.vmem [resolvable:$true] %s60_s27 }
   0x6   :  { %s1724_s30 = scalar_lea.hbm %s2390_s1, 1024 }
   0x7   :  { %p1725_p0 = scmp.ne.s32.totalorder %s2390_s1, %s1724_s30  ;;  %p1728_p1 = scmp.lt.u32.totalorder %s1724_s30, %s2390_s1 }
   0x9   :  { %p1730_p2 = pnand %p1728_p1, %p1725_p0 }
   0xb   :  { %1733 = shalt.err (!%p1730_p2)
}
   0xc   :  { %s1734_s12 = scalar_lea.vmem %s36_s25, 1024  ;;  %p1739_p4 = scmp.lt.s32.totalorder %s36_s25, %s36_s25 }
   0xd   :  { %p1735_p3 = scmp.ne.s32.totalorder %s36_s25, %s1734_s12  ;;  %p1740_p5 = scmp.lt.s32.totalorder %s1734_s12, %s1734_s12 }
   0xf   :  { %p1741_p6 = por %p1740_p5, %p1739_p4 }
  0x11   :  { %p1742_p7 = pnand %p1741_p6, %p1735_p3 }
  0x13   :  { %1745 = shalt.err (!%p1742_p7)
}
  0x14   :  { %s1912_s13 = smov 128   ;;  %s1913_s14 = smov 8  }
  0x15   :  { %41 = dma.hbm_to_vmem [thread:$0]  %s2390_s1, 1024, %s36_s25, [#allocation7], %s1912_s13, %s1912_s13, %s1913_s14  }
  0x16   :  { %s1746_s19 = scalar_lea.hbm %s2392_s3, 16 }
  0x17   :  { %p1747_p8 = scmp.ne.s32.totalorder %s2392_s3, %s1746_s19  ;;  %p1750_p9 = scmp.lt.u32.totalorder %s1746_s19, %s2392_s3 }
  0x19   :  { %p1752_p10 = pnand %p1750_p9, %p1747_p8 }
  0x1b   :  { %1755 = shalt.err (!%p1752_p10)
}
  0x1c   :  { %s1756_s24 = scalar_lea.vmem %s1967_s27, 16  ;;  %s1760_s1 = scalar_lea.vmem %s1967_s27, 32 }
  0x1d   :  { %p1757_p11 = scmp.ne.s32.totalorder %s1967_s27, %s1756_s24  ;;  %p1761_p12 = scmp.lt.s32.totalorder %s1967_s27, %s1967_s27 }
  0x1e   :  { %p1762_p13 = scmp.lt.s32.totalorder %s1760_s1, %s1756_s24 }
  0x20   :  { %p1763_p0 = por %p1762_p13, %p1761_p12 }
  0x22   :  { %p1764_p1 = pnand %p1763_p0, %p1757_p11 }
  0x24   :  { %1767 = shalt.err (!%p1764_p1)
}
  0x25   :  { %63 = dma.hbm_to_vmem [thread:$0]  %s2392_s3, 16, %s1967_s27, [#allocation10]  }
  0x26   :  { %s1914_s28 = smov [#allocation3]   ;;  %s1915_s30 = smov [#allocation8]  }
  0x27   :  { %s23_s29 = sshll.u32 %s1914_s28, 4  ;;  %s47_s8 = sshll.u32 %s1915_s30, 4  ;;  %s24_s29 = int_to_ptr.vmem [resolvable:$true] %s23_s29  ;;  %s2002_s8 = int_to_ptr.vmem [resolvable:$true] %s47_s8 }
  0x28   :  { %s1768_s11 = scalar_lea.hbm %s2389_s0, 1024 }
  0x29   :  { %p1769_p2 = scmp.ne.s32.totalorder %s2389_s0, %s1768_s11  ;;  %p1772_p3 = scmp.lt.u32.totalorder %s1768_s11, %s2389_s0 }
  0x2b   :  { %p1774_p4 = pnand %p1772_p3, %p1769_p2 }
  0x2d   :  { %1777 = shalt.err (!%p1774_p4)
}
  0x2e   :  { %s1778_s3 = scalar_lea.vmem %s24_s29, 1024  ;;  %p1783_p6 = scmp.lt.s32.totalorder %s24_s29, %s24_s29 }
  0x2f   :  { %p1779_p5 = scmp.ne.s32.totalorder %s24_s29, %s1778_s3  ;;  %p1784_p7 = scmp.lt.s32.totalorder %s1778_s3, %s1778_s3 }
  0x31   :  { %p1785_p8 = por %p1784_p7, %p1783_p6 }
  0x33   :  { %p1786_p9 = pnand %p1785_p8, %p1779_p5 }
  0x35   :  { %1789 = shalt.err (!%p1786_p9)
}
  0x36   :  { %29 = dma.hbm_to_vmem [thread:$0]  %s2389_s0, 1024, %s24_s29, [#allocation4], %s1912_s13, %s1912_s13, %s1913_s14  }
  0x37   :  { %s1790_s21 = scalar_lea.hbm %s2391_s2, 512 }
  0x38   :  { %p1791_p10 = scmp.ne.s32.totalorder %s2391_s2, %s1790_s21  ;;  %p1794_p11 = scmp.lt.u32.totalorder %s1790_s21, %s2391_s2 }
  0x3a   :  { %p1796_p12 = pnand %p1794_p11, %p1791_p10 }
  0x3c   :  { %1799 = shalt.err (!%p1796_p12)
}
  0x3d   :  { %s1800_s25 = scalar_lea.vmem %s2002_s8, 512  ;;  %p1805_p0 = scmp.lt.s32.totalorder %s2002_s8, %s2002_s8 }
  0x3e   :  { %p1801_p13 = scmp.ne.s32.totalorder %s2002_s8, %s1800_s25  ;;  %p1806_p1 = scmp.lt.s32.totalorder %s1800_s25, %s1800_s25 }
  0x40   :  { %p1807_p2 = por %p1806_p1, %p1805_p0 }
  0x42   :  { %p1808_p3 = pnand %p1807_p2, %p1801_p13 }
  0x44   :  { %1811 = shalt.err (!%p1808_p3)
}
  0x45   :  { %53 = dma.hbm_to_vmem [thread:$0]  %s2391_s2, 512, %s2002_s8, [#allocation7], %s1912_s13, %s1912_s13, %s1913_s14  }
  0x46   :  { %s1916_s28 = smov [#allocation11]   ;;  %s1812_s10 = scalar_lea.hbm %s2393_s4, 512 }
  0x47   :  { %s69_s29 = sshll.u32 %s1916_s28, 4  ;;  %p1813_p4 = scmp.ne.s32.totalorder %s2393_s4, %s1812_s10  ;;  %s70_s29 = int_to_ptr.vmem [resolvable:$true] %s69_s29 }
  0x48   :  { %p1816_p5 = scmp.lt.u32.totalorder %s1812_s10, %s2393_s4 }
  0x4a   :  { %p1818_p6 = pnand %p1816_p5, %p1813_p4 }
  0x4c   :  { %1821 = shalt.err (!%p1818_p6)
}
  0x4d   :  { %s1822_s17 = scalar_lea.vmem %s70_s29, 512  ;;  %p1827_p8 = scmp.lt.s32.totalorder %s70_s29, %s70_s29 }
  0x4e   :  { %p1823_p7 = scmp.ne.s32.totalorder %s70_s29, %s1822_s17  ;;  %p1828_p9 = scmp.lt.s32.totalorder %s1822_s17, %s1822_s17 }
  0x50   :  { %p1829_p10 = por %p1828_p9, %p1827_p8 }
  0x52   :  { %p1830_p11 = pnand %p1829_p10, %p1823_p7 }
  0x54   :  { %1833 = shalt.err (!%p1830_p11)
}
  0x55   :  { %75 = dma.hbm_to_vmem [thread:$0]  %s2393_s4, 512, %s70_s29, [#allocation10], %s1912_s13, %s1912_s13, %s1913_s14  }
  0x56   :  { %1900 = dma.done.wait [#allocation4], 1024  }
  0x57   :  { %1901 = vsyncadd [#allocation4], 4294966272 }
  0x58   :  { %1902 = dma.done.wait [#allocation7], 1536  }
  0x59   :  { %1903 = vsyncadd [#allocation7], 4294965760 }
  0x5a   :  { %1904 = dma.done.wait [#allocation10], 528  }
  0x5b   :  { %1905 = vsyncadd [#allocation10], 4294966768  ;;  %v1917_v0 = vmov 0.0|0.0   ;;  %vm1918_vm0 = vmmov 0   ;;  %v1919_v1 = vmov 0.0   ;;  %vm110_vm1 = vcmask 261120  }
  0x5c   :  { %1593 = vmatprep.subr.bf16.mxu1 %v1917_v0  ;;  %1505 = vmatprep.mubr.msk.f32.mxu1 %vm1918_vm0, %v1919_v1  ;;  %v99_v2 = vld [vmem:[#allocation8] sm:$0xff]  ;;  %v100_v3 = vld [vmem:[#allocation8 + $0x8] sm:$0xff]  ;;  %v101_v4 = vld [vmem:[#allocation8 + $0x10] sm:$0xff]  ;;  %v252_v22 = vlaneseq  ;;  %s1920_s4 = smov 64   ;;  %s1921_s3 = smov 32   ;;  %v1922_v63 = vmov 0  }
  0x5d   :  { %v1585_v5 = vpack.c.bf16 %v100_v3, %v99_v2  ;;  %v102_v6 = vld [vmem:[#allocation8 + $0x18] sm:$0xff]  ;;  %v91_v7 = vld [vmem:[#allocation3] sm:$0xff]  ;;  %v249_v10 = vld [vmem:[#allocation11 + $0x8] sm:$0xff]  ;;  %1659 = vset.pattern.permute.xlu0 %v1922_v63  ;;  %1658 = vset.pattern.permute.xlu1 %v1922_v63  ;;  %s1923_s27 = smov 96   ;;  %s1924_s18 = smov [#allocation13]  }
  0x5e   :  { %v1589_v8 = vpack.c.bf16 %v102_v6, %v101_v4  ;;  %1485 = vmatprep.mubr.msk.f32.mxu0 %vm110_vm1, %v91_v7  ;;  %v248_v9 = vld [vmem:[#allocation11] sm:$0xff]  ;;  %v250_v12 = vld [vmem:[#allocation11 + $0x10] sm:$0xff]  ;;  %v251_v13 = vld [vmem:[#allocation11 + $0x18] sm:$0xff]  ;;  %v2087_v25 = vand.u32 127, %v252_v22  ;;  %s1370_s19 = sshll.u32 %s1924_s18, 4  ;;  %s1925_s20 = smov [#allocation12]   ;;  %s1371_s19 = int_to_ptr.vmem [resolvable:$true] %s1370_s19 }
  0x5f   :  { %1586 = vmatprep.subr.bf16.mxu0 %v1585_v5  ;;  %v2058_v11 = vpack.c.bf16 %v249_v10, %v248_v9  ;;  %v2061_v14 = vpack.c.bf16 %v251_v13, %v250_v12  ;;  %v92_v15 = vld [vmem:[#allocation3 + $0x8] sm:$0xff]  ;;  %v93_v16 = vld [vmem:[#allocation3 + $0x10] sm:$0xff]  ;;  %v94_v17 = vld [vmem:[#allocation3 + $0x18] sm:$0xff]  ;;  %s1358_s21 = sshll.u32 %s1925_s20, 4  ;;  %s1926_s22 = smov [#allocation15]   ;;  %s2330_s21 = int_to_ptr.vmem [resolvable:$true] %s1358_s21 }
  0x60   :  { %1588 = vmatpush3.bf16.msra.mxu0 %v1585_v5  ;;  %v95_v18 = vld [vmem:[#allocation3 + $0x20] sm:$0xff]  ;;  %v96_v19 = vld [vmem:[#allocation3 + $0x28] sm:$0xff]  ;;  %v97_v20 = vld [vmem:[#allocation3 + $0x30] sm:$0xff]  ;;  %v258_v31 = vand.u32 31, %v2087_v25  ;;  %vm267_vm3 = vcmp.ge.s32.totalorder %v2087_v25, 64  ;;  %vm268_vm4 = vcmp.lt.s32.totalorder %v2087_v25, 96  ;;  %p1839_p13 = scmp.lt.s32.totalorder %s1371_s19, %s1371_s19 }
  0x61   :  { %1590 = vmatprep.subr.bf16.mxu0 %v1589_v8  ;;  %1595 = vmatpush3.bf16.msra.mxu1 %v2058_v11  ;;  %v98_v21 = vld [vmem:[#allocation3 + $0x38] sm:$0xff]  ;;  %v1401_v23 = vld [vmem:[#allocation9] ss:$0 sm:$0xff]  ;;  %vm2144_vm5 = vmand %vm267_vm3, %vm268_vm4  ;;  %vm270_vm6 = vcmp.lt.s32.totalorder %v2087_v25, 16  ;;  %s1383_s23 = sshll.u32 %s1926_s22, 4  ;;  %s1834_s24 = scalar_lea.vmem %s1371_s19, 1024  ;;  %s2335_s23 = int_to_ptr.vmem [resolvable:$true] %s1383_s23 }
  0x62   :  { %1596 = vmatprep.subr.bf16.mxu1 %v1917_v0  ;;  %vm2096_vm2 = vcmp.lt.s32.totalorder %v258_v31, 16  ;;  %v2152_v2 = vld [vmem:[#allocation6 + $0x38] sm:$0xff]  ;;  %v2156_v7 = vld [vmem:[#allocation6] sm:$0xff]  ;;  %p1835_p12 = scmp.ne.s32.totalorder %s1371_s19, %s1834_s24  ;;  %p1840_p0 = scmp.lt.s32.totalorder %s1834_s24, %s1834_s24 }
  0x64   :  { %1592 = vmatpush3.bf16.msra.mxu0 %v1589_v8  ;;  %p1841_p1 = por %p1840_p0, %p1839_p13 }
  0x65   :  { %1605 = vmatprep.subr.bf16.mxu0 %v1917_v0  ;;  %1598 = vmatpush3.bf16.msra.mxu1 %v2061_v14 }
  0x66   :  { %1599 = vmatprep.subr.bf16.mxu1 %v1917_v0  ;;  %p1842_p2 = pnand %p1841_p1, %p1835_p12 }
  0x67   :  { %1486 = vmatmul.mubr.msk.f32.vlgmr.msra.gmra.mrb[0].mxu0 %vm110_vm1, %v92_v15 }
  0x68   :  { %1488 = vmatprep.mubr.msk.f32.mxu0 %vm110_vm1, %v93_v16  ;;  %1607 = vmatpush3.bf16.msra.mxu0 %v2058_v11 }
  0x69   :  { %1506 = vmatmul.mubr.f32.vlgmr.msra.gmra.mrb[0].mxu1 %v1919_v1  ;;  %1608 = vmatprep.subr.bf16.mxu0 %v1917_v0 }
  0x6a   :  { %1601 = vmatpush3.bf16.msra.mxu1 %v2058_v11  ;;  %1516 = vmatprep.mubr.msk.f32.mxu1 %vm1918_vm0, %v1919_v1 }
  0x6b   :  { %1489 = vmatmul.mubr.msk.f32.gmra.mrb[2].mxu0 %vm110_vm1, %v94_v17  ;;  %1602 = vmatprep.subr.bf16.mxu1 %v1917_v0 }
  0x6c   :  { %1491 = vmatprep.mubr.msk.f32.mxu0 %vm110_vm1, %v95_v18  ;;  %1610 = vmatpush3.bf16.msra.mxu0 %v2061_v14 }
  0x6d   :  { %1617 = vmatprep.subr.bf16.mxu0 %v1917_v0 }
  0x6e   :  { %1604 = vmatpush3.bf16.msra.mxu1 %v2061_v14 }
  0x6f   :  { %1492 = vmatmul.mubr.msk.f32.gmra.mrb[4].mxu0 %vm110_vm1, %v96_v19  ;;  %1611 = vmatprep.subr.bf16.mxu1 %v1917_v0 }
  0x70   :  { %1494 = vmatprep.mubr.msk.f32.mxu0 %vm110_vm1, %v97_v20 }
  0x73   :  { %1495 = vmatmul.mubr.msk.f32.gmra.mrb[6].mxu0 %vm110_vm1, %v98_v21 }
  0x74   :  { %1527 = vmatprep.mubr.msk.f32.mxu0 %vm1918_vm0, %v1919_v1 }
 0x13a   :  { %v1487_v24 = vpop.f32.mrb[0].mxu0 }
 0x13b   :  { %v2089_v26 = vadd.f32 %v1487_v24, %v1401_v23  ;;  %v201_v27 = vpop.f32.mrb[1].mxu0 }
 0x13c   :  { %v346_v28 = vpop.f32.mrb[0].mxu1  ;;  %v2120_v45 = vadd.f32 %v1401_v23, %v201_v27 }
 0x13d   :  { %v1507_v29 = vpop.f32.mrb[1].mxu1 }
 0x13e   :  { %v1490_v30 = vpop.f32.mrb[2].mxu0 }
 0x13f   :  { %v2092_v32 = vadd.f32 %v1490_v30, %v1401_v23  ;;  %v211_v33 = vpop.f32.mrb[3].mxu0 }
 0x140   :  { %v2094_v34 = vadd.f32 %v1401_v23, %v211_v33  ;;  %v2178_v33 = vld [vmem:[#allocation6 + $0x8] sm:$0xff] }
 0x142   :  { %v1493_v35 = vpop.f32.mrb[4].mxu0 }
 0x143   :  { %v2100_v37 = vadd.f32 %v1493_v35, %v1401_v23  ;;  %v221_v38 = vpop.f32.mrb[5].mxu0 }
 0x144   :  { %v2102_v39 = vadd.f32 %v1401_v23, %v221_v38 }
 0x145   :  { %v550_v40 = vsel %vm2096_vm2, %v2094_v34, %v2100_v37  ;;  %v958_v41 = vsel %vm2096_vm2, %v2100_v37, %v2094_v34 }
 0x146   :  { %v1496_v42 = vpop.f32.mrb[6].mxu0  ;;  %v688_v43 = vsel %vm2096_vm2, %v2092_v32, %v2102_v39  ;;  %v824_v44 = vsel %vm2096_vm2, %v2102_v39, %v2092_v32 }
 0x147   :  { %v2122_v46 = vadd.f32 %v1496_v42, %v1401_v23  ;;  %v231_v47 = vpop.f32.mrb[7].mxu0 }
 0x148   :  { %v2124_v48 = vadd.f32 %v1401_v23, %v231_v47 }
 0x149   :  { %v276_v49 = vsel %vm2096_vm2, %v2120_v45, %v2122_v46  ;;  %v1226_v50 = vsel %vm2096_vm2, %v2122_v46, %v2120_v45 }
 0x14a   :  { %v350_v51 = vadd.f32 %v346_v28, %v276_v49  ;;  %v412_v52 = vsel %vm2096_vm2, %v2089_v26, %v2124_v48  ;;  %v1092_v53 = vsel %vm2096_vm2, %v2124_v48, %v2089_v26 }
 0x14c   :  { %v1410_v54 = vmul.f32 -1.442695, %v350_v51 }
 0x14e   :  { %1660 = vpow2.f32 %v1410_v54 }
 0x14f   :  { %1662 = vtanh.f32 %v350_v51  ;;  %v2182_v51 = vld [vmem:[#allocation6 + $0x30] sm:$0xff] }
 0x158   :  { %v1661_v55 = vpop.eup %1660 }
 0x159   :  { %v355_v56 = vadd.f32 1.0, %v1661_v55  ;;  %v1663_v58 = vpop.eup %1662 }
 0x15b   :  { %1664 = vrcp.f32 %v355_v56 }
 0x165   :  { %v1665_v59 = vpop.eup %1664 }
 0x166   :  { %v360_v60 = vsel %vm2144_vm5, %v1663_v58, %v1665_v59 }
 0x167   :  { %363 = vrot.lane.b32.xlu0 %v360_v60, %s1920_s4  ;;  %v361_v3 = vmul.f32 0.0, %v360_v60 }
 0x1d9   :  { %v364_v61 = vpop.permute.xlu0 %363 }
 0x1da   :  { %v366_v62 = vmul.f32 %v364_v61, %v360_v60 }
 0x1dc   :  { %368 = vrot.lane.b32.xlu0 %v366_v62, %s1921_s3 }
 0x1e0   :  { %390 = vperm.xlu0 %1659, %v2152_v2  }
 0x24e   :  { %v369_v4 = vpop.permute.xlu0 %368 }
 0x24f   :  { %v371_v5 = vadd.f32 %v369_v4, %v361_v3 }
 0x251   :  { %1666 = vtanh.f32 %v371_v5 }
 0x25b   :  { %v1667_v6 = vpop.eup %1666 }
 0x25c   :  { %374 = vrot.lane.b32.xlu1 %v1667_v6, %s1920_s4 }
 0x25f   :  { %v391_v10 = vpop.permute.xlu0 %390 }
 0x260   :  { %385 = vperm.xlu1 %1658, %v2156_v7  }
 0x2ce   :  { %v375_v8 = vpop.permute.xlu1 %374 }
 0x2cf   :  { %v377_v9 = vmul.f32 %v375_v8, %v360_v60 }
 0x2d1   :  { %396 = vrot.lane.b32.xlu1 %v377_v9, %s1921_s3 }
 0x2d5   :  { %401 = vrot.lane.b32.xlu1 %v371_v5, %s1923_s27 }
 0x2df   :  { %v386_v12 = vpop.permute.xlu1 %385 }
 0x2e0   :  { %v393_v13 = vsel %vm270_vm6, %v386_v12, %v391_v10 }
 0x2e1   :  { %vm394_vm7 = vcmp.gt.f32.partialorder %v393_v13, 0.5 }
 0x343   :  { %v397_v15 = vpop.permute.xlu1 %396 }
 0x344   :  { %v399_v16 = vsel %vm394_vm7, %v397_v15, 0.0 }
 0x345   :  { %405 = vst.msk [vmem:[#allocation12] sm:$0xff] %vm110_vm1, %v399_v16  ;;  %407 = vst.msk [vmem:[#allocation13 + $0x38] sm:$0xff] %vm110_vm1, %v399_v16  ;;  %1517 = vmatmul.mubr.msk.f32.vlgmr.msra.gmra.mrb[2].mxu1 %vm110_vm1, %v399_v16 }
 0x346   :  { %1613 = vmatpush3.bf16.msra.mxu1 %v2058_v11  ;;  %1538 = vmatprep.mubr.msk.f32.mxu1 %vm1918_vm0, %v1919_v1 }
 0x347   :  { %v402_v17 = vpop.permute.xlu1 %401  ;;  %1614 = vmatprep.subr.bf16.mxu1 %v1917_v0 }
 0x348   :  { %v404_v18 = vsel %vm394_vm7, %v402_v17, 0.0 }
 0x349   :  { %496 = vrot.lane.b32.xlu1 %v404_v18, %s1921_s3 }
 0x34a   :  { %1616 = vmatpush3.bf16.msra.mxu1 %v2061_v14 }
 0x34b   :  { %1623 = vmatprep.subr.bf16.mxu1 %v1917_v0 }
 0x3bb   :  { %v497_v35 = vpop.permute.xlu1 %496 }
 0x418   :  { %v482_v19 = vpop.f32.mrb[2].mxu1 }
 0x419   :  { %v486_v20 = vadd.f32 %v482_v19, %v412_v52  ;;  %v1518_v21 = vpop.f32.mrb[3].mxu1 }
 0x41a   :  { %v2212_v21 = vld [vmem:[#allocation6 + $0x28] sm:$0xff] }
 0x41b   :  { %v1412_v22 = vmul.f32 -1.442695, %v486_v20 }
 0x41d   :  { %1668 = vpow2.f32 %v1412_v22 }
 0x41e   :  { %1670 = vtanh.f32 %v486_v20 }
 0x427   :  { %v1669_v23 = vpop.eup %1668 }
 0x428   :  { %v491_v24 = vadd.f32 1.0, %v1669_v23  ;;  %v1671_v27 = vpop.eup %1670 }
 0x42a   :  { %1672 = vrcp.f32 %v491_v24 }
 0x434   :  { %v1673_v28 = vpop.eup %1672 }
 0x435   :  { %v494_v29 = vsel %vm2144_vm5, %v1671_v27, %v1673_v28 }
 0x436   :  { %501 = vrot.lane.b32.xlu0 %v494_v29, %s1920_s4  ;;  %v499_v38 = vmul.f32 %v497_v35, %v494_v29 }
 0x4a8   :  { %v502_v30 = vpop.permute.xlu0 %501 }
 0x4a9   :  { %v504_v31 = vmul.f32 %v502_v30, %v494_v29 }
 0x4ab   :  { %506 = vrot.lane.b32.xlu0 %v504_v31, %s1921_s3 }
 0x4af   :  { %522 = vperm.xlu0 %1659, %v2178_v33  }
 0x51d   :  { %v507_v42 = vpop.permute.xlu0 %506 }
 0x51e   :  { %v509_v47 = vadd.f32 %v507_v42, %v499_v38 }
 0x520   :  { %1674 = vtanh.f32 %v509_v47 }
 0x52a   :  { %v1675_v49 = vpop.eup %1674 }
 0x52b   :  { %512 = vrot.lane.b32.xlu1 %v1675_v49, %s1920_s4 }
 0x52e   :  { %v523_v55 = vpop.permute.xlu0 %522 }
 0x52f   :  { %527 = vperm.xlu1 %1658, %v2182_v51  }
 0x533   :  { %538 = vrot.lane.b32.xlu1 %v509_v47, %s1923_s27 }
 0x59d   :  { %v513_v52 = vpop.permute.xlu1 %512 }
 0x59e   :  { %v515_v54 = vmul.f32 %v513_v52, %v494_v29 }
 0x5a0   :  { %533 = vrot.lane.b32.xlu0 %v515_v54, %s1921_s3 }
 0x5ae   :  { %v528_v56 = vpop.permute.xlu1 %527 }
 0x5af   :  { %v530_v58 = vsel %vm270_vm6, %v523_v55, %v528_v56 }
 0x5b0   :  { %vm531_vm8 = vcmp.gt.f32.partialorder %v530_v58, 0.5 }
 0x5b2   :  { %v539_v59 = vpop.permute.xlu1 %538 }
 0x5b3   :  { %v541_v60 = vsel %vm531_vm8, %v539_v59, %v404_v18 }
 0x5b4   :  { %634 = vrot.lane.b32.xlu1 %v541_v60, %s1921_s3 }
 0x612   :  { %v534_v61 = vpop.permute.xlu0 %533 }
 0x613   :  { %v536_v62 = vsel %vm531_vm8, %v534_v61, %v399_v16  ;;  %v2208_v16 = vld [vmem:[#allocation6 + $0x10] sm:$0xff]  ;;  %v793_v61 = vld [vmem:[#allocation6 + $0x18] sm:$0xff] }
 0x614   :  { %543 = vst.msk [vmem:[#allocation12 + $0x8] sm:$0xff] %vm110_vm1, %v536_v62  ;;  %545 = vst.msk [vmem:[#allocation13 + $0x30] sm:$0xff] %vm110_vm1, %v536_v62  ;;  %1528 = vmatmul.mubr.msk.f32.vlgmr.msra.gmra.mrb[8].mxu0 %vm110_vm1, %v536_v62 }
 0x615   :  { %1619 = vmatpush3.bf16.msra.mxu0 %v2058_v11  ;;  %1549 = vmatprep.mubr.msk.f32.mxu0 %vm1918_vm0, %v1919_v1 }
 0x616   :  { %1620 = vmatprep.subr.bf16.mxu0 %v1917_v0 }
 0x619   :  { %1622 = vmatpush3.bf16.msra.mxu0 %v2061_v14 }
 0x61a   :  { %1629 = vmatprep.subr.bf16.mxu0 %v1917_v0 }
 0x6e7   :  { %v620_v63 = vpop.f32.mrb[8].mxu0 }
 0x6e8   :  { %v624_v3 = vadd.f32 %v620_v63, %v550_v40  ;;  %v1529_v4 = vpop.f32.mrb[9].mxu0  ;;  %v635_v40 = vpop.permute.xlu1 %634 }
 0x6ea   :  { %v1414_v5 = vmul.f32 -1.442695, %v624_v3 }
 0x6ec   :  { %1676 = vpow2.f32 %v1414_v5  ;;  %v795_v5 = vld [vmem:[#allocation6 + $0x20] sm:$0xff] }
 0x6ed   :  { %1678 = vtanh.f32 %v624_v3 }
 0x6f6   :  { %v1677_v6 = vpop.eup %1676 }
 0x6f7   :  { %v629_v8 = vadd.f32 1.0, %v1677_v6  ;;  %v1679_v9 = vpop.eup %1678 }
 0x6f9   :  { %1680 = vrcp.f32 %v629_v8 }
 0x703   :  { %v1681_v10 = vpop.eup %1680 }
 0x704   :  { %v632_v12 = vsel %vm2144_vm5, %v1679_v9, %v1681_v10 }
 0x705   :  { %639 = vrot.lane.b32.xlu0 %v632_v12, %s1920_s4  ;;  %v637_v17 = vmul.f32 %v635_v40, %v632_v12 }
 0x777   :  { %v640_v13 = vpop.permute.xlu0 %639 }
 0x778   :  { %v642_v15 = vmul.f32 %v640_v13, %v632_v12 }
 0x77a   :  { %644 = vrot.lane.b32.xlu0 %v642_v15, %s1921_s3 }
 0x77e   :  { %660 = vperm.xlu0 %1659, %v2208_v16  }
 0x7ec   :  { %v645_v18 = vpop.permute.xlu0 %644 }
 0x7ed   :  { %v647_v19 = vadd.f32 %v645_v18, %v637_v17 }
 0x7ef   :  { %1682 = vtanh.f32 %v647_v19 }
 0x7f9   :  { %v1683_v20 = vpop.eup %1682 }
 0x7fa   :  { %650 = vrot.lane.b32.xlu1 %v1683_v20, %s1920_s4 }
 0x7fd   :  { %v661_v24 = vpop.permute.xlu0 %660 }
 0x7fe   :  { %665 = vperm.xlu1 %1658, %v2212_v21  }
 0x802   :  { %676 = vrot.lane.b32.xlu1 %v647_v19, %s1923_s27 }
 0x86c   :  { %v651_v22 = vpop.permute.xlu1 %650 }
 0x86d   :  { %v653_v23 = vmul.f32 %v651_v22, %v632_v12 }
 0x86f   :  { %671 = vrot.lane.b32.xlu0 %v653_v23, %s1921_s3 }
 0x87d   :  { %v666_v27 = vpop.permute.xlu1 %665 }
 0x87e   :  { %v668_v28 = vsel %vm270_vm6, %v661_v24, %v666_v27 }
 0x87f   :  { %vm669_vm9 = vcmp.gt.f32.partialorder %v668_v28, 0.5 }
 0x881   :  { %v677_v29 = vpop.permute.xlu1 %676 }
 0x882   :  { %v679_v30 = vsel %vm669_vm9, %v677_v29, %v541_v60 }
 0x883   :  { %772 = vrot.lane.b32.xlu1 %v679_v30, %s1921_s3 }
 0x8e1   :  { %v672_v31 = vpop.permute.xlu0 %671 }
 0x8e2   :  { %v674_v35 = vsel %vm669_vm9, %v672_v31, %v536_v62 }
 0x8e3   :  { %681 = vst.msk [vmem:[#allocation12 + $0x10] sm:$0xff] %vm110_vm1, %v674_v35  ;;  %683 = vst.msk [vmem:[#allocation13 + $0x28] sm:$0xff] %vm110_vm1, %v674_v35  ;;  %1539 = vmatmul.mubr.msk.f32.vlgmr.msra.gmra.mrb[4].mxu1 %vm110_vm1, %v674_v35 }
 0x8e4   :  { %1625 = vmatpush3.bf16.msra.mxu1 %v2058_v11  ;;  %1560 = vmatprep.mubr.msk.f32.mxu1 %vm1918_vm0, %v1919_v1 }
 0x8e5   :  { %1626 = vmatprep.subr.bf16.mxu1 %v1917_v0 }
 0x8e8   :  { %1628 = vmatpush3.bf16.msra.mxu1 %v2061_v14 }
 0x8e9   :  { %1635 = vmatprep.subr.bf16.mxu1 %v1917_v0 }
 0x9b6   :  { %v758_v38 = vpop.f32.mrb[4].mxu1 }
 0x9b7   :  { %v762_v42 = vadd.f32 %v758_v38, %v688_v43  ;;  %v1540_v47 = vpop.f32.mrb[5].mxu1  ;;  %v773_v43 = vpop.permute.xlu1 %772 }
 0x9b9   :  { %v1416_v49 = vmul.f32 -1.442695, %v762_v42 }
 0x9bb   :  { %1684 = vpow2.f32 %v1416_v49 }
 0x9bc   :  { %1686 = vtanh.f32 %v762_v42 }
 0x9c5   :  { %v1685_v52 = vpop.eup %1684 }
 0x9c6   :  { %v767_v54 = vadd.f32 1.0, %v1685_v52  ;;  %v1687_v55 = vpop.eup %1686 }
 0x9c8   :  { %1688 = vrcp.f32 %v767_v54 }
 0x9d2   :  { %v1689_v56 = vpop.eup %1688 }
 0x9d3   :  { %v770_v58 = vsel %vm2144_vm5, %v1687_v55, %v1689_v56 }
 0x9d4   :  { %777 = vrot.lane.b32.xlu0 %v770_v58, %s1920_s4  ;;  %v775_v62 = vmul.f32 %v773_v43, %v770_v58 }
 0xa46   :  { %v778_v59 = vpop.permute.xlu0 %777 }
 0xa47   :  { %v780_v60 = vmul.f32 %v778_v59, %v770_v58 }
 0xa49   :  { %782 = vrot.lane.b32.xlu0 %v780_v60, %s1921_s3 }
 0xa4d   :  { %798 = vperm.xlu0 %1659, %v793_v61  }
 0xabb   :  { %v783_v63 = vpop.permute.xlu0 %782 }
 0xabc   :  { %v785_v3 = vadd.f32 %v783_v63, %v775_v62 }
 0xabe   :  { %1690 = vtanh.f32 %v785_v3 }
 0xac8   :  { %v1691_v4 = vpop.eup %1690 }
 0xac9   :  { %788 = vrot.lane.b32.xlu1 %v1691_v4, %s1920_s4 }
 0xacc   :  { %v799_v9 = vpop.permute.xlu0 %798 }
 0xacd   :  { %803 = vperm.xlu1 %1658, %v795_v5  }
 0xad1   :  { %814 = vrot.lane.b32.xlu1 %v785_v3, %s1923_s27 }
 0xb3b   :  { %v789_v6 = vpop.permute.xlu1 %788 }
 0xb3c   :  { %v791_v8 = vmul.f32 %v789_v6, %v770_v58 }
 0xb3e   :  { %809 = vrot.lane.b32.xlu0 %v791_v8, %s1921_s3 }
 0xb4c   :  { %v804_v10 = vpop.permute.xlu1 %803 }
 0xb4d   :  { %v806_v12 = vsel %vm270_vm6, %v799_v9, %v804_v10 }
 0xb4e   :  { %vm807_vm10 = vcmp.gt.f32.partialorder %v806_v12, 0.5 }
 0xb50   :  { %v815_v13 = vpop.permute.xlu1 %814 }
 0xb51   :  { %v817_v15 = vsel %vm807_vm10, %v815_v13, %v679_v30 }
 0xb52   :  { %908 = vrot.lane.b32.xlu1 %v817_v15, %s1921_s3 }
 0xbb0   :  { %v810_v40 = vpop.permute.xlu0 %809 }
 0xbb1   :  { %v812_v17 = vsel %vm807_vm10, %v810_v40, %v674_v35 }
 0xbb2   :  { %819 = vst.msk [vmem:[#allocation12 + $0x18] sm:$0xff] %vm110_vm1, %v812_v17  ;;  %821 = vst.msk [vmem:[#allocation13 + $0x20] sm:$0xff] %vm110_vm1, %v812_v17  ;;  %1550 = vmatmul.mubr.msk.f32.vlgmr.msra.gmra.mrb[10].mxu0 %vm110_vm1, %v812_v17 }
 0xbb3   :  { %1631 = vmatpush3.bf16.msra.mxu0 %v2058_v11  ;;  %1571 = vmatprep.mubr.msk.f32.mxu0 %vm1918_vm0, %v1919_v1 }
 0xbb4   :  { %1632 = vmatprep.subr.bf16.mxu0 %v1917_v0 }
 0xbb7   :  { %1634 = vmatpush3.bf16.msra.mxu0 %v2061_v14 }
 0xbc4   :  { %v909_v32 = vpop.permute.xlu1 %908 }
 0xc85   :  { %v894_v18 = vpop.f32.mrb[10].mxu0 }
 0xc86   :  { %v898_v19 = vadd.f32 %v894_v18, %v824_v44  ;;  %v1551_v20 = vpop.f32.mrb[11].mxu0 }
 0xc88   :  { %v1418_v22 = vmul.f32 -1.442695, %v898_v19 }
 0xc8a   :  { %1692 = vpow2.f32 %v1418_v22 }
 0xc8b   :  { %1694 = vtanh.f32 %v898_v19 }
 0xc94   :  { %v1693_v23 = vpop.eup %1692 }
 0xc95   :  { %v903_v24 = vadd.f32 1.0, %v1693_v23  ;;  %v1695_v27 = vpop.eup %1694 }
 0xc97   :  { %1696 = vrcp.f32 %v903_v24 }
 0xca1   :  { %v1697_v28 = vpop.eup %1696 }
 0xca2   :  { %v906_v29 = vsel %vm2144_vm5, %v1695_v27, %v1697_v28 }
 0xca3   :  { %913 = vrot.lane.b32.xlu0 %v906_v29, %s1920_s4  ;;  %v911_v39 = vmul.f32 %v909_v32, %v906_v29 }
 0xd15   :  { %v914_v30 = vpop.permute.xlu0 %913 }
 0xd16   :  { %v916_v31 = vmul.f32 %v914_v30, %v906_v29 }
 0xd18   :  { %918 = vrot.lane.b32.xlu0 %v916_v31, %s1921_s3 }
 0xd1c   :  { %932 = vperm.xlu0 %1659, %v795_v5  }
 0xd8a   :  { %v919_v44 = vpop.permute.xlu0 %918 }
 0xd8b   :  { %v921_v35 = vadd.f32 %v919_v44, %v911_v39 }
 0xd8d   :  { %1698 = vtanh.f32 %v921_v35 }
 0xd97   :  { %v1699_v38 = vpop.eup %1698 }
 0xd98   :  { %924 = vrot.lane.b32.xlu1 %v1699_v38, %s1920_s4 }
 0xd9b   :  { %v933_v49 = vpop.permute.xlu0 %932 }
 0xd9c   :  { %937 = vperm.xlu1 %1658, %v793_v61  }
 0xda0   :  { %948 = vrot.lane.b32.xlu1 %v921_v35, %s1923_s27 }
 0xe0a   :  { %v925_v42 = vpop.permute.xlu1 %924 }
 0xe0b   :  { %v927_v47 = vmul.f32 %v925_v42, %v906_v29 }
 0xe0d   :  { %943 = vrot.lane.b32.xlu0 %v927_v47, %s1921_s3 }
 0xe1b   :  { %v938_v52 = vpop.permute.xlu1 %937 }
 0xe1c   :  { %v940_v54 = vsel %vm270_vm6, %v933_v49, %v938_v52 }
 0xe1d   :  { %vm941_vm11 = vcmp.gt.f32.partialorder %v940_v54, 0.5 }
 0xe1f   :  { %v949_v55 = vpop.permute.xlu1 %948 }
 0xe20   :  { %v951_v56 = vsel %vm941_vm11, %v949_v55, %v817_v15 }
 0xe21   :  { %1042 = vrot.lane.b32.xlu1 %v951_v56, %s1921_s3 }
 0xe7f   :  { %v944_v58 = vpop.permute.xlu0 %943 }
 0xe80   :  { %v946_v59 = vsel %vm941_vm11, %v944_v58, %v812_v17 }
 0xe81   :  { %953 = vst.msk [vmem:[#allocation12 + $0x20] sm:$0xff] %vm110_vm1, %v946_v59  ;;  %955 = vst.msk [vmem:[#allocation13 + $0x18] sm:$0xff] %vm110_vm1, %v946_v59  ;;  %1561 = vmatmul.mubr.msk.f32.vlgmr.msra.gmra.mrb[6].mxu1 %vm110_vm1, %v946_v59 }
 0xe82   :  { %1637 = vmatpush3.bf16.msra.mxu1 %v2058_v11  ;;  %1582 = vmatprep.mubr.msk.f32.mxu1 %vm1918_vm0, %v1919_v1 }
 0xe83   :  { %1638 = vmatprep.subr.bf16.mxu1 %v1917_v0 }
 0xe86   :  { %1640 = vmatpush3.bf16.msra.mxu1 %v2061_v14 }
 0xe93   :  { %v1043_v34 = vpop.permute.xlu1 %1042 }
 0xf54   :  { %v1028_v60 = vpop.f32.mrb[6].mxu1 }
 0xf55   :  { %v1032_v61 = vadd.f32 %v1028_v60, %v958_v41  ;;  %v1562_v43 = vpop.f32.mrb[7].mxu1 }
 0xf57   :  { %v1420_v62 = vmul.f32 -1.442695, %v1032_v61 }
 0xf59   :  { %1700 = vpow2.f32 %v1420_v62 }
 0xf5a   :  { %1702 = vtanh.f32 %v1032_v61 }
 0xf63   :  { %v1701_v63 = vpop.eup %1700 }
 0xf64   :  { %v1037_v3 = vadd.f32 1.0, %v1701_v63  ;;  %v1703_v11 = vpop.eup %1702 }
 0xf66   :  { %1704 = vrcp.f32 %v1037_v3 }
 0xf70   :  { %v1705_v1 = vpop.eup %1704 }
 0xf71   :  { %v1040_v0 = vsel %vm2144_vm5, %v1703_v11, %v1705_v1 }
 0xf72   :  { %1047 = vrot.lane.b32.xlu0 %v1040_v0, %s1920_s4  ;;  %v1045_v37 = vmul.f32 %v1043_v34, %v1040_v0 }
 0xfe4   :  { %v1048_v14 = vpop.permute.xlu0 %1047 }
 0xfe5   :  { %v1050_v4 = vmul.f32 %v1048_v14, %v1040_v0 }
 0xfe7   :  { %1052 = vrot.lane.b32.xlu0 %v1050_v4, %s1921_s3 }
 0xfeb   :  { %1066 = vperm.xlu0 %1659, %v2212_v21  }
0x1059   :  { %v1053_v41 = vpop.permute.xlu0 %1052 }
0x105a   :  { %v1055_v5 = vadd.f32 %v1053_v41, %v1045_v37 }
0x105c   :  { %1706 = vtanh.f32 %v1055_v5 }
0x1066   :  { %v1707_v6 = vpop.eup %1706 }
0x1067   :  { %1058 = vrot.lane.b32.xlu1 %v1707_v6, %s1920_s4 }
0x106a   :  { %v1067_v10 = vpop.permute.xlu0 %1066 }
0x106b   :  { %1071 = vperm.xlu1 %1658, %v2208_v16  }
0x106f   :  { %1082 = vrot.lane.b32.xlu1 %v1055_v5, %s1923_s27 }
0x10d9   :  { %v1059_v8 = vpop.permute.xlu1 %1058 }
0x10da   :  { %v1061_v9 = vmul.f32 %v1059_v8, %v1040_v0 }
0x10dc   :  { %1077 = vrot.lane.b32.xlu0 %v1061_v9, %s1921_s3 }
0x10ea   :  { %v1072_v12 = vpop.permute.xlu1 %1071 }
0x10eb   :  { %v1074_v21 = vsel %vm270_vm6, %v1067_v10, %v1072_v12 }
0x10ec   :  { %vm1075_vm12 = vcmp.gt.f32.partialorder %v1074_v21, 0.5 }
0x10ee   :  { %v1083_v13 = vpop.permute.xlu1 %1082 }
0x10ef   :  { %v1085_v15 = vsel %vm1075_vm12, %v1083_v13, %v951_v56 }
0x10f0   :  { %1176 = vrot.lane.b32.xlu1 %v1085_v15, %s1921_s3 }
0x114e   :  { %v1078_v40 = vpop.permute.xlu0 %1077 }
0x114f   :  { %v1080_v17 = vsel %vm1075_vm12, %v1078_v40, %v946_v59 }
0x1150   :  { %1087 = vst.msk [vmem:[#allocation12 + $0x28] sm:$0xff] %vm110_vm1, %v1080_v17  ;;  %1089 = vst.msk [vmem:[#allocation13 + $0x10] sm:$0xff] %vm110_vm1, %v1080_v17  ;;  %1572 = vmatmul.mubr.msk.f32.vlgmr.msra.gmra.mrb[12].mxu0 %vm110_vm1, %v1080_v17 }
0x1162   :  { %v1177_v26 = vpop.permute.xlu1 %1176 }
0x1223   :  { %v1162_v16 = vpop.f32.mrb[12].mxu0 }
0x1224   :  { %v1166_v18 = vadd.f32 %v1162_v16, %v1092_v53  ;;  %v1573_v19 = vpop.f32.mrb[13].mxu0 }
0x1226   :  { %v1422_v20 = vmul.f32 -1.442695, %v1166_v18 }
0x1228   :  { %1708 = vpow2.f32 %v1422_v20 }
0x1229   :  { %1710 = vtanh.f32 %v1166_v18 }
0x1232   :  { %v1709_v22 = vpop.eup %1708 }
0x1233   :  { %v1171_v23 = vadd.f32 1.0, %v1709_v22  ;;  %v1711_v24 = vpop.eup %1710 }
0x1235   :  { %1712 = vrcp.f32 %v1171_v23 }
0x123f   :  { %v1713_v27 = vpop.eup %1712 }
0x1240   :  { %v1174_v28 = vsel %vm2144_vm5, %v1711_v24, %v1713_v27 }
0x1241   :  { %1181 = vrot.lane.b32.xlu0 %v1174_v28, %s1920_s4  ;;  %v1179_v48 = vmul.f32 %v1177_v26, %v1174_v28 }
0x12b3   :  { %v1182_v29 = vpop.permute.xlu0 %1181 }
0x12b4   :  { %v1184_v30 = vmul.f32 %v1182_v29, %v1174_v28 }
0x12b6   :  { %1186 = vrot.lane.b32.xlu0 %v1184_v30, %s1921_s3 }
0x12ba   :  { %1200 = vperm.xlu0 %1659, %v2182_v51  }
0x1328   :  { %v1187_v53 = vpop.permute.xlu0 %1186 }
0x1329   :  { %v1189_v31 = vadd.f32 %v1187_v53, %v1179_v48 }
0x132b   :  { %1714 = vtanh.f32 %v1189_v31 }
0x1335   :  { %v1715_v32 = vpop.eup %1714 }
0x1336   :  { %1192 = vrot.lane.b32.xlu1 %v1715_v32, %s1920_s4 }
0x1339   :  { %v1201_v35 = vpop.permute.xlu0 %1200 }
0x133a   :  { %1205 = vperm.xlu1 %1658, %v2178_v33  }
0x133e   :  { %1216 = vrot.lane.b32.xlu1 %v1189_v31, %s1923_s27 }
0x13a8   :  { %v1193_v39 = vpop.permute.xlu1 %1192 }
0x13a9   :  { %v1195_v44 = vmul.f32 %v1193_v39, %v1174_v28 }
0x13ab   :  { %1211 = vrot.lane.b32.xlu0 %v1195_v44, %s1921_s3 }
0x13b9   :  { %v1206_v38 = vpop.permute.xlu1 %1205 }
0x13ba   :  { %v1208_v51 = vsel %vm270_vm6, %v1201_v35, %v1206_v38 }
0x13bb   :  { %vm1209_vm13 = vcmp.gt.f32.partialorder %v1208_v51, 0.5 }
0x13bd   :  { %v1217_v42 = vpop.permute.xlu1 %1216 }
0x13be   :  { %v1219_v47 = vsel %vm1209_vm13, %v1217_v42, %v1085_v15 }
0x13bf   :  { %1310 = vrot.lane.b32.xlu1 %v1219_v47, %s1921_s3 }
0x141d   :  { %v1212_v49 = vpop.permute.xlu0 %1211 }
0x141e   :  { %v1214_v52 = vsel %vm1209_vm13, %v1212_v49, %v1080_v17 }
0x141f   :  { %1221 = vst.msk [vmem:[#allocation12 + $0x30] sm:$0xff] %vm110_vm1, %v1214_v52  ;;  %1223 = vst.msk [vmem:[#allocation13 + $0x8] sm:$0xff] %vm110_vm1, %v1214_v52  ;;  %1583 = vmatmul.mubr.msk.f32.vlgmr.msra.gmra.mrb[8].mxu1 %vm110_vm1, %v1214_v52 }
0x1431   :  { %v1311_v45 = vpop.permute.xlu1 %1310 }
0x14f2   :  { %v1296_v33 = vpop.f32.mrb[8].mxu1 }
0x14f3   :  { %v1300_v54 = vadd.f32 %v1296_v33, %v1226_v50  ;;  %v1584_v55 = vpop.f32.mrb[9].mxu1 }
0x14f5   :  { %v1424_v56 = vmul.f32 -1.442695, %v1300_v54 }
0x14f7   :  { %1716 = vpow2.f32 %v1424_v56 }
0x14f8   :  { %1718 = vtanh.f32 %v1300_v54 }
0x1501   :  { %v1717_v58 = vpop.eup %1716 }
0x1502   :  { %v1305_v59 = vadd.f32 1.0, %v1717_v58  ;;  %v1719_v60 = vpop.eup %1718 }
0x1504   :  { %1720 = vrcp.f32 %v1305_v59 }
0x150e   :  { %v1721_v61 = vpop.eup %1720 }
0x150f   :  { %v1308_v43 = vsel %vm2144_vm5, %v1719_v60, %v1721_v61 }
0x1510   :  { %1315 = vrot.lane.b32.xlu0 %v1308_v43, %s1920_s4  ;;  %v1313_v46 = vmul.f32 %v1311_v45, %v1308_v43 }
0x1582   :  { %v1316_v62 = vpop.permute.xlu0 %1315 }
0x1583   :  { %v1318_v36 = vmul.f32 %v1316_v62, %v1308_v43 }
0x1585   :  { %1320 = vrot.lane.b32.xlu0 %v1318_v36, %s1921_s3 }
0x1589   :  { %1334 = vperm.xlu0 %1659, %v2152_v2  }
0x15f7   :  { %v1321_v50 = vpop.permute.xlu0 %1320 }
0x15f8   :  { %v1323_v63 = vadd.f32 %v1321_v50, %v1313_v46 }
0x15fa   :  { %1722 = vtanh.f32 %v1323_v63 }
0x1604   :  { %v1723_v3 = vpop.eup %1722 }
0x1605   :  { %1326 = vrot.lane.b32.xlu1 %v1723_v3, %s1920_s4 }
0x1608   :  { %v1335_v0 = vpop.permute.xlu0 %1334 }
0x1609   :  { %1339 = vperm.xlu1 %1658, %v2156_v7  }
0x1677   :  { %v1327_v57 = vpop.permute.xlu1 %1326 }
0x1678   :  { %v1329_v11 = vmul.f32 %v1327_v57, %v1308_v43 }
0x167a   :  { %1345 = vrot.lane.b32.xlu0 %v1329_v11, %s1921_s3 }
0x1688   :  { %v1340_v1 = vpop.permute.xlu1 %1339 }
0x1689   :  { %v1342_v14 = vsel %vm270_vm6, %v1335_v0, %v1340_v1 }
0x168a   :  { %vm1343_vm14 = vcmp.gt.f32.partialorder %v1342_v14, 0.5 }
0x16ec   :  { %v1346_v2 = vpop.permute.xlu0 %1345 }
0x16ed   :  { %v1348_v4 = vsel %vm1343_vm14, %v1346_v2, %v1214_v52 }
0x16ee   :  { %1350 = vst.msk [vmem:[#allocation12 + $0x38] sm:$0xff] %vm110_vm1, %v1348_v4  ;;  %1351 = vst.msk [vmem:[#allocation13] sm:$0xff] %vm110_vm1, %v1348_v4 }
0x16ef   :  { %1352 = vst.msk [vmem:[#allocation15] sm:$0xff] %vm110_vm1, %v1348_v4 }
0x16f0   :  { %1845 = shalt.err (!%p1842_p2)
}
0x16f1   :  { %s1846_s0 = scalar_lea.hbm %s2395_s6, 1024 }
0x16f2   :  { %p1847_p3 = scmp.ne.s32.totalorder %s2395_s6, %s1846_s0  ;;  %p1850_p4 = scmp.lt.u32.totalorder %s1846_s0, %s2395_s6 }
0x16f4   :  { %p1852_p5 = pnand %p1850_p4, %p1847_p3 }
0x16f6   :  { %1855 = shalt.err (!%p1852_p5)
}
0x16f7   :  { %1376 = dma.vmem_to_hbm [thread:$0]  %s1371_s19, 1024, %s2395_s6, [#allocation14], %s1912_s13, %s1912_s13, %s1913_s14  }
0x16f8   :  { %s1856_s11 = scalar_lea.vmem %s2330_s21, 1024  ;;  %p1861_p7 = scmp.lt.s32.totalorder %s2330_s21, %s2330_s21 }
0x16f9   :  { %p1857_p6 = scmp.ne.s32.totalorder %s2330_s21, %s1856_s11  ;;  %p1862_p8 = scmp.lt.s32.totalorder %s1856_s11, %s1856_s11 }
0x16fb   :  { %p1863_p9 = por %p1862_p8, %p1861_p7 }
0x16fd   :  { %p1864_p10 = pnand %p1863_p9, %p1857_p6 }
0x16ff   :  { %1867 = shalt.err (!%p1864_p10)
}
0x1700   :  { %s1868_s16 = scalar_lea.hbm %s2394_s5, 1024 }
0x1701   :  { %p1869_p11 = scmp.ne.s32.totalorder %s2394_s5, %s1868_s16  ;;  %p1872_p12 = scmp.lt.u32.totalorder %s1868_s16, %s2394_s5 }
0x1703   :  { %p1874_p13 = pnand %p1872_p12, %p1869_p11 }
0x1705   :  { %1877 = shalt.err (!%p1874_p13)
}
0x1706   :  { %1364 = dma.vmem_to_hbm [thread:$0]  %s2330_s21, 1024, %s2394_s5, [#allocation5], %s1912_s13, %s1912_s13, %s1913_s14  }
0x1707   :  { %s1878_s27 = scalar_lea.vmem %s2335_s23, 128  ;;  %p1883_p1 = scmp.lt.s32.totalorder %s2335_s23, %s2335_s23 }
0x1708   :  { %p1879_p0 = scmp.ne.s32.totalorder %s2335_s23, %s1878_s27  ;;  %p1884_p2 = scmp.lt.s32.totalorder %s1878_s27, %s1878_s27 }
0x170a   :  { %p1885_p3 = por %p1884_p2, %p1883_p1 }
0x170c   :  { %p1886_p4 = pnand %p1885_p3, %p1879_p0 }
0x170e   :  { %1889 = shalt.err (!%p1886_p4)
}
0x170f   :  { %s1890_s20 = scalar_lea.hbm %s2396_s7, 128 }
0x1710   :  { %p1891_p5 = scmp.ne.s32.totalorder %s2396_s7, %s1890_s20  ;;  %p1894_p6 = scmp.lt.u32.totalorder %s1890_s20, %s2396_s7 }
0x1712   :  { %p1896_p7 = pnand %p1894_p6, %p1891_p5 }
0x1714   :  { %1899 = shalt.err (!%p1896_p7)
}
0x1715   :  { %1386 = dma.vmem_to_hbm [thread:$0]  %s2335_s23, 128, %s2396_s7, [#allocation14]  }
0x1716   :  { %1906 = dma.done.wait [#allocation5], 1024  }
0x1717   :  { %1907 = vsyncadd [#allocation5], 4294966272 }
0x1718   :  { %1908 = dma.done.wait [#allocation14], 1152  }
0x1719   :  { %1909 = vsyncadd [#allocation14], 4294966144 }
0x171a   :  { %1396 = vsyncpa [#allocation4], 1 }
0x171b   :  { %1397 = vsyncpa [#allocation7], 1 }
0x171c   :  { %1398 = vsyncpa [#allocation10], 1 }
0x171d   :  { %1399 = vsyncpa [#allocation5], 1 }
0x171e   :  { %1400 = vsyncpa [#allocation14], 1 }

</bundles_post_ra>
